<compile_context>
chip_gen: v6e
topology: v6e:2x2x1
jax: 0.10.0
libtpu: 0.0.40
codegen_flags: <defaults>
</compile_context>

<pallas_src>
import math

import jax
import jax.numpy as jnp
from jax.experimental import pallas as pl
from jax.experimental.pallas import tpu as pltpu


# --- network dims -------------------------------------------------------------
IN_DIM = 24      # observation size
H1 = 64
H2 = 32
OUT_DIM = 4      # action size
OUT_PAD = 8      # padded output features (cols 4..7 are zeros -> tanh(0)=0)

# --- packed weight slab layout (rows x 128 lanes) ------------------------------
# rows [  0,  24) cols [0, 64) : W1  (in=24, out=64)   (transposed PyTorch weight)
# rows [ 24,  88) cols [0, 32) : W2  (in=64, out=32)
# rows [ 88, 120) cols [0,  8) : W3  (in=32, out=8)    (cols 4..7 zero)
# row  120        cols [0, 64) : b1
# row  121        cols [0, 32) : b2
# row  122        cols [0,  8) : b3                    (cols 4..7 zero)
_W1_R0 = 0
_W2_R0 = _W1_R0 + IN_DIM          # 24
_W3_R0 = _W2_R0 + H1              # 88
_B1_R = _W3_R0 + H2               # 120
_B2_R = _B1_R + 1                 # 121
_B3_R = _B2_R + 1                 # 122
SLAB_ROWS = 128
SLAB_COLS = 128

# --- tiling knobs ---------------------------------------------------------------
_CHUNK = 256          # in-kernel batch sub-tile (sublane chunk), multiple of 8
_DEFAULT_TILE = 2048  # per-grid-step batch tile (multiple of _CHUNK)
_MAX_TILE = 4096      # keeps double-buffered VMEM footprint ~5 MB on every gen


def munet_kernel(x_ref, w_ref, out_ref):
    """One batch tile: x_ref (TM, 24) -> out_ref (TM, 8)."""
    cdt = w_ref.dtype  # MXU operand dtype (f32 or bf16); accumulation is f32.

    # Static slices of the resident slab; loaded once per grid step (hoisted
    # out of the unrolled chunk loop by construction).
    w1 = w_ref[_W1_R0:_W1_R0 + IN_DIM, 0:H1]            # (24, 64)
    w2 = w_ref[_W2_R0:_W2_R0 + H1, 0:H2]                # (64, 32)
    w3 = w_ref[_W3_R0:_W3_R0 + H2, 0:OUT_PAD]           # (32, 8)
    b1 = w_ref[_B1_R:_B1_R + 1, 0:H1].astype(jnp.float32)       # (1, 64)
    b2 = w_ref[_B2_R:_B2_R + 1, 0:H2].astype(jnp.float32)       # (1, 32)
    b3 = w_ref[_B3_R:_B3_R + 1, 0:OUT_PAD].astype(jnp.float32)  # (1, 8)

    tm = x_ref.shape[0]
    # Fully-unrolled static chunk loop: static (aligned) offsets, each chunk's
    # intermediates die at its store, so the outer tile can be large without
    # vreg spill.  Trip count is tm // _CHUNK <= 16.
    for c in range(tm // _CHUNK):
        lo = c * _CHUNK
        xc = x_ref[lo:lo + _CHUNK, :].astype(cdt)                            # (C, 24)
        h1 = jnp.dot(xc, w1, preferred_element_type=jnp.float32) + b1        # (C, 64)
        h1 = jnp.maximum(h1, 0.0)
        h2 = jnp.dot(h1.astype(cdt), w2, preferred_element_type=jnp.float32) + b2
        h2 = jnp.maximum(h2, 0.0)                                            # (C, 32)
        mu = jnp.dot(h2.astype(cdt), w3, preferred_element_type=jnp.float32) + b3
        out_ref[lo:lo + _CHUNK, :] = jnp.tanh(mu).astype(out_ref.dtype)      # (C, 8)


def _round_up(n, m):
    return ((n + m - 1) // m) * m


def _choose_tile(batch, tile_b):
    """Batch tile TM: multiple of _CHUNK, <= batch whenever batch >= _CHUNK."""
    tm_max = max(_CHUNK, min(_MAX_TILE, (int(tile_b) // _CHUNK) * _CHUNK))
    if batch < _CHUNK:
        return _CHUNK
    tm = min(tm_max, (batch // _CHUNK) * _CHUNK)
    # v7x megacore: prefer >= 2 grid tiles so both TensorCores get work.
    if pl.cdiv(batch, tm) < 2 and batch >= 2 * _CHUNK:
        tm = max(_CHUNK, _round_up((batch + 1) // 2, _CHUNK))
    return tm


def munet_forward(x, packed_w, tile_b=_DEFAULT_TILE):
    """x: (B, 24) observations -> (B, 4) tanh actions."""
    if x.ndim != 2 or x.shape[1] != IN_DIM:
        raise ValueError(f"expected (B, {IN_DIM}) input, got {x.shape}")
    B = x.shape[0]
    TM = _choose_tile(B, tile_b)

    if B < TM:
        # Only tiny batches (< one chunk) get padded; large batches are read
        # directly from their original HBM buffer (no extra pass).
        x_in = jnp.zeros((TM, IN_DIM), x.dtype).at[:B, :].set(x)
    else:
        x_in = x

    grid = pl.cdiv(x_in.shape[0], TM)
    # NOTE: padded / overhanging batch rows are garbage after fc1 (relu(b1) != 0
    # propagates); correctness relies on the [:B] slice below — never reduce
    # over the batch axis inside this kernel.

    out = pl.pallas_call(
        munet_kernel,
        out_shape=jax.ShapeDtypeStruct((grid * TM, OUT_PAD), jnp.float32),
        grid_spec=pltpu.PrefetchScalarGridSpec(
            num_scalar_prefetch=0,
            grid=(grid,),
            in_specs=[
                # x streams in natural (B, 24) layout: contiguous HBM reads,
                # boundary tile handled by Pallas masking.
                pl.BlockSpec((TM, IN_DIM), lambda i: (i, 0)),
                # Single packed weight slab; constant block index -> DMA'd once,
                # VMEM-resident across every batch tile.
                pl.BlockSpec((SLAB_ROWS, SLAB_COLS), lambda i: (0, 0)),
            ],
            out_specs=pl.BlockSpec((TM, OUT_PAD), lambda i: (i, 0)),
        ),
        compiler_params=pltpu.CompilerParams(
            dimension_semantics=("parallel",),  # v7x: shard batch tiles over 2 TCs
        ),
    )(x_in, packed_w)

    return out[:B, :OUT_DIM]


# --- parameter init / packing / reference ---------------------------------------
def init_linear(key, fan_in, fan_out):
    # PyTorch nn.Linear default init: U(-1/sqrt(fan_in), 1/sqrt(fan_in)),
    # weight stored (out, in) like PyTorch.
    kw, kb = jax.random.split(key)
    bound = 1.0 / math.sqrt(fan_in)
    w = jax.random.uniform(kw, (fan_out, fan_in), jnp.float32, -bound, bound)
    b = jax.random.uniform(kb, (fan_out,), jnp.float32, -bound, bound)
    return w, b


def init_munet_params(key):
    k1, k2, k3 = jax.random.split(key, 3)
    return (init_linear(k1, IN_DIM, H1),   # fc1
            init_linear(k2, H1, H2),       # fc2
            init_linear(k3, H2, OUT_DIM))  # fc_mu


def pack_munet_params(params, dtype=jnp.float32):
    (w1, b1), (w2, b2), (w3, b3) = params
    slab = jnp.zeros((SLAB_ROWS, SLAB_COLS), jnp.float32)
    slab = slab.at[_W1_R0:_W1_R0 + IN_DIM, 0:H1].set(w1.T)       # (24, 64)
    slab = slab.at[_W2_R0:_W2_R0 + H1, 0:H2].set(w2.T)           # (64, 32)
    slab = slab.at[_W3_R0:_W3_R0 + H2, 0:OUT_DIM].set(w3.T)      # (32, 4), rest 0
    slab = slab.at[_B1_R, 0:H1].set(b1)
    slab = slab.at[_B2_R, 0:H2].set(b2)
    slab = slab.at[_B3_R, 0:OUT_DIM].set(b3)
    return slab.astype(dtype)


def munet_reference(x, params):
    (w1, b1), (w2, b2), (w3, b3) = params
    h1 = jnp.maximum(x @ w1.T + b1, 0.0)
    h2 = jnp.maximum(h1 @ w2.T + b2, 0.0)
    return jnp.tanh(h2 @ w3.T + b3)


if __name__ == "__main__":
    # Make the pure-JAX reference (and the in-kernel dots) use full f32 matmul
    # precision so the tolerance below is meaningful on TPU.
    jax.config.update("jax_default_matmul_precision", "highest")

    key = jax.random.PRNGKey(0)
    kp, kx = jax.random.split(key)
    params = init_munet_params(kp)
    packed_w = pack_munet_params(params)

    B = 8  # small batch of 24-dim observations (BipedalWalker-style state)
    x = jax.random.normal(kx, (B, IN_DIM), jnp.float32)

    mu = jax.block_until_ready(munet_forward(x, packed_w))
    ref = munet_reference(x, params)

    assert mu.shape == (B, OUT_DIM), mu.shape
    assert jnp.allclose(mu, ref, atol=2e-3, rtol=2e-3), "mismatch vs reference"
    print("KERNEL_OK")
</pallas_src>

<mosaic_0001>
module attributes {stable_mosaic.version = 11 : i64} {
  func.func @munet_kernel(%arg0: i32, %arg1: memref<256x24xf32, #tpu.memory_space<vmem>>, %arg2: memref<128x128xf32, #tpu.memory_space<vmem>>, %arg3: memref<256x8xf32, #tpu.memory_space<vmem>>) attributes {dimension_semantics = [#tpu.dimension_semantics<parallel>], iteration_bounds = array<i64: 1>, scalar_prefetch = 0 : i64, scratch_operands = 0 : i64, tpu.core_type = #tpu.core_type<tc>, window_params = [{transform_indices = @transform_0, window_bounds = array<i64: 256, 24>}, {pipeline_mode = #tpu.pipeline_mode<synchronous>, transform_indices = @transform_1, window_bounds = array<i64: 128, 128>}, {transform_indices = @transform_2, window_bounds = array<i64: 256, 8>}]} {
    %c0 = arith.constant 0 : index
    %c0_0 = arith.constant 0 : index
    %0 = vector.load %arg2[%c0, %c0_0] : memref<128x128xf32, #tpu.memory_space<vmem>>, vector<24x64xf32>
    %c24 = arith.constant 24 : index
    %c0_1 = arith.constant 0 : index
    %1 = vector.load %arg2[%c24, %c0_1] : memref<128x128xf32, #tpu.memory_space<vmem>>, vector<64x32xf32>
    %c88 = arith.constant 88 : index
    %c0_2 = arith.constant 0 : index
    %2 = vector.load %arg2[%c88, %c0_2] : memref<128x128xf32, #tpu.memory_space<vmem>>, vector<32x8xf32>
    %c120 = arith.constant 120 : index
    %c0_3 = arith.constant 0 : index
    %3 = vector.load %arg2[%c120, %c0_3] : memref<128x128xf32, #tpu.memory_space<vmem>>, vector<1x64xf32>
    %c121 = arith.constant 121 : index
    %c0_4 = arith.constant 0 : index
    %4 = vector.load %arg2[%c121, %c0_4] : memref<128x128xf32, #tpu.memory_space<vmem>>, vector<1x32xf32>
    %c122 = arith.constant 122 : index
    %c0_5 = arith.constant 0 : index
    %5 = vector.load %arg2[%c122, %c0_5] : memref<128x128xf32, #tpu.memory_space<vmem>>, vector<1x8xf32>
    %c0_6 = arith.constant 0 : index
    %c0_7 = arith.constant 0 : index
    %6 = vector.load %arg1[%c0_6, %c0_7] : memref<256x24xf32, #tpu.memory_space<vmem>>, vector<256x24xf32>
    %cst = arith.constant dense<0.000000e+00> : vector<256x64xf32>
    %7 = tpu.matmul %6, %0, %cst {dimension_numbers = #tpu.dot_dimension_numbers<[1], [0], [0], [1], [0, 0, 1, 1], [], []>, precision = #tpu.contract_precision<fp32>} : vector<256x24xf32>, vector<24x64xf32>, vector<256x64xf32> -> vector<256x64xf32>
    %8 = vector.broadcast %3 : vector<1x64xf32> to vector<256x64xf32>
    %9 = arith.addf %7, %8 : vector<256x64xf32>
    %cst_8 = arith.constant 0.000000e+00 : f32
    %10 = vector.broadcast %cst_8 : f32 to vector<256x64xf32>
    %11 = arith.maximumf %9, %10 : vector<256x64xf32>
    %cst_9 = arith.constant dense<0.000000e+00> : vector<256x32xf32>
    %12 = tpu.matmul %11, %1, %cst_9 {dimension_numbers = #tpu.dot_dimension_numbers<[1], [0], [0], [1], [0, 0, 1, 1], [], []>, precision = #tpu.contract_precision<fp32>} : vector<256x64xf32>, vector<64x32xf32>, vector<256x32xf32> -> vector<256x32xf32>
    %13 = vector.broadcast %4 : vector<1x32xf32> to vector<256x32xf32>
    %14 = arith.addf %12, %13 : vector<256x32xf32>
    %cst_10 = arith.constant 0.000000e+00 : f32
    %15 = vector.broadcast %cst_10 : f32 to vector<256x32xf32>
    %16 = arith.maximumf %14, %15 : vector<256x32xf32>
    %cst_11 = arith.constant dense<0.000000e+00> : vector<256x8xf32>
    %17 = tpu.matmul %16, %2, %cst_11 {dimension_numbers = #tpu.dot_dimension_numbers<[1], [0], [0], [1], [0, 0, 1, 1], [], []>, precision = #tpu.contract_precision<fp32>} : vector<256x32xf32>, vector<32x8xf32>, vector<256x8xf32> -> vector<256x8xf32>
    %18 = vector.broadcast %5 : vector<1x8xf32> to vector<256x8xf32>
    %19 = arith.addf %17, %18 : vector<256x8xf32>
    %20 = math.tanh %19 : vector<256x8xf32>
    %c0_12 = arith.constant 0 : index
    %c0_13 = arith.constant 0 : index
    %21 = vector.load %arg3[%c0_12, %c0_13] : memref<256x8xf32, #tpu.memory_space<vmem>>, vector<256x8xf32>
    tpu.vector_store %arg3[%c0_12, %c0_13], %20 {strides = array<i32>} : memref<256x8xf32, #tpu.memory_space<vmem>>, vector<256x8xf32>,
    return
  }
  func.func @transform_0(%arg0: i32) -> (i32, i32) {
    %c0_i32 = arith.constant 0 : i32
    %c0_i32_0 = arith.constant 0 : i32
    return %arg0, %c0_i32 : i32, i32
  }
  func.func @transform_1(%arg0: i32) -> (i32, i32) {
    %c0_i32 = arith.constant 0 : i32
    %c0_i32_0 = arith.constant 0 : i32
    %c0_i32_1 = arith.constant 0 : i32
    return %c0_i32, %c0_i32_0 : i32, i32
  }
  func.func @transform_2(%arg0: i32) -> (i32, i32) {
    %c0_i32 = arith.constant 0 : i32
    %c0_i32_0 = arith.constant 0 : i32
    return %arg0, %c0_i32 : i32, i32
  }
}

</mosaic_0001>

<bundles_post_ra>
// kernel: tpu_custom_call.1
= control target key start
LH: loop header
LB: loop body
LE: loop exit
PB: predicated region body
PF: predicated region fallthrough
CT: control target
= control target key end

     0   :  { %vm65_vm0 = vcmask 195584   ;;  %vm2003_vm1 = vcmask 523264   ;;  %vm4006_vm2 = vcmask 261120   ;;  %vm5953_vm3 = vcmask 64512   ;;  %s11213_s1 = inlined_call_operand.vmem [shape: f32[128,128], index: 1, kind: input, shape index: {}]   ;;  %s11214_s0 = inlined_call_operand.vmem [shape: f32[256,24], index: 0, kind: input, shape index: {}]   ;;  %s11215_s2 = inlined_call_operand.vmem [shape: f32[256,8], index: 2, kind: output, shape index: {}]  }
   0x1   :  { %v13_v0 = vld [vmem:[%s11213_s1 + $0x10] sm:$0xff]  ;;  %v12_v1 = vld [vmem:[%s11213_s1 + $0x8] sm:$0xff]  ;;  %v11_v2 = vld [vmem:[%s11213_s1] sm:$0xff] }
   0x2   :  { %v7791_v3 = vand.u32 4294901760, %v13_v0  ;;  %v7793_v4 = vand.u32 4294901760, %v12_v1  ;;  %v7795_v5 = vand.u32 4294901760, %v11_v2  ;;  %v29_v6 = vld [vmem:[%s11214_s0] sm:$0xff]  ;;  %v30_v7 = vld [vmem:[%s11214_s0 + $0x8] sm:$0xff]  ;;  %v31_v8 = vld [vmem:[%s11214_s0 + $0x10] sm:$0xff] }
   0x3   :  { %v67_v9 = vsel %vm65_vm0, %v29_v6, 0  ;;  %v70_v10 = vsel %vm65_vm0, %v30_v7, 0  ;;  %v73_v11 = vsel %vm65_vm0, %v31_v8, 0  ;;  %v32_v12 = vld [vmem:[%s11214_s0 + $0x18] sm:$0xff]  ;;  %v33_v13 = vld [vmem:[%s11214_s0 + $0x20] sm:$0xff]  ;;  %v34_v38 = vld [vmem:[%s11214_s0 + $0x28] sm:$0xff] }
   0x4   :  { %6659 = vmatprep.subr.mxu0 %v7791_v3  ;;  %v7817_v14 = vsub.f32 %v13_v0, %v7791_v3  ;;  %v7819_v15 = vand.u32 4294901760, %v67_v9  ;;  %v7821_v16 = vand.u32 4294901760, %v70_v10  ;;  %v7824_v17 = vsub.f32 %v12_v1, %v7793_v4  ;;  %v35_v39 = vld [vmem:[%s11214_s0 + $0x30] sm:$0xff]  ;;  %v36_v48 = vld [vmem:[%s11214_s0 + $0x38] sm:$0xff]  ;;  %v37_v49 = vld [vmem:[%s11214_s0 + $0x40] sm:$0xff] }
   0x5   :  { %6660 = vmatpush3.msra.mxu0 %v7791_v3  ;;  %v7828_v18 = vsub.f32 %v11_v2, %v7795_v5  ;;  %v7830_v19 = vand.u32 4294901760, %v73_v11  ;;  %v76_v20 = vsel %vm65_vm0, %v32_v12, 0  ;;  %v79_v21 = vsel %vm65_vm0, %v33_v13, 0  ;;  %v38_v50 = vld [vmem:[%s11214_s0 + $0x48] sm:$0xff]  ;;  %v39_v59 = vld [vmem:[%s11214_s0 + $0x50] sm:$0xff]  ;;  %v40_v0 = vld [vmem:[%s11214_s0 + $0x58] sm:$0xff] }
   0x6   :  { %11474 = vst [vmem:[#allocation2_spill] sm:$0xff] %v7821_v16  ;;  %6661 = vmatprep.subr.mxu0 %v7793_v4  ;;  %v7836_v22 = vand.u32 4294901760, %v7817_v14  ;;  %v7839_v23 = vsub.f32 %v67_v9, %v7819_v15  ;;  %v7842_v24 = vsub.f32 %v70_v10, %v7821_v16  ;;  %v7845_v25 = vand.u32 4294901760, %v7824_v17  ;;  %6719 = vmatprep.mubr.f32.mxu1 %v7819_v15  ;;  %v41_v12 = vld [vmem:[%s11214_s0 + $0x60] sm:$0xff] }
   0x7   :  { %11475 = vst [vmem:[#allocation3_spill] sm:$0xff] %v7830_v19  ;;  %6662 = vmatpush3.msra.mxu0 %v7793_v4  ;;  %v7850_v26 = vand.u32 4294901760, %v7828_v18  ;;  %v7853_v27 = vsub.f32 %v73_v11, %v7830_v19  ;;  %v7855_v28 = vand.u32 4294901760, %v76_v20  ;;  %v7857_v29 = vand.u32 4294901760, %v79_v21 }
   0x8   :  { %6663 = vmatprep.subr.mxu0 %v7795_v5  ;;  %v580_v30 = vsub.f32 %v7817_v14, %v7836_v22  ;;  %v11231_v31 = vand.u32 4294901760, %v7839_v23  ;;  %v11230_v32 = vand.u32 4294901760, %v7842_v24  ;;  %v587_v33 = vsub.f32 %v7824_v17, %v7845_v25 }
   0x9   :  { %11476 = vst [vmem:[#allocation4_spill] sm:$0xff] %v7855_v28  ;;  %11477 = vst [vmem:[#allocation5_spill] sm:$0xff] %v7857_v29  ;;  %6664 = vmatpush3.msra.mxu0 %v7795_v5  ;;  %v594_v34 = vsub.f32 %v7828_v18, %v7850_v26  ;;  %v11229_v35 = vand.u32 4294901760, %v7853_v27  ;;  %v7871_v36 = vsub.f32 %v76_v20, %v7855_v28  ;;  %v82_v53 = vsel %vm65_vm0, %v34_v38, 0 }
   0xa   :  { %v7874_v37 = vsub.f32 %v79_v21, %v7857_v29  ;;  %v581_v40 = vand.u32 4294901760, %v580_v30  ;;  %v233_v41 = vsub.f32 %v7839_v23, %v11231_v31  ;;  %v243_v42 = vsub.f32 %v7842_v24, %v11230_v32  ;;  %6767 = vmatprep.subr.mxu0 %v7817_v14 }
   0xb   :  { %v588_v43 = vand.u32 4294901760, %v587_v33  ;;  %v595_v44 = vand.u32 4294901760, %v594_v34  ;;  %v253_v45 = vsub.f32 %v7853_v27, %v11229_v35  ;;  %v11227_v46 = vand.u32 4294901760, %v7871_v36 }
   0xc   :  { %v11225_v47 = vand.u32 4294901760, %v7874_v37  ;;  %6713 = vmatprep.subr.mxu1 %v581_v40  ;;  %v234_v51 = vand.u32 4294901760, %v233_v41  ;;  %v244_v52 = vand.u32 4294901760, %v243_v42  ;;  %v85_v54 = vsel %vm65_vm0, %v35_v39, 0 }
   0xd   :  { %6714 = vmatpush3.msra.mxu1 %v581_v40  ;;  %v254_v55 = vand.u32 4294901760, %v253_v45  ;;  %v263_v56 = vsub.f32 %v7871_v36, %v11227_v46  ;;  %v7911_v58 = vand.u32 4294901760, %v82_v53  ;;  %v7916_v60 = vand.u32 4294901760, %v85_v54 }
   0xe   :  { %v273_v57 = vsub.f32 %v7874_v37, %v11225_v47  ;;  %6665 = vmatprep.mubr.f32.mxu0 %v234_v51  ;;  %6715 = vmatprep.subr.mxu1 %v588_v43  ;;  %v88_v61 = vsel %vm65_vm0, %v36_v48, 0  ;;  %v91_v62 = vsel %vm65_vm0, %v37_v49, 0  ;;  %v94_v63 = vsel %vm65_vm0, %v38_v50, 0  ;;  %v42_v49 = vld [vmem:[%s11214_s0 + $0x68] sm:$0xff] }
   0xf   :  { %11478 = vst [vmem:[#allocation6_spill] sm:$0xff] %v7911_v58  ;;  %11479 = vst [vmem:[#allocation7_spill] sm:$0xff] %v7916_v60  ;;  %6666 = vmatmul.mubr.f32.vlgmr.msra.gmra.mxu0 %v244_v52  ;;  %6716 = vmatpush3.msra.mxu1 %v588_v43  ;;  %v264_v1 = vand.u32 4294901760, %v263_v56  ;;  %v7925_v6 = vsub.f32 %v82_v53, %v7911_v58  ;;  %v7927_v7 = vand.u32 4294901760, %v88_v61  ;;  %v7932_v9 = vand.u32 4294901760, %v91_v62 }
  0x10   :  { %v274_v2 = vand.u32 4294901760, %v273_v57  ;;  %6717 = vmatprep.subr.mxu1 %v595_v44  ;;  %6668 = vmatprep.mubr.f32.mxu0 %v254_v55  ;;  %v7930_v8 = vsub.f32 %v85_v54, %v7916_v60  ;;  %v7934_v10 = vand.u32 4294901760, %v94_v63  ;;  %v97_v11 = vsel %vm65_vm0, %v39_v59, 0  ;;  %v43_v59 = vld [vmem:[%s11214_s0 + $0x70] sm:$0xff] }
  0x11   :  { %11480 = vst [vmem:[#allocation8_spill] sm:$0xff] %v7927_v7  ;;  %11481 = vst [vmem:[#allocation9_spill] sm:$0xff] %v7932_v9  ;;  %6718 = vmatpush3.msra.mxu1 %v595_v44  ;;  %6768 = vmatpush3.msra.mxu0 %v7817_v14  ;;  %v11224_v13 = vand.u32 4294901760, %v7925_v6  ;;  %v7943_v20 = vsub.f32 %v88_v61, %v7927_v7  ;;  %v7945_v21 = vand.u32 4294901760, %v97_v11  ;;  %v100_v30 = vsel %vm65_vm0, %v40_v0, 0  ;;  %v44_v61 = vld [vmem:[%s11214_s0 + $0x78] sm:$0xff] }
  0x12   :  { %11482 = vst [vmem:[#allocation10_spill] sm:$0xff] %v7934_v10  ;;  %6720 = vmatmul.mubr.f32.vlgmr.msra.gmra.mxu1 %v7821_v16  ;;  %6821 = vmatprep.subr.mxu1 %v7791_v3  ;;  %v11222_v33 = vand.u32 4294901760, %v7930_v8  ;;  %v7952_v34 = vsub.f32 %v91_v62, %v7932_v9  ;;  %v7955_v14 = vsub.f32 %v94_v63, %v7934_v10  ;;  %v7957_v38 = vand.u32 4294901760, %v100_v30 }
  0x13   :  { %11483 = vst [vmem:[#allocation11_spill] sm:$0xff] %v7945_v21  ;;  %6669 = vmatmul.mubr.f32.gmra.mxu0 %v264_v1  ;;  %6822 = vmatpush3.msra.mxu1 %v7791_v3  ;;  %v283_v39 = vsub.f32 %v7925_v6, %v11224_v13  ;;  %v11221_v40 = vand.u32 4294901760, %v7943_v20  ;;  %v7965_v41 = vsub.f32 %v97_v11, %v7945_v21  ;;  %v103_v42 = vsel %vm65_vm0, %v41_v12, 0  ;;  %v45_v12 = vld [vmem:[%s11214_s0 + $0x80] sm:$0xff]  ;;  %v50_v13 = vld [vmem:[%s11214_s0 + $0xa8] sm:$0xff] }
  0x14   :  { %11484 = vst [vmem:[#allocation12_spill] sm:$0xff] %v7957_v38  ;;  %6671 = vmatprep.mubr.f32.mxu0 %v274_v2  ;;  %6722 = vmatprep.mubr.f32.mxu1 %v7830_v19  ;;  %v293_v43 = vsub.f32 %v7930_v8, %v11222_v33  ;;  %v11220_v44 = vand.u32 4294901760, %v7952_v34  ;;  %v11218_v45 = vand.u32 4294901760, %v7955_v14  ;;  %v7975_v48 = vsub.f32 %v100_v30, %v7957_v38  ;;  %v46_v30 = vld [vmem:[%s11214_s0 + $0x88] sm:$0xff] }
  0x15   :  { %v284_v50 = vand.u32 4294901760, %v283_v39  ;;  %v303_v51 = vsub.f32 %v7943_v20, %v11221_v40  ;;  %v11217_v52 = vand.u32 4294901760, %v7965_v41  ;;  %v7984_v53 = vand.u32 4294901760, %v103_v42  ;;  %6769 = vmatprep.subr.mxu0 %v7824_v17  ;;  %6823 = vmatprep.subr.mxu1 %v7793_v4  ;;  %v47_v39 = vld [vmem:[%s11214_s0 + $0x90] sm:$0xff] }
  0x16   :  { %6723 = vmatmul.mubr.f32.gmra.mxu1 %v7855_v28  ;;  %v294_v54 = vand.u32 4294901760, %v293_v43  ;;  %v313_v55 = vsub.f32 %v7952_v34, %v11220_v44  ;;  %v323_v56 = vsub.f32 %v7955_v14, %v11218_v45  ;;  %v11216_v57 = vand.u32 4294901760, %v7975_v48  ;;  %6770 = vmatpush3.msra.mxu0 %v7824_v17 }
  0x17   :  { %11485 = vst [vmem:[#allocation13_spill] sm:$0xff] %v7984_v53  ;;  %6672 = vmatmul.mubr.f32.gmra.mxu0 %v284_v50  ;;  %6725 = vmatprep.mubr.f32.mxu1 %v7857_v29  ;;  %v304_v62 = vand.u32 4294901760, %v303_v51  ;;  %v333_v63 = vsub.f32 %v7965_v41, %v11217_v52  ;;  %v8008_v0 = vsub.f32 %v103_v42, %v7984_v53  ;;  %v106_v17 = vsel %vm65_vm0, %v42_v49, 0 }
  0x18   :  { %6674 = vmatprep.mubr.f32.mxu0 %v294_v54  ;;  %v314_v1 = vand.u32 4294901760, %v313_v55  ;;  %v324_v2 = vand.u32 4294901760, %v323_v56  ;;  %v8011_v11 = vand.u32 4294901760, %v106_v17  ;;  %6824 = vmatpush3.msra.mxu1 %v7793_v4  ;;  %v343_v42 = vsub.f32 %v7975_v48, %v11216_v57 }
  0x19   :  { %v11219_v43 = vand.u32 4294901760, %v8008_v0  ;;  %v109_v49 = vsel %vm65_vm0, %v43_v59, 0  ;;  %v112_v50 = vsel %vm65_vm0, %v44_v61, 0  ;;  %6771 = vmatprep.subr.mxu0 %v7828_v18  ;;  %6825 = vmatprep.subr.mxu1 %v7795_v5  ;;  %v334_v51 = vand.u32 4294901760, %v333_v63  ;;  %v48_v59 = vld [vmem:[%s11214_s0 + $0x98] sm:$0xff] }
  0x1a   :  { %11486 = vst [vmem:[#allocation14_spill] sm:$0xff] %v8011_v11  ;;  %6726 = vmatmul.mubr.f32.gmra.mxu1 %v7911_v58  ;;  %v8033_v54 = vsub.f32 %v106_v17, %v8011_v11  ;;  %v8035_v55 = vand.u32 4294901760, %v109_v49  ;;  %v8037_v56 = vand.u32 4294901760, %v112_v50  ;;  %6772 = vmatpush3.msra.mxu0 %v7828_v18  ;;  %v115_v63 = vsel %vm65_vm0, %v45_v12, 0 }
  0x1b   :  { %6675 = vmatmul.mubr.f32.gmra.mxu0 %v304_v62  ;;  %6728 = vmatprep.mubr.f32.mxu1 %v7916_v60  ;;  %v353_v61 = vsub.f32 %v8008_v0, %v11219_v43  ;;  %v118_v17 = vsel %vm65_vm0, %v46_v30, 0  ;;  %v121_v57 = vsel %vm65_vm0, %v47_v39, 0  ;;  %v8057_v62 = vand.u32 4294901760, %v115_v63  ;;  %v49_v43 = vld [vmem:[%s11214_s0 + $0xa0] sm:$0xff] }
  0x1c   :  { %11487 = vst [vmem:[#allocation15_spill] sm:$0xff] %v8035_v55  ;;  %11488 = vst [vmem:[#allocation16_spill] sm:$0xff] %v8037_v56  ;;  %6677 = vmatprep.mubr.f32.mxu0 %v314_v1  ;;  %v11223_v52 = vand.u32 4294901760, %v8033_v54  ;;  %v8052_v45 = vsub.f32 %v109_v49, %v8035_v55  ;;  %v8055_v18 = vsub.f32 %v112_v50, %v8037_v56  ;;  %6826 = vmatpush3.msra.mxu1 %v7795_v5 }
  0x1d   :  { %11489 = vst [vmem:[#allocation17_spill] sm:$0xff] %v8057_v62  ;;  %v344_v12 = vand.u32 4294901760, %v343_v42  ;;  %v8063_v30 = vand.u32 4294901760, %v118_v17  ;;  %v8065_v1 = vand.u32 4294901760, %v121_v57  ;;  %v124_v39 = vsel %vm65_vm0, %v48_v59, 0  ;;  %6875 = vmatprep.subr.mxu0 %v7836_v22  ;;  %6929 = vmatprep.subr.mxu1 %v7791_v3 }
  0x1e   :  { %6729 = vmatmul.mubr.f32.gmra.mxu1 %v7927_v7  ;;  %v363_v49 = vsub.f32 %v8033_v54, %v11223_v52  ;;  %v11226_v50 = vand.u32 4294901760, %v8052_v45  ;;  %v11228_v42 = vand.u32 4294901760, %v8055_v18  ;;  %v8077_v44 = vsub.f32 %v115_v63, %v8057_v62 }
  0x1f   :  { %11490 = vst [vmem:[#allocation18_spill] sm:$0xff] %v8065_v1  ;;  %6678 = vmatmul.mubr.f32.gmra.mxu0 %v324_v2  ;;  %6731 = vmatprep.mubr.f32.mxu1 %v7932_v9  ;;  %v8081_v59 = vsub.f32 %v118_v17, %v8063_v30  ;;  %v8084_v40 = vsub.f32 %v121_v57, %v8065_v1  ;;  %v8086_v33 = vand.u32 4294901760, %v124_v39  ;;  %v127_v52 = vsel %vm65_vm0, %v49_v43, 0  ;;  %v51_v43 = vld [vmem:[%s11214_s0 + $0xb0] sm:$0xff] }
  0x20   :  { %6680 = vmatprep.mubr.f32.mxu0 %v334_v51  ;;  %v354_v63 = vand.u32 4294901760, %v353_v61  ;;  %v373_v2 = vsub.f32 %v8052_v45, %v11226_v50  ;;  %v11232_v17 = vand.u32 4294901760, %v8077_v44  ;;  %v383_v57 = vsub.f32 %v8055_v18, %v11228_v42  ;;  %v52_v51 = vld [vmem:[%s11214_s0 + $0xb8] sm:$0xff] }
  0x21   :  { %v8099_v47 = vand.u32 4294901760, %v127_v52  ;;  %v364_v61 = vand.u32 4294901760, %v363_v49  ;;  %v130_v46 = vsel %vm65_vm0, %v50_v13, 0  ;;  %v8116_v31 = vsub.f32 %v124_v39, %v8086_v33  ;;  %v53_v49 = vld [vmem:[%s11214_s0 + $0xc0] sm:$0xff] }
  0x22   :  { %6732 = vmatmul.mubr.f32.gmra.mxu1 %v7934_v10  ;;  %v374_v42 = vand.u32 4294901760, %v373_v2  ;;  %v393_v35 = vsub.f32 %v8077_v44, %v11232_v17  ;;  %v133_v2 = vsel %vm65_vm0, %v51_v43, 0  ;;  %v136_v50 = vsel %vm65_vm0, %v52_v51, 0  ;;  %v54_v17 = vld [vmem:[%s11214_s0 + $0xc8] sm:$0xff]  ;;  %v55_v43 = vld [vmem:[%s11214_s0 + $0xd0] sm:$0xff] }
  0x23   :  { %11491 = vst [vmem:[#allocation19_spill] sm:$0xff] %v8099_v47  ;;  %6681 = vmatmul.mubr.f32.gmra.mxu0 %v344_v12  ;;  %6734 = vmatprep.mubr.f32.mxu1 %v7945_v21  ;;  %v8122_v13 = vsub.f32 %v127_v52, %v8099_v47  ;;  %v8124_v12 = vand.u32 4294901760, %v130_v46  ;;  %v384_v39 = vand.u32 4294901760, %v383_v57  ;;  %v8137_v52 = vand.u32 4294901760, %v136_v50 }
  0x24   :  { %6683 = vmatprep.mubr.f32.mxu0 %v354_v63  ;;  %v8135_v63 = vand.u32 4294901760, %v133_v2  ;;  %v139_v21 = vsel %vm65_vm0, %v53_v49, 0  ;;  %v11492_v57 = vand.u32 4294901760, %v8081_v59  ;;  %v142_v10 = vsel %vm65_vm0, %v54_v17, 0 }
  0x25   :  { %v8133_v32 = vsub.f32 %v130_v46, %v8124_v12  ;;  %v11253_v46 = vand.u32 4294901760, %v8116_v31  ;;  %v394_v9 = vand.u32 4294901760, %v393_v35  ;;  %v11493_v49 = vand.u32 4294901760, %v8084_v40 }
  0x26   :  { %6735 = vmatmul.mubr.f32.gmra.mxu1 %v7957_v38  ;;  %v403_v51 = vsub.f32 %v8081_v59, %v11492_v57  ;;  %v8148_v38 = vand.u32 4294901760, %v139_v21  ;;  %v145_v60 = vsel %vm65_vm0, %v55_v43, 0  ;;  %v56_v57 = vld [vmem:[%s11214_s0 + $0xd8] sm:$0xff]  ;;  %v8165_v35 = vsub.f32 %v136_v50, %v8137_v52 }
  0x27   :  { %6684 = vmatmul.mubr.f32.gmra.mxu0 %v364_v61  ;;  %6737 = vmatprep.mubr.f32.mxu1 %v7984_v53  ;;  %v413_v7 = vsub.f32 %v8084_v40, %v11493_v49  ;;  %v8156_v53 = vsub.f32 %v133_v2, %v8135_v63  ;;  %v8167_v17 = vand.u32 4294901760, %v142_v10  ;;  %v57_v2 = vld [vmem:[%s11214_s0 + $0xe0] sm:$0xff]  ;;  %v423_v49 = vsub.f32 %v8116_v31, %v11253_v46  ;;  %v58_v46 = vld [vmem:[%s11214_s0 + $0xe8] sm:$0xff] }
  0x28   :  { %6686 = vmatprep.mubr.f32.mxu0 %v374_v42  ;;  %v404_v43 = vand.u32 4294901760, %v403_v51  ;;  %v8178_v42 = vsub.f32 %v139_v21, %v8148_v38  ;;  %v8183_v29 = vand.u32 4294901760, %v145_v60  ;;  %v151_v51 = vsel %vm65_vm0, %v57_v2, 0 }
  0x29   :  { %v11262_v61 = vand.u32 4294901760, %v8156_v53  ;;  %v414_v50 = vand.u32 4294901760, %v413_v7  ;;  %v11495_v21 = vand.u32 4294901760, %v8133_v32  ;;  %v424_v2 = vand.u32 4294901760, %v423_v49  ;;  %v60_v49 = vld [vmem:[%s11214_s0 + $0xf8] sm:$0xff] }
  0x2a   :  { %6738 = vmatmul.mubr.f32.gmra.mxu1 %v8011_v11  ;;  %v11494_v11 = vand.u32 4294901760, %v8122_v13  ;;  %v8211_v28 = vand.u32 4294901760, %v151_v51 }
  0x2b   :  { %6687 = vmatmul.mubr.f32.gmra.mxu0 %v384_v39  ;;  %6740 = vmatprep.mubr.f32.mxu1 %v8035_v55  ;;  %v148_v39 = vsel %vm65_vm0, %v56_v57, 0  ;;  %v443_v7 = vsub.f32 %v8133_v32, %v11495_v21  ;;  %v59_v57 = vld [vmem:[%s11214_s0 + $0xf0] sm:$0xff]  ;;  %v11496_v55 = vand.u32 4294901760, %v8165_v35 }
  0x2c   :  { %6689 = vmatprep.mubr.f32.mxu0 %v394_v9  ;;  %v433_v58 = vsub.f32 %v8122_v13, %v11494_v11  ;;  %v8196_v11 = vsub.f32 %v142_v10, %v8167_v17  ;;  %v8206_v21 = vand.u32 4294901760, %v148_v39  ;;  %v8209_v10 = vsub.f32 %v145_v60, %v8183_v29 }
  0x2e   :  { %6741 = vmatmul.mubr.f32.gmra.mxu1 %v8037_v56  ;;  %v453_v56 = vsub.f32 %v8156_v53, %v11262_v61  ;;  %v434_v9 = vand.u32 4294901760, %v433_v58  ;;  %v444_v61 = vand.u32 4294901760, %v443_v7  ;;  %v463_v58 = vsub.f32 %v8165_v35, %v11496_v55 }
  0x2f   :  { %6690 = vmatmul.mubr.f32.gmra.mxu0 %v404_v43  ;;  %6743 = vmatprep.mubr.f32.mxu1 %v8057_v62  ;;  %v154_v43 = vsel %vm65_vm0, %v58_v46, 0  ;;  %v157_v62 = vsel %vm65_vm0, %v59_v57, 0  ;;  %v11497_v46 = vand.u32 4294901760, %v8178_v42  ;;  %v8228_v19 = vsub.f32 %v148_v39, %v8206_v21 }
  0x30   :  { %6692 = vmatprep.mubr.f32.mxu0 %v414_v50  ;;  %v454_v50 = vand.u32 4294901760, %v453_v56  ;;  %v8230_v16 = vand.u32 4294901760, %v154_v43  ;;  %v8234_v55 = vsub.f32 %v151_v51, %v8211_v28  ;;  %v8236_v60 = vand.u32 4294901760, %v157_v62 }
  0x31   :  { %v473_v57 = vsub.f32 %v8178_v42, %v11497_v46  ;;  %v464_v56 = vand.u32 4294901760, %v463_v58  ;;  %v11498_v39 = vand.u32 4294901760, %v8196_v11 }
  0x32   :  { %6744 = vmatmul.mubr.f32.gmra.mxu1 %v8063_v30  ;;  %v8246_v7 = vsub.f32 %v154_v43, %v8230_v16 }
  0x33   :  { %6693 = vmatmul.mubr.f32.gmra.mxu0 %v424_v2  ;;  %6746 = vmatprep.mubr.f32.mxu1 %v8065_v1  ;;  %v160_v2 = vsel %vm65_vm0, %v60_v49, 0  ;;  %v483_v46 = vsub.f32 %v8196_v11, %v11498_v39  ;;  %v474_v1 = vand.u32 4294901760, %v473_v57  ;;  %v11499_v49 = vand.u32 4294901760, %v8209_v10 }
  0x34   :  { %6695 = vmatprep.mubr.f32.mxu0 %v434_v9  ;;  %v11271_v9 = vand.u32 4294901760, %v8228_v19  ;;  %v8248_v51 = vand.u32 4294901760, %v160_v2  ;;  %v11272_v57 = vand.u32 4294901760, %v8246_v7 }
  0x35   :  { %v493_v58 = vsub.f32 %v8209_v10, %v11499_v49  ;;  %v484_v43 = vand.u32 4294901760, %v483_v46 }
  0x36   :  { %6747 = vmatmul.mubr.f32.gmra.mxu1 %v8086_v33  ;;  %v8264_v39 = vsub.f32 %v160_v2, %v8248_v51 }
  0x37   :  { %6696 = vmatmul.mubr.f32.gmra.mxu0 %v444_v61  ;;  %6749 = vmatprep.mubr.f32.mxu1 %v8099_v47  ;;  %v512_v61 = vand.u32 4294901760, %v8234_v55  ;;  %v8255_v47 = vsub.f32 %v157_v62, %v8236_v60  ;;  %v494_v49 = vand.u32 4294901760, %v493_v58 }
  0x38   :  { %6698 = vmatprep.mubr.f32.mxu0 %v454_v50  ;;  %v503_v50 = vsub.f32 %v8228_v19, %v11271_v9  ;;  %v523_v9 = vsub.f32 %v8246_v7, %v11272_v57  ;;  %v542_v2 = vand.u32 4294901760, %v8264_v39 }
  0x39   :  { %v513_v62 = vsub.f32 %v8234_v55, %v512_v61 }
  0x3a   :  { %6750 = vmatmul.mubr.f32.gmra.mxu1 %v8124_v12  ;;  %v504_v46 = vand.u32 4294901760, %v503_v50  ;;  %v543_v50 = vsub.f32 %v8264_v39, %v542_v2 }
  0x3b   :  { %6699 = vmatmul.mubr.f32.gmra.mxu0 %v464_v56  ;;  %6752 = vmatprep.mubr.f32.mxu1 %v8135_v63  ;;  %v532_v56 = vand.u32 4294901760, %v8255_v47 }
  0x3c   :  { %6701 = vmatprep.mubr.f32.mxu0 %v474_v1  ;;  %v514_v1 = vand.u32 4294901760, %v513_v62  ;;  %v11541_v62 = vld [vmem:[#allocation14_spill] sm:$0xff] }
  0x3d   :  { %v533_v58 = vsub.f32 %v8255_v47, %v532_v56 }
  0x3e   :  { %6753 = vmatmul.mubr.f32.gmra.mxu1 %v8137_v52 }
  0x3f   :  { %6702 = vmatmul.mubr.f32.gmra.mxu0 %v484_v43  ;;  %6755 = vmatprep.mubr.f32.mxu1 %v8148_v38  ;;  %v524_v43 = vand.u32 4294901760, %v523_v9  ;;  %v534_v57 = vand.u32 4294901760, %v533_v58  ;;  %v11500_v9 = vand.u32 4294901760, %v7839_v23 }
  0x40   :  { %6704 = vmatprep.mubr.f32.mxu0 %v494_v49  ;;  %v544_v49 = vand.u32 4294901760, %v543_v50 }
  0x42   :  { %6756 = vmatmul.mubr.f32.gmra.mxu1 %v8167_v17 }
  0x43   :  { %6705 = vmatmul.mubr.f32.gmra.mxu0 %v504_v46  ;;  %6758 = vmatprep.mubr.f32.mxu1 %v8183_v29  ;;  %v11543_v46 = vld [vmem:[#allocation15_spill] sm:$0xff] }
  0x44   :  { %6707 = vmatprep.mubr.f32.mxu0 %v514_v1  ;;  %v11545_v1 = vld [vmem:[#allocation16_spill] sm:$0xff] }
  0x46   :  { %6759 = vmatmul.mubr.f32.gmra.mxu1 %v8206_v21 }
  0x47   :  { %6708 = vmatmul.mubr.f32.gmra.mxu0 %v524_v43  ;;  %6761 = vmatprep.mubr.f32.mxu1 %v8211_v28  ;;  %v11547_v43 = vld [vmem:[#allocation17_spill] sm:$0xff] }
  0x48   :  { %6710 = vmatprep.mubr.f32.mxu0 %v534_v57  ;;  %v11501_v57 = vand.u32 4294901760, %v7842_v24 }
  0x4a   :  { %6762 = vmatmul.mubr.f32.gmra.mxu1 %v8230_v16 }
  0x4b   :  { %6711 = vmatmul.mubr.f32.gmra.mxu0 %v544_v49  ;;  %6764 = vmatprep.mubr.f32.mxu1 %v8236_v60  ;;  %v20_v49 = vld [vmem:[%s11213_s1 + $0x48] sm:$0xff] }
  0x4c   :  { %6773 = vmatprep.mubr.f32.mxu0 %v7839_v23  ;;  %v11502_v23 = vand.u32 4294901760, %v7853_v27 }
  0x4e   :  { %6765 = vmatmul.mubr.f32.gmra.mxu1 %v8248_v51 }
  0x4f   :  { %6774 = vmatmul.mubr.f32.vlgmr.msra.gmra.mxu0 %v7842_v24  ;;  %6827 = vmatprep.mubr.f32.mxu1 %v11500_v9  ;;  %v11504_v24 = vand.u32 4294901760, %v7874_v37 }
  0x50   :  { %6776 = vmatprep.mubr.f32.mxu0 %v7853_v27  ;;  %6876 = vmatpush3.msra.mxu0 %v7836_v22  ;;  %v11503_v22 = vand.u32 4294901760, %v7871_v36  ;;  %v11509_v27 = vand.u32 4294901760, %v7955_v14 }
  0x51   :  { %6877 = vmatprep.subr.mxu0 %v7845_v25 }
  0x52   :  { %6828 = vmatmul.mubr.f32.vlgmr.msra.gmra.mxu1 %v11501_v57  ;;  %6878 = vmatpush3.msra.mxu0 %v7845_v25  ;;  %v11506_v25 = vand.u32 4294901760, %v7930_v8  ;;  %v8448_v57 = vand.u32 4294901760, %v20_v49 }
  0x53   :  { %6777 = vmatmul.mubr.f32.gmra.mxu0 %v7871_v36  ;;  %6930 = vmatpush3.msra.mxu1 %v7791_v3  ;;  %v11505_v3 = vand.u32 4294901760, %v7925_v6  ;;  %v11510_v36 = vand.u32 4294901760, %v7965_v41 }
  0x54   :  { %6779 = vmatprep.mubr.f32.mxu0 %v7874_v37  ;;  %6830 = vmatprep.mubr.f32.mxu1 %v11502_v23  ;;  %v11512_v37 = vand.u32 4294901760, %v8008_v0  ;;  %v11549_v23 = vld [vmem:[#allocation18_spill] sm:$0xff] }
  0x55   :  { %6931 = vmatprep.subr.mxu1 %v7793_v4  ;;  %6879 = vmatprep.subr.mxu0 %v7850_v26 }
  0x56   :  { %6831 = vmatmul.mubr.f32.gmra.mxu1 %v11503_v22  ;;  %6880 = vmatpush3.msra.mxu0 %v7850_v26  ;;  %v11507_v26 = vand.u32 4294901760, %v7943_v20  ;;  %v8453_v22 = vsub.f32 %v20_v49, %v8448_v57 }
  0x57   :  { %6780 = vmatmul.mubr.f32.gmra.mxu0 %v7925_v6  ;;  %6833 = vmatprep.mubr.f32.mxu1 %v11504_v24  ;;  %v11513_v6 = vand.u32 4294901760, %v8033_v54 }
  0x58   :  { %6782 = vmatprep.mubr.f32.mxu0 %v7930_v8  ;;  %6932 = vmatpush3.msra.mxu1 %v7793_v4  ;;  %v11508_v4 = vand.u32 4294901760, %v7952_v34  ;;  %v11514_v8 = vand.u32 4294901760, %v8052_v45  ;;  %v8460_v24 = vand.u32 4294901760, %v8453_v22 }
  0x59   :  { %6933 = vmatprep.subr.mxu1 %v7795_v5 }
  0x5a   :  { %6834 = vmatmul.mubr.f32.gmra.mxu1 %v11505_v3  ;;  %v11552_v3 = vld [vmem:[#allocation19_spill] sm:$0xff] }
  0x5b   :  { %6783 = vmatmul.mubr.f32.gmra.mxu0 %v7943_v20  ;;  %6836 = vmatprep.mubr.f32.mxu1 %v11506_v25  ;;  %v11515_v20 = vand.u32 4294901760, %v8055_v18  ;;  %v2520_v25 = vsub.f32 %v8453_v22, %v8460_v24 }
  0x5c   :  { %6785 = vmatprep.mubr.f32.mxu0 %v7952_v34  ;;  %6934 = vmatpush3.msra.mxu1 %v7795_v5  ;;  %v11511_v5 = vand.u32 4294901760, %v7975_v48  ;;  %v11516_v34 = vand.u32 4294901760, %v8077_v44 }
  0x5e   :  { %6837 = vmatmul.mubr.f32.gmra.mxu1 %v11507_v26  ;;  %v2521_v26 = vand.u32 4294901760, %v2520_v25 }
  0x5f   :  { %6786 = vmatmul.mubr.f32.gmra.mxu0 %v7955_v14  ;;  %6839 = vmatprep.mubr.f32.mxu1 %v11508_v4  ;;  %v11517_v14 = vand.u32 4294901760, %v8081_v59 }
  0x60   :  { %6788 = vmatprep.mubr.f32.mxu0 %v7965_v41  ;;  %v11518_v41 = vand.u32 4294901760, %v8084_v40 }
  0x62   :  { %6840 = vmatmul.mubr.f32.gmra.mxu1 %v11509_v27 }
  0x63   :  { %6789 = vmatmul.mubr.f32.gmra.mxu0 %v7975_v48  ;;  %6842 = vmatprep.mubr.f32.mxu1 %v11510_v36  ;;  %v11521_v48 = vand.u32 4294901760, %v8133_v32 }
  0x64   :  { %6791 = vmatprep.mubr.f32.mxu0 %v8008_v0  ;;  %v11524_v0 = vand.u32 4294901760, %v8178_v42 }
  0x66   :  { %6843 = vmatmul.mubr.f32.gmra.mxu1 %v11511_v5 }
  0x67   :  { %6792 = vmatmul.mubr.f32.gmra.mxu0 %v8033_v54  ;;  %6845 = vmatprep.mubr.f32.mxu1 %v11512_v37  ;;  %v11527_v54 = vand.u32 4294901760, %v8228_v19 }
  0x68   :  { %6794 = vmatprep.mubr.f32.mxu0 %v8052_v45  ;;  %v11519_v45 = vand.u32 4294901760, %v8116_v31 }
  0x6a   :  { %6846 = vmatmul.mubr.f32.gmra.mxu1 %v11513_v6 }
  0x6b   :  { %6795 = vmatmul.mubr.f32.gmra.mxu0 %v8055_v18  ;;  %6848 = vmatprep.mubr.f32.mxu1 %v11514_v8  ;;  %v11528_v18 = vand.u32 4294901760, %v8246_v7 }
  0x6c   :  { %6797 = vmatprep.mubr.f32.mxu0 %v8077_v44  ;;  %v11520_v44 = vand.u32 4294901760, %v8122_v13 }
  0x6e   :  { %6849 = vmatmul.mubr.f32.gmra.mxu1 %v11515_v20 }
  0x6f   :  { %6798 = vmatmul.mubr.f32.gmra.mxu0 %v8081_v59  ;;  %6851 = vmatprep.mubr.f32.mxu1 %v11516_v34  ;;  %v11530_v59 = vld [vmem:[#allocation3_spill] sm:$0xff] }
  0x70   :  { %6800 = vmatprep.mubr.f32.mxu0 %v8084_v40  ;;  %v11522_v40 = vand.u32 4294901760, %v8156_v53 }
  0x72   :  { %6852 = vmatmul.mubr.f32.gmra.mxu1 %v11517_v14 }
  0x73   :  { %6801 = vmatmul.mubr.f32.gmra.mxu0 %v8116_v31  ;;  %6854 = vmatprep.mubr.f32.mxu1 %v11518_v41  ;;  %v11523_v31 = vand.u32 4294901760, %v8165_v35  ;;  %v15_v41 = vld [vmem:[%s11213_s1 + $0x20] sm:$0xff] }
  0x74   :  { %6803 = vmatprep.mubr.f32.mxu0 %v8122_v13  ;;  %v11531_v13 = vld [vmem:[#allocation4_spill] sm:$0xff] }
  0x76   :  { %6855 = vmatmul.mubr.f32.gmra.mxu1 %v11519_v45 }
  0x77   :  { %6804 = vmatmul.mubr.f32.gmra.mxu0 %v8133_v32  ;;  %6857 = vmatprep.mubr.f32.mxu1 %v11520_v44  ;;  %v11525_v32 = vand.u32 4294901760, %v8196_v11 }
  0x78   :  { %6806 = vmatprep.mubr.f32.mxu0 %v8156_v53  ;;  %v11526_v53 = vand.u32 4294901760, %v8209_v10 }
  0x7a   :  { %6858 = vmatmul.mubr.f32.gmra.mxu1 %v11521_v48  ;;  %v8552_v48 = vand.u32 4294901760, %v15_v41 }
  0x7b   :  { %6807 = vmatmul.mubr.f32.gmra.mxu0 %v8165_v35  ;;  %6860 = vmatprep.mubr.f32.mxu1 %v11522_v40  ;;  %v11534_v35 = vld [vmem:[#allocation7_spill] sm:$0xff] }
  0x7c   :  { %6809 = vmatprep.mubr.f32.mxu0 %v8178_v42  ;;  %v11532_v42 = vld [vmem:[#allocation5_spill] sm:$0xff]  ;;  %11551 = vst [vmem:[#allocation7_spill] sm:$0xff] %v8460_v24  ;;  %11564 = vst [vmem:[#allocation19_spill] sm:$0xff] %v8552_v48 }
  0x7d   :  { %11548 = vst [vmem:[#allocation5_spill] sm:$0xff] %v8448_v57 }
  0x7e   :  { %6861 = vmatmul.mubr.f32.gmra.mxu1 %v11523_v31 }
  0x7f   :  { %6810 = vmatmul.mubr.f32.gmra.mxu0 %v8196_v11  ;;  %6863 = vmatprep.mubr.f32.mxu1 %v11524_v0  ;;  %v11536_v11 = vld [vmem:[#allocation9_spill] sm:$0xff] }
  0x80   :  { %6812 = vmatprep.mubr.f32.mxu0 %v8209_v10  ;;  %v11537_v10 = vld [vmem:[#allocation10_spill] sm:$0xff] }
  0x82   :  { %6864 = vmatmul.mubr.f32.gmra.mxu1 %v11525_v32  ;;  %v8565_v32 = vsub.f32 %v15_v41, %v8552_v48 }
  0x83   :  { %6813 = vmatmul.mubr.f32.gmra.mxu0 %v8228_v19  ;;  %6866 = vmatprep.mubr.f32.mxu1 %v11526_v53  ;;  %v11529_v19 = vld [vmem:[#allocation2_spill] sm:$0xff] }
  0x84   :  { %6815 = vmatprep.mubr.f32.mxu0 %v8234_v55  ;;  %v11539_v55 = vld [vmem:[#allocation12_spill] sm:$0xff]  ;;  %11566 = vst [vmem:[#allocation21_spill] sm:$0xff] %v8565_v32 }
  0x86   :  { %6867 = vmatmul.mubr.f32.gmra.mxu1 %v11527_v54 }
  0x87   :  { %6816 = vmatmul.mubr.f32.gmra.mxu0 %v8246_v7  ;;  %6869 = vmatprep.mubr.f32.mxu1 %v512_v61  ;;  %v11538_v7 = vld [vmem:[#allocation11_spill] sm:$0xff]  ;;  %v11540_v61 = vld [vmem:[#allocation13_spill] sm:$0xff] }
  0x88   :  { %6818 = vmatprep.mubr.f32.mxu0 %v8255_v47  ;;  %v11533_v47 = vld [vmem:[#allocation6_spill] sm:$0xff] }
  0x89   :  { %11550 = vst [vmem:[#allocation6_spill] sm:$0xff] %v8453_v22 }
  0x8a   :  { %6870 = vmatmul.mubr.f32.gmra.mxu1 %v11528_v18 }
  0x8b   :  { %6819 = vmatmul.mubr.f32.gmra.mxu0 %v8264_v39  ;;  %6872 = vmatprep.mubr.f32.mxu1 %v532_v56  ;;  %v21_v39 = vld [vmem:[%s11213_s1 + $0x50] sm:$0xff] }
  0x8c   :  { %6881 = vmatprep.mubr.f32.mxu0 %v7819_v15  ;;  %v8425_v56 = vand.u32 4294901760, %v21_v39 }
  0x8e   :  { %6873 = vmatmul.mubr.f32.gmra.mxu1 %v542_v2  ;;  %11542 = vst [vmem:[#allocation2_spill] sm:$0xff] %v8425_v56  ;;  %6983 = vmatprep.subr.mxu0 %v8425_v56  ;;  %v8430_v2 = vsub.f32 %v21_v39, %v8425_v56 }
  0x8f   :  { %6882 = vmatmul.mubr.f32.vlgmr.msra.gmra.mxu0 %v11529_v19  ;;  %6935 = vmatprep.mubr.f32.mxu1 %v7819_v15  ;;  %v11535_v15 = vld [vmem:[#allocation8_spill] sm:$0xff] }
  0x90   :  { %6884 = vmatprep.mubr.f32.mxu0 %v11530_v59  ;;  %11544 = vst [vmem:[#allocation3_spill] sm:$0xff] %v8430_v2  ;;  %6984 = vmatpush3.msra.mxu0 %v8425_v56  ;;  %v8437_v58 = vand.u32 4294901760, %v8430_v2 }
  0x91   :  { %6985 = vmatprep.subr.mxu0 %v8448_v57 }
  0x92   :  { %6936 = vmatmul.mubr.f32.vlgmr.msra.gmra.mxu1 %v11529_v19  ;;  %11546 = vst [vmem:[#allocation4_spill] sm:$0xff] %v8437_v58  ;;  %v2513_v50 = vsub.f32 %v8430_v2, %v8437_v58  ;;  %6986 = vmatpush3.msra.mxu0 %v8448_v57 }
  0x93   :  { %6885 = vmatmul.mubr.f32.gmra.mxu0 %v11531_v13  ;;  %6938 = vmatprep.mubr.f32.mxu1 %v11530_v59 }
  0x94   :  { %6887 = vmatprep.mubr.f32.mxu0 %v11532_v42  ;;  %v2514_v9 = vand.u32 4294901760, %v2513_v50 }
  0x96   :  { %6939 = vmatmul.mubr.f32.gmra.mxu1 %v11531_v13  ;;  %7047 = vmatprep.subr.mxu1 %v2514_v9 }
  0x97   :  { %6888 = vmatmul.mubr.f32.gmra.mxu0 %v11533_v47  ;;  %6941 = vmatprep.mubr.f32.mxu1 %v11532_v42  ;;  %v8578_v42 = vand.u32 4294901760, %v8565_v32 }
  0x98   :  { %6890 = vmatprep.mubr.f32.mxu0 %v11534_v35  ;;  %7048 = vmatpush3.msra.mxu1 %v2514_v9 }
  0x99   :  { %7049 = vmatprep.subr.mxu1 %v2521_v26  ;;  %11568 = vst [vmem:[#allocation23_spill] sm:$0xff] %v8578_v42 }
  0x9a   :  { %6942 = vmatmul.mubr.f32.gmra.mxu1 %v11533_v47 }
  0x9b   :  { %6891 = vmatmul.mubr.f32.gmra.mxu0 %v11535_v15  ;;  %6944 = vmatprep.mubr.f32.mxu1 %v11534_v35 }
  0x9c   :  { %6893 = vmatprep.mubr.f32.mxu0 %v11536_v11  ;;  %7050 = vmatpush3.msra.mxu1 %v2521_v26 }
  0x9e   :  { %6945 = vmatmul.mubr.f32.gmra.mxu1 %v11535_v15 }
  0x9f   :  { %6894 = vmatmul.mubr.f32.gmra.mxu0 %v11537_v10  ;;  %6947 = vmatprep.mubr.f32.mxu1 %v11536_v11 }
  0xa0   :  { %6896 = vmatprep.mubr.f32.mxu0 %v11538_v7 }
  0xa2   :  { %6948 = vmatmul.mubr.f32.gmra.mxu1 %v11537_v10  ;;  %v2555_v10 = vsub.f32 %v8565_v32, %v8578_v42 }
  0xa3   :  { %6897 = vmatmul.mubr.f32.gmra.mxu0 %v11539_v55  ;;  %6950 = vmatprep.mubr.f32.mxu1 %v11538_v7 }
  0xa4   :  { %6899 = vmatprep.mubr.f32.mxu0 %v11540_v61 }
  0xa6   :  { %6951 = vmatmul.mubr.f32.gmra.mxu1 %v11539_v55 }
  0xa7   :  { %6900 = vmatmul.mubr.f32.gmra.mxu0 %v11541_v62  ;;  %6953 = vmatprep.mubr.f32.mxu1 %v11540_v61 }
  0xa8   :  { %6902 = vmatprep.mubr.f32.mxu0 %v11543_v46 }
  0xaa   :  { %6954 = vmatmul.mubr.f32.gmra.mxu1 %v11541_v62 }
  0xab   :  { %6903 = vmatmul.mubr.f32.gmra.mxu0 %v11545_v1  ;;  %6956 = vmatprep.mubr.f32.mxu1 %v11543_v46  ;;  %v2556_v46 = vand.u32 4294901760, %v2555_v10 }
  0xac   :  { %6905 = vmatprep.mubr.f32.mxu0 %v11547_v43 }
  0xae   :  { %6957 = vmatmul.mubr.f32.gmra.mxu1 %v11545_v1 }
  0xaf   :  { %6906 = vmatmul.mubr.f32.gmra.mxu0 %v8063_v30  ;;  %6959 = vmatprep.mubr.f32.mxu1 %v11547_v43 }
  0xb0   :  { %6908 = vmatprep.mubr.f32.mxu0 %v11549_v23 }
  0xb2   :  { %6960 = vmatmul.mubr.f32.gmra.mxu1 %v8063_v30  ;;  %v19_v30 = vld [vmem:[%s11213_s1 + $0x40] sm:$0xff] }
  0xb3   :  { %6909 = vmatmul.mubr.f32.gmra.mxu0 %v8086_v33  ;;  %6962 = vmatprep.mubr.f32.mxu1 %v11549_v23  ;;  %v8471_v4 = vand.u32 4294901760, %v19_v30 }
  0xb4   :  { %6911 = vmatprep.mubr.f32.mxu0 %v11552_v3 }
  0xb5   :  { %11553 = vst [vmem:[#allocation8_spill] sm:$0xff] %v8471_v4  ;;  %6987 = vmatprep.subr.mxu0 %v8471_v4  ;;  %v8476_v27 = vsub.f32 %v19_v30, %v8471_v4 }
  0xb6   :  { %6963 = vmatmul.mubr.f32.gmra.mxu1 %v8086_v33  ;;  %6988 = vmatpush3.msra.mxu0 %v8471_v4 }
  0xb7   :  { %6912 = vmatmul.mubr.f32.gmra.mxu0 %v8124_v12  ;;  %6965 = vmatprep.mubr.f32.mxu1 %v11552_v3  ;;  %11554 = vst [vmem:[#allocation9_spill] sm:$0xff] %v8476_v27  ;;  %v8483_v33 = vand.u32 4294901760, %v8476_v27 }
  0xb8   :  { %6914 = vmatprep.mubr.f32.mxu0 %v8135_v63 }
  0xb9   :  { %11555 = vst [vmem:[#allocation10_spill] sm:$0xff] %v8483_v33  ;;  %v2527_v36 = vsub.f32 %v8476_v27, %v8483_v33 }
  0xba   :  { %6966 = vmatmul.mubr.f32.gmra.mxu1 %v8124_v12  ;;  %v18_v12 = vld [vmem:[%s11213_s1 + $0x38] sm:$0xff] }
  0xbb   :  { %6915 = vmatmul.mubr.f32.gmra.mxu0 %v8137_v52  ;;  %6968 = vmatprep.mubr.f32.mxu1 %v8135_v63  ;;  %v2528_v63 = vand.u32 4294901760, %v2527_v36  ;;  %v8494_v5 = vand.u32 4294901760, %v18_v12 }
  0xbc   :  { %6917 = vmatprep.mubr.f32.mxu0 %v8148_v38 }
  0xbd   :  { %11556 = vst [vmem:[#allocation11_spill] sm:$0xff] %v8494_v5  ;;  %7051 = vmatprep.subr.mxu1 %v2528_v63  ;;  %6989 = vmatprep.subr.mxu0 %v8494_v5  ;;  %v8499_v37 = vsub.f32 %v18_v12, %v8494_v5 }
  0xbe   :  { %6969 = vmatmul.mubr.f32.gmra.mxu1 %v8137_v52  ;;  %6990 = vmatpush3.msra.mxu0 %v8494_v5 }
  0xbf   :  { %6918 = vmatmul.mubr.f32.gmra.mxu0 %v8167_v17  ;;  %6971 = vmatprep.mubr.f32.mxu1 %v8148_v38  ;;  %11557 = vst [vmem:[#allocation12_spill] sm:$0xff] %v8499_v37  ;;  %v8506_v38 = vand.u32 4294901760, %v8499_v37 }
  0xc0   :  { %6920 = vmatprep.mubr.f32.mxu0 %v8183_v29  ;;  %7052 = vmatpush3.msra.mxu1 %v2528_v63 }
  0xc1   :  { %11558 = vst [vmem:[#allocation13_spill] sm:$0xff] %v8506_v38  ;;  %v2534_v52 = vsub.f32 %v8499_v37, %v8506_v38 }
  0xc2   :  { %6972 = vmatmul.mubr.f32.gmra.mxu1 %v8167_v17  ;;  %v17_v17 = vld [vmem:[%s11213_s1 + $0x30] sm:$0xff] }
  0xc3   :  { %6921 = vmatmul.mubr.f32.gmra.mxu0 %v8206_v21  ;;  %6974 = vmatprep.mubr.f32.mxu1 %v8183_v29  ;;  %v2535_v29 = vand.u32 4294901760, %v2534_v52  ;;  %v8517_v6 = vand.u32 4294901760, %v17_v17 }
  0xc4   :  { %6923 = vmatprep.mubr.f32.mxu0 %v8211_v28 }
  0xc5   :  { %11559 = vst [vmem:[#allocation14_spill] sm:$0xff] %v8517_v6  ;;  %7053 = vmatprep.subr.mxu1 %v2535_v29  ;;  %6991 = vmatprep.subr.mxu0 %v8517_v6  ;;  %v8522_v8 = vsub.f32 %v17_v17, %v8517_v6 }
  0xc6   :  { %6975 = vmatmul.mubr.f32.gmra.mxu1 %v8206_v21  ;;  %6992 = vmatpush3.msra.mxu0 %v8517_v6  ;;  %v8534_v21 = vld [vmem:[%s11213_s1 + $0x78] ss:$0 sm:$0xff] }
  0xc7   :  { %6924 = vmatmul.mubr.f32.gmra.mxu0 %v8230_v16  ;;  %6977 = vmatprep.mubr.f32.mxu1 %v8211_v28  ;;  %11560 = vst [vmem:[#allocation15_spill] sm:$0xff] %v8522_v8  ;;  %v8529_v28 = vand.u32 4294901760, %v8522_v8 }
  0xc8   :  { %6926 = vmatprep.mubr.f32.mxu0 %v8236_v60  ;;  %7054 = vmatpush3.msra.mxu1 %v2535_v29 }
  0xc9   :  { %11561 = vst [vmem:[#allocation16_spill] sm:$0xff] %v8529_v28  ;;  %v2541_v20 = vsub.f32 %v8522_v8, %v8529_v28 }
  0xca   :  { %6978 = vmatmul.mubr.f32.gmra.mxu1 %v8230_v16  ;;  %v16_v16 = vld [vmem:[%s11213_s1 + $0x28] sm:$0xff] }
  0xcb   :  { %6927 = vmatmul.mubr.f32.gmra.mxu0 %v8248_v51  ;;  %6980 = vmatprep.mubr.f32.mxu1 %v8236_v60  ;;  %v8542_v34 = vand.u32 4294901760, %v16_v16  ;;  %v2542_v14 = vand.u32 4294901760, %v2541_v20 }
  0xcd   :  { %11562 = vst [vmem:[#allocation17_spill] sm:$0xff] %v8542_v34  ;;  %6993 = vmatprep.subr.mxu0 %v8542_v34  ;;  %v8550_v44 = vsub.f32 %v16_v16, %v8542_v34  ;;  %7055 = vmatprep.subr.mxu1 %v2542_v14 }
  0xce   :  { %6981 = vmatmul.mubr.f32.gmra.mxu1 %v8248_v51  ;;  %6994 = vmatpush3.msra.mxu0 %v8542_v34  ;;  %v14_v51 = vld [vmem:[%s11213_s1 + $0x18] sm:$0xff] }
  0xcf   :  { %v6667_v60 = vpop.f32.mrf.mxu0  ;;  %11563 = vst [vmem:[#allocation18_spill] sm:$0xff] %v8550_v44  ;;  %7056 = vmatpush3.msra.mxu1 %v2542_v14  ;;  %v8561_v0 = vand.u32 4294901760, %v8550_v44  ;;  %6995 = vmatprep.subr.mxu0 %v8552_v48  ;;  %v8567_v53 = vand.u32 4294901760, %v14_v51 }
  0xd0   :  { %v247_v45 = vadd.f32 %v6667_v60, %v8534_v21  ;;  %6996 = vmatpush3.msra.mxu0 %v8552_v48 }
  0xd1   :  { %v8554_v40 = vpop.f32.mrf.mxu0  ;;  %11565 = vst [vmem:[#allocation20_spill] sm:$0xff] %v8561_v0  ;;  %11567 = vst [vmem:[#allocation22_spill] sm:$0xff] %v8567_v53  ;;  %v2548_v13 = vsub.f32 %v8550_v44, %v8561_v0  ;;  %v8581_v47 = vsub.f32 %v14_v51, %v8567_v53  ;;  %6997 = vmatprep.subr.mxu0 %v8567_v53 }
  0xd2   :  { %v6721_v31 = vpop.f32.mrf.mxu1  ;;  %6998 = vmatpush3.msra.mxu0 %v8567_v53 }
  0xd3   :  { %v6670_v54 = vpop.f32.mrf.mxu0  ;;  %v8569_v18 = vadd.f32 %v6721_v31, %v247_v45  ;;  %11569 = vst [vmem:[#allocation24_spill] sm:$0xff] %v8581_v47  ;;  %v2549_v11 = vand.u32 4294901760, %v2548_v13  ;;  %v8590_v7 = vand.u32 4294901760, %v8581_v47  ;;  %7111 = vmatprep.subr.mxu0 %v8430_v2 }
  0xd4   :  { %v267_v19 = vadd.f32 %v6670_v54, %v8534_v21  ;;  %v8573_v59 = vpop.f32.mrf.mxu1 }
  0xd5   :  { %v8584_v35 = vpop.f32.mrf.mxu0  ;;  %11570 = vst [vmem:[#allocation25_spill] sm:$0xff] %v8590_v7  ;;  %7057 = vmatprep.subr.mxu1 %v2549_v11  ;;  %v2562_v1 = vsub.f32 %v8581_v47, %v8590_v7 }
  0xd6   :  { %v6724_v15 = vpop.f32.mrf.mxu1  ;;  %7058 = vmatpush3.msra.mxu1 %v2549_v11 }
  0xd7   :  { %v6673_v55 = vpop.f32.mrf.mxu0  ;;  %v8593_v61 = vadd.f32 %v6724_v15, %v267_v19  ;;  %7059 = vmatprep.subr.mxu1 %v2556_v46  ;;  %v2563_v49 = vand.u32 4294901760, %v2562_v1 }
  0xd8   :  { %v287_v39 = vadd.f32 %v6673_v55, %v8534_v21  ;;  %v8596_v62 = vpop.f32.mrf.mxu1  ;;  %7060 = vmatpush3.msra.mxu1 %v2556_v46 }
  0xd9   :  { %v8600_v43 = vpop.f32.mrf.mxu0  ;;  %7061 = vmatprep.subr.mxu1 %v2563_v49 }
  0xda   :  { %v6727_v50 = vpop.f32.mrf.mxu1  ;;  %7062 = vmatpush3.msra.mxu1 %v2563_v49 }
  0xdb   :  { %v6676_v9 = vpop.f32.mrf.mxu0  ;;  %v8602_v23 = vadd.f32 %v6727_v50, %v287_v39  ;;  %7175 = vmatprep.subr.mxu1 %v8425_v56 }
  0xdc   :  { %v307_v3 = vadd.f32 %v6676_v9, %v8534_v21  ;;  %v8605_v25 = vpop.f32.mrf.mxu1 }
  0xdd   :  { %v8607_v30 = vpop.f32.mrf.mxu0 }
  0xde   :  { %v6730_v26 = vpop.f32.mrf.mxu1 }
  0xdf   :  { %v6679_v36 = vpop.f32.mrf.mxu0  ;;  %v8610_v12 = vadd.f32 %v6730_v26, %v307_v3 }
  0xe0   :  { %v327_v63 = vadd.f32 %v6679_v36, %v8534_v21  ;;  %v8613_v52 = vpop.f32.mrf.mxu1 }
  0xe1   :  { %v8615_v17 = vpop.f32.mrf.mxu0 }
  0xe2   :  { %v6733_v29 = vpop.f32.mrf.mxu1 }
  0xe3   :  { %v6682_v20 = vpop.f32.mrf.mxu0  ;;  %v8617_v16 = vadd.f32 %v6733_v29, %v327_v63 }
  0xe4   :  { %v347_v60 = vadd.f32 %v6682_v20, %v8534_v21  ;;  %v8620_v14 = vpop.f32.mrf.mxu1 }
  0xe5   :  { %11571 = vst [vmem:[#allocation26_spill] sm:$0xff] %v8617_v16  ;;  %v8622_v41 = vpop.f32.mrf.mxu0 }
  0xe6   :  { %v6736_v45 = vpop.f32.mrf.mxu1 }
  0xe7   :  { %v6685_v51 = vpop.f32.mrf.mxu0  ;;  %v8624_v31 = vadd.f32 %v6736_v45, %v347_v60 }
  0xe8   :  { %v367_v54 = vadd.f32 %v6685_v51, %v8534_v21  ;;  %v8627_v19 = vpop.f32.mrf.mxu1 }
  0xe9   :  { %11572 = vst [vmem:[#allocation27_spill] sm:$0xff] %v8624_v31  ;;  %v8629_v13 = vpop.f32.mrf.mxu0 }
  0xea   :  { %v6739_v15 = vpop.f32.mrf.mxu1 }
  0xeb   :  { %v6688_v11 = vpop.f32.mrf.mxu0  ;;  %v8631_v10 = vadd.f32 %v6739_v15, %v367_v54 }
  0xec   :  { %v387_v55 = vadd.f32 %v6688_v11, %v8534_v21  ;;  %v8634_v39 = vpop.f32.mrf.mxu1 }
  0xed   :  { %11573 = vst [vmem:[#allocation28_spill] sm:$0xff] %v8631_v10  ;;  %v8636_v46 = vpop.f32.mrf.mxu0 }
  0xee   :  { %v6742_v1 = vpop.f32.mrf.mxu1 }
  0xef   :  { %v6691_v50 = vpop.f32.mrf.mxu0  ;;  %v8638_v49 = vadd.f32 %v6742_v1, %v387_v55 }
  0xf0   :  { %v407_v9 = vadd.f32 %v6691_v50, %v8534_v21  ;;  %v8641_v3 = vpop.f32.mrf.mxu1 }
  0xf1   :  { %11574 = vst [vmem:[#allocation29_spill] sm:$0xff] %v8638_v49  ;;  %v8643_v26 = vpop.f32.mrf.mxu0 }
  0xf2   :  { %v6745_v36 = vpop.f32.mrf.mxu1 }
  0xf3   :  { %v6694_v63 = vpop.f32.mrf.mxu0  ;;  %v8645_v29 = vadd.f32 %v6745_v36, %v407_v9 }
  0xf4   :  { %v427_v20 = vadd.f32 %v6694_v63, %v8534_v21  ;;  %v8648_v60 = vpop.f32.mrf.mxu1 }
  0xf5   :  { %11575 = vst [vmem:[#allocation30_spill] sm:$0xff] %v8645_v29  ;;  %v8650_v45 = vpop.f32.mrf.mxu0 }
  0xf6   :  { %v6748_v51 = vpop.f32.mrf.mxu1 }
  0xf7   :  { %v6697_v54 = vpop.f32.mrf.mxu0  ;;  %v8652_v15 = vadd.f32 %v6748_v51, %v427_v20 }
  0xf8   :  { %v447_v11 = vadd.f32 %v6697_v54, %v8534_v21  ;;  %v8655_v55 = vpop.f32.mrf.mxu1 }
  0xf9   :  { %11576 = vst [vmem:[#allocation31_spill] sm:$0xff] %v8652_v15  ;;  %v8657_v1 = vpop.f32.mrf.mxu0 }
  0xfa   :  { %v6751_v50 = vpop.f32.mrf.mxu1 }
  0xfb   :  { %v6700_v7 = vpop.f32.mrf.mxu0  ;;  %v8659_v9 = vadd.f32 %v6751_v50, %v447_v11 }
  0xfc   :  { %v467_v36 = vadd.f32 %v6700_v7, %v8534_v21  ;;  %v8662_v63 = vpop.f32.mrf.mxu1 }
  0xfd   :  { %v8664_v42 = vpop.f32.mrf.mxu0 }
  0xfe   :  { %v6754_v0 = vpop.f32.mrf.mxu1 }
  0xff   :  { %v6703_v28 = vpop.f32.mrf.mxu0  ;;  %v8666_v20 = vadd.f32 %v6754_v0, %v467_v36 }
 0x100   :  { %v487_v51 = vadd.f32 %v6703_v28, %v8534_v21  ;;  %v8669_v54 = vpop.f32.mrf.mxu1 }
 0x101   :  { %v8671_v38 = vpop.f32.mrf.mxu0 }
 0x102   :  { %v6757_v33 = vpop.f32.mrf.mxu1 }
 0x103   :  { %v6706_v24 = vpop.f32.mrf.mxu0  ;;  %v8673_v11 = vadd.f32 %v6757_v33, %v487_v51 }
 0x104   :  { %v507_v7 = vadd.f32 %v6706_v24, %v8534_v21  ;;  %v8676_v50 = vpop.f32.mrf.mxu1 }
 0x105   :  { %v8678_v58 = vpop.f32.mrf.mxu0 }
 0x106   :  { %v6760_v47 = vpop.f32.mrf.mxu1 }
 0x107   :  { %v6709_v53 = vpop.f32.mrf.mxu0  ;;  %v8680_v0 = vadd.f32 %v6760_v47, %v507_v7 }
 0x108   :  { %v527_v28 = vadd.f32 %v6709_v53, %v8534_v21  ;;  %v8683_v36 = vpop.f32.mrf.mxu1 }
 0x109   :  { %v8685_v32 = vpop.f32.mrf.mxu0 }
 0x10a   :  { %v6763_v48 = vpop.f32.mrf.mxu1 }
 0x10b   :  { %v6712_v44 = vpop.f32.mrf.mxu0  ;;  %v8687_v33 = vadd.f32 %v6763_v48, %v527_v28 }
 0x10c   :  { %v547_v24 = vadd.f32 %v6712_v44, %v8534_v21  ;;  %v8690_v51 = vpop.f32.mrf.mxu1 }
 0x10d   :  { %v8692_v8 = vpop.f32.mrf.mxu0 }
 0x10e   :  { %v6766_v37 = vpop.f32.mrf.mxu1 }
 0x10f   :  { %v8694_v27 = vadd.f32 %v6766_v37, %v547_v24  ;;  %v8696_v47 = vpop.f32.mrf.mxu0 }
 0x110   :  { %v8698_v53 = vpop.f32.mrf.mxu1 }
 0x111   :  { %11577 = vst [vmem:[#allocation32_spill] sm:$0xff] %v8694_v27  ;;  %v8700_v7 = vpop.f32.mrf.mxu0 }
 0x112   :  { %v8702_v34 = vpop.f32.mrf.mxu1 }
 0x113   :  { %v8704_v22 = vpop.f32.mrf.mxu0 }
 0x114   :  { %v8706_v48 = vpop.f32.mrf.mxu1 }
 0x115   :  { %v8708_v44 = vpop.f32.mrf.mxu0 }
 0x116   :  { %v8710_v28 = vpop.f32.mrf.mxu1 }
 0x117   :  { %v8712_v2 = vpop.f32.mrf.mxu0 }
 0x118   :  { %v8714_v37 = vpop.f32.mrf.mxu1 }
 0x119   :  { %11578 = vst [vmem:[#allocation33_spill] sm:$0xff] %v8714_v37  ;;  %v8716_v24 = vpop.f32.mrf.mxu0 }
 0x11a   :  { %v8718_v6 = vpop.f32.mrf.mxu1 }
 0x11b   :  { %11579 = vst [vmem:[#allocation34_spill] sm:$0xff] %v8718_v6  ;;  %v8720_v5 = vpop.f32.mrf.mxu0 }
 0x11c   :  { %11580 = vst [vmem:[#allocation35_spill] sm:$0xff] %v8720_v5  ;;  %v8722_v4 = vpop.f32.mrf.mxu1 }
 0x11d   :  { %11581 = vst [vmem:[#allocation36_spill] sm:$0xff] %v8722_v4  ;;  %v8724_v57 = vpop.f32.mrf.mxu0 }
 0x11e   :  { %11582 = vst [vmem:[#allocation37_spill] sm:$0xff] %v8724_v57  ;;  %v8726_v56 = vpop.f32.mrf.mxu1 }
 0x11f   :  { %11583 = vst [vmem:[#allocation38_spill] sm:$0xff] %v8726_v56  ;;  %v8728_v15 = vpop.f32.mrf.mxu0 }
 0x120   :  { %11584 = vst [vmem:[#allocation39_spill] sm:$0xff] %v8728_v15  ;;  %v8730_v29 = vpop.f32.mrf.mxu1 }
 0x121   :  { %11585 = vst [vmem:[#allocation40_spill] sm:$0xff] %v8730_v29  ;;  %v8732_v49 = vpop.f32.mrf.mxu0 }
 0x122   :  { %11586 = vst [vmem:[#allocation41_spill] sm:$0xff] %v8732_v49  ;;  %v8734_v10 = vpop.f32.mrf.mxu1 }
 0x123   :  { %11587 = vst [vmem:[#allocation42_spill] sm:$0xff] %v8734_v10  ;;  %v8736_v31 = vpop.f32.mrf.mxu0 }
 0x124   :  { %11588 = vst [vmem:[#allocation43_spill] sm:$0xff] %v8736_v31  ;;  %v8738_v16 = vpop.f32.mrf.mxu1 }
 0x125   :  { %11589 = vst [vmem:[#allocation44_spill] sm:$0xff] %v8738_v16  ;;  %v8740_v6 = vpop.f32.mrf.mxu0 }
 0x126   :  { %11590 = vst [vmem:[#allocation45_spill] sm:$0xff] %v8740_v6  ;;  %v8742_v37 = vpop.f32.mrf.mxu1 }
 0x127   :  { %11591 = vst [vmem:[#allocation46_spill] sm:$0xff] %v8742_v37  ;;  %v8744_v4 = vpop.f32.mrf.mxu0 }
 0x128   :  { %11592 = vst [vmem:[#allocation47_spill] sm:$0xff] %v8744_v4  ;;  %v8746_v27 = vpop.f32.mrf.mxu1 }
 0x129   :  { %11593 = vst [vmem:[#allocation48_spill] sm:$0xff] %v8746_v27  ;;  %v8748_v56 = vpop.f32.mrf.mxu0 }
 0x12a   :  { %11594 = vst [vmem:[#allocation49_spill] sm:$0xff] %v8748_v56  ;;  %v8750_v15 = vpop.f32.mrf.mxu1 }
 0x12b   :  { %11595 = vst [vmem:[#allocation50_spill] sm:$0xff] %v8750_v15  ;;  %v8752_v29 = vpop.f32.mrf.mxu0 }
 0x12c   :  { %11596 = vst [vmem:[#allocation51_spill] sm:$0xff] %v8752_v29  ;;  %v8754_v49 = vpop.f32.mrf.mxu1 }
 0x12d   :  { %11597 = vst [vmem:[#allocation52_spill] sm:$0xff] %v8754_v49  ;;  %v8756_v10 = vpop.f32.mrf.mxu0 }
 0x12e   :  { %11598 = vst [vmem:[#allocation53_spill] sm:$0xff] %v8756_v10  ;;  %v8758_v31 = vpop.f32.mrf.mxu1 }
 0x12f   :  { %11599 = vst [vmem:[#allocation54_spill] sm:$0xff] %v8758_v31  ;;  %v8760_v16 = vpop.f32.mrf.mxu0 }
 0x130   :  { %11600 = vst [vmem:[#allocation55_spill] sm:$0xff] %v8760_v16  ;;  %v8762_v6 = vpop.f32.mrf.mxu1 }
 0x131   :  { %11601 = vst [vmem:[#allocation56_spill] sm:$0xff] %v8762_v6  ;;  %v8764_v37 = vpop.f32.mrf.mxu0 }
 0x132   :  { %11602 = vst [vmem:[#allocation57_spill] sm:$0xff] %v8764_v37  ;;  %v8766_v4 = vpop.f32.mrf.mxu1 }
 0x133   :  { %11603 = vst [vmem:[#allocation58_spill] sm:$0xff] %v8766_v4  ;;  %v8768_v27 = vpop.f32.mrf.mxu0 }
 0x134   :  { %11604 = vst [vmem:[#allocation59_spill] sm:$0xff] %v8768_v27  ;;  %v8770_v56 = vpop.f32.mrf.mxu1 }
 0x135   :  { %11605 = vst [vmem:[#allocation60_spill] sm:$0xff] %v8770_v56  ;;  %v8772_v15 = vpop.f32.mrf.mxu0 }
 0x136   :  { %11606 = vst [vmem:[#allocation61_spill] sm:$0xff] %v8772_v15  ;;  %v8774_v29 = vpop.f32.mrf.mxu1 }
 0x137   :  { %11607 = vst [vmem:[#allocation62_spill] sm:$0xff] %v8774_v29  ;;  %v6805_v49 = vpop.f32.mrf.mxu0  ;;  %v237_v29 = vadd.f32 %v8534_v21, %v8554_v40 }
 0x138   :  { %v1044_v10 = vadd.f32 %v6805_v49, %v8659_v9  ;;  %v8777_v31 = vpop.f32.mrf.mxu1  ;;  %v257_v9 = vadd.f32 %v8534_v21, %v8584_v35  ;;  %v317_v35 = vadd.f32 %v8534_v21, %v8615_v17 }
 0x139   :  { %v8779_v16 = vpop.f32.mrf.mxu0 }
 0x13a   :  { %v6859_v6 = vpop.f32.mrf.mxu1 }
 0x13b   :  { %v6808_v57 = vpop.f32.mrf.mxu0  ;;  %v8781_v37 = vadd.f32 %v6859_v6, %v1044_v10  ;;  %v277_v6 = vadd.f32 %v8534_v21, %v8600_v43 }
 0x13c   :  { %v1058_v4 = vadd.f32 %v6808_v57, %v8666_v20  ;;  %v8784_v27 = vpop.f32.mrf.mxu1  ;;  %v297_v57 = vadd.f32 %v8534_v21, %v8607_v30  ;;  %v337_v30 = vadd.f32 %v8534_v21, %v8622_v41 }
 0x13d   :  { %11608 = vst [vmem:[#allocation63_spill] sm:$0xff] %v8781_v37  ;;  %11609 = vst [vmem:[#allocation64_spill] sm:$0xff] %v8784_v27  ;;  %v8786_v56 = vpop.f32.mrf.mxu0  ;;  %v633_v37 = vadd.f32 %v8573_v59, %v237_v29  ;;  %v657_v40 = vadd.f32 %v8605_v25, %v277_v6  ;;  %v377_v59 = vadd.f32 %v8534_v21, %v8636_v46 }
 0x13e   :  { %v6862_v15 = vpop.f32.mrf.mxu1  ;;  %v669_v43 = vadd.f32 %v8613_v52, %v297_v57  ;;  %v417_v25 = vadd.f32 %v8534_v21, %v8650_v45  ;;  %v437_v52 = vadd.f32 %v8534_v21, %v8657_v1  ;;  %v693_v46 = vadd.f32 %v8627_v19, %v337_v30 }
 0x13f   :  { %v6811_v5 = vpop.f32.mrf.mxu0  ;;  %v8790_v49 = vadd.f32 %v6862_v15, %v1058_v4  ;;  %v645_v4 = vadd.f32 %v8596_v62, %v257_v9  ;;  %v397_v62 = vadd.f32 %v8534_v21, %v8643_v26  ;;  %v717_v6 = vadd.f32 %v8641_v3, %v377_v59  ;;  %v11612_v59 = vld [vmem:[#allocation32_spill] sm:$0xff] }
 0x140   :  { %v1072_v10 = vadd.f32 %v6811_v5, %v8673_v11  ;;  %v8799_v20 = vpop.f32.mrf.mxu1  ;;  %v357_v5 = vadd.f32 %v8534_v21, %v8629_v13  ;;  %v681_v13 = vadd.f32 %v8620_v14, %v317_v35  ;;  %v8836_v45 = vadd.f32 %v8655_v55, %v417_v25  ;;  %v11617_v25 = vld [vmem:[#allocation39_spill] sm:$0xff] }
 0x141   :  { %v8802_v27 = vpop.f32.mrf.mxu0  ;;  %v8833_v26 = vadd.f32 %v8648_v60, %v397_v62  ;;  %v457_v1 = vadd.f32 %v8534_v21, %v8664_v42  ;;  %v477_v19 = vadd.f32 %v8534_v21, %v8671_v38  ;;  %v517_v3 = vadd.f32 %v8534_v21, %v8685_v32  ;;  %v11616_v62 = vld [vmem:[#allocation26_spill] sm:$0xff] }
 0x142   :  { %v6865_v15 = vpop.f32.mrf.mxu1  ;;  %v705_v9 = vadd.f32 %v8634_v39, %v357_v5  ;;  %v497_v39 = vadd.f32 %v8534_v21, %v8678_v58  ;;  %v537_v55 = vadd.f32 %v8534_v21, %v8692_v8  ;;  %v904_v42 = vadd.f32 %v8696_v47, %v8569_v18  ;;  %v11610_v5 = vld [vmem:[#allocation35_spill] sm:$0xff] }
 0x143   :  { %v6814_v29 = vpop.f32.mrf.mxu0  ;;  %v8815_v11 = vadd.f32 %v6865_v15, %v1072_v10  ;;  %v8860_v58 = vadd.f32 %v8669_v54, %v457_v1  ;;  %v8863_v32 = vadd.f32 %v8676_v50, %v477_v19  ;;  %v8869_v8 = vadd.f32 %v8690_v51, %v517_v3  ;;  %v11622_v3 = vld [vmem:[#allocation43_spill] sm:$0xff] }
 0x144   :  { %v1086_v17 = vadd.f32 %v6814_v29, %v8680_v0  ;;  %v8824_v41 = vpop.f32.mrf.mxu1  ;;  %v8841_v0 = vadd.f32 %v8662_v63, %v437_v52  ;;  %v897_v63 = vadd.f32 %v8700_v7, %v633_v37  ;;  %v8866_v15 = vadd.f32 %v8683_v36, %v497_v39  ;;  %v11621_v39 = vld [vmem:[#allocation27_spill] sm:$0xff] }
 0x145   :  { %v8830_v57 = vpop.f32.mrf.mxu0  ;;  %v8874_v18 = vadd.f32 %v8698_v53, %v537_v55  ;;  %v1198_v54 = vadd.f32 %v8702_v34, %v904_v42  ;;  %v911_v7 = vadd.f32 %v8708_v44, %v645_v4  ;;  %v932_v36 = vadd.f32 %v8712_v2, %v8602_v23  ;;  %v11613_v44 = vld [vmem:[#allocation33_spill] sm:$0xff]  ;;  %v11614_v2 = vld [vmem:[#allocation34_spill] sm:$0xff] }
 0x146   :  { %v6868_v14 = vpop.f32.mrf.mxu1  ;;  %v1190_v47 = vadd.f32 %v8706_v48, %v897_v63  ;;  %v925_v51 = vadd.f32 %v8716_v24, %v657_v40  ;;  %v11615_v24 = vld [vmem:[#allocation36_spill] sm:$0xff]  ;;  %v11623_v42 = vld [vmem:[#allocation42_spill] sm:$0xff] }
 0x147   :  { %v6817_v60 = vpop.f32.mrf.mxu0  ;;  %v8849_v10 = vadd.f32 %v6868_v14, %v1086_v17  ;;  %v1206_v4 = vadd.f32 %v11613_v44, %v911_v7  ;;  %v1230_v23 = vadd.f32 %v11614_v2, %v932_v36  ;;  %v11620_v14 = vld [vmem:[#allocation40_spill] sm:$0xff]  ;;  %v11626_v7 = vld [vmem:[#allocation47_spill] sm:$0xff]  ;;  %v11630_v44 = vld [vmem:[#allocation29_spill] sm:$0xff] }
 0x148   :  { %v1100_v35 = vadd.f32 %v6817_v60, %v8687_v33  ;;  %v8857_v38 = vpop.f32.mrf.mxu1  ;;  %v918_v33 = vadd.f32 %v8704_v22, %v8593_v61  ;;  %v946_v22 = vadd.f32 %v11610_v5, %v8610_v12  ;;  %v11611_v61 = vld [vmem:[#allocation37_spill] sm:$0xff]  ;;  %v8896_v40 = vadd.f32 %v11615_v24, %v925_v51  ;;  %v11618_v12 = vld [vmem:[#allocation38_spill] sm:$0xff]  ;;  %v11627_v5 = vld [vmem:[#allocation44_spill] sm:$0xff] }
 0x149   :  { %v8871_v21 = vpop.f32.mrf.mxu0  ;;  %v939_v34 = vadd.f32 %v11611_v61, %v669_v43  ;;  %v11619_v43 = vld [vmem:[#allocation41_spill] sm:$0xff]  ;;  %v974_v60 = vadd.f32 %v11622_v3, %v11621_v39  ;;  %v11631_v2 = vld [vmem:[#allocation51_spill] sm:$0xff]  ;;  %v11635_v39 = vld [vmem:[#allocation52_spill] sm:$0xff] }
 0x14a   :  { %v6871_v50 = vpop.f32.mrf.mxu1  ;;  %v1214_v53 = vadd.f32 %v8710_v28, %v918_v33  ;;  %v960_v28 = vadd.f32 %v11617_v25, %v11616_v62  ;;  %v8903_v17 = vadd.f32 %v11618_v12, %v946_v22  ;;  %v953_v1 = vadd.f32 %v11619_v43, %v681_v13  ;;  %v11628_v22 = vld [vmem:[#allocation46_spill] sm:$0xff]  ;;  %v11634_v12 = vld [vmem:[#allocation53_spill] sm:$0xff] }
 0x14b   :  { %v6820_v37 = vpop.f32.mrf.mxu0  ;;  %v8884_v30 = vadd.f32 %v6871_v50, %v1100_v35  ;;  %v8907_v19 = vadd.f32 %v11620_v14, %v939_v34  ;;  %v11624_v35 = vld [vmem:[#allocation45_spill] sm:$0xff]  ;;  %v11625_v50 = vld [vmem:[#allocation28_spill] sm:$0xff]  ;;  %v8923_v61 = vadd.f32 %v11628_v22, %v974_v60  ;;  %v1002_v24 = vadd.f32 %v11631_v2, %v11630_v44  ;;  %v11636_v60 = vld [vmem:[#allocation30_spill] sm:$0xff] }
 0x14c   :  { %v1114_v48 = vadd.f32 %v6820_v37, %v11612_v59  ;;  %v8891_v29 = vpop.f32.mrf.mxu1  ;;  %v8912_v63 = vadd.f32 %v11623_v42, %v960_v28  ;;  %v967_v33 = vadd.f32 %v11624_v35, %v693_v46  ;;  %v988_v36 = vadd.f32 %v11626_v7, %v11625_v50  ;;  %v11629_v34 = vld [vmem:[#allocation49_spill] sm:$0xff]  ;;  %v11632_v46 = vld [vmem:[#allocation48_spill] sm:$0xff]  ;;  %v11633_v28 = vld [vmem:[#allocation50_spill] sm:$0xff] }
 0x14d   :  { %v8900_v52 = vpop.f32.mrf.mxu0  ;;  %v8920_v13 = vadd.f32 %v11627_v5, %v953_v1  ;;  %v981_v59 = vadd.f32 %v11629_v34, %v705_v9  ;;  %v995_v43 = vadd.f32 %v11634_v12, %v717_v6  ;;  %v11637_v9 = vld [vmem:[#allocation55_spill] sm:$0xff]  ;;  %v11638_v42 = vld [vmem:[#allocation54_spill] sm:$0xff]  ;;  %v11639_v50 = vld [vmem:[#allocation57_spill] sm:$0xff] }
 0x14e   :  { %v6874_v55 = vpop.f32.mrf.mxu1  ;;  %v8931_v25 = vadd.f32 %v11632_v46, %v967_v33  ;;  %v8943_v35 = vadd.f32 %v11638_v42, %v1002_v24  ;;  %v1009_v33 = vadd.f32 %v11639_v50, %v8833_v26  ;;  %v11640_v5 = vld [vmem:[#allocation56_spill] sm:$0xff]  ;;  %v11641_v22 = vld [vmem:[#allocation31_spill] sm:$0xff]  ;;  %v11643_v44 = vld [vmem:[#allocation58_spill] sm:$0xff]  ;;  %v1037_v26 = vadd.f32 %v8779_v16, %v8841_v0 }
 0x14f   :  { %v8917_v51 = vadd.f32 %v6874_v55, %v1114_v48  ;;  %v6883_v37 = vpop.f32.mrf.mxu0  ;;  %v8934_v48 = vadd.f32 %v11633_v28, %v988_v36  ;;  %v8938_v3 = vadd.f32 %v11635_v39, %v981_v59  ;;  %v1016_v55 = vadd.f32 %v11637_v9, %v11636_v60  ;;  %v11642_v6 = vld [vmem:[#allocation59_spill] sm:$0xff]  ;;  %v11644_v46 = vld [vmem:[#allocation61_spill] sm:$0xff]  ;;  %v11645_v28 = vld [vmem:[#allocation60_spill] sm:$0xff] }
 0x150   :  { %v8928_v62 = vpop.f32.mrf.mxu1  ;;  %v1524_v1 = vadd.f32 %v6883_v37, %v1198_v54  ;;  %v8948_v36 = vadd.f32 %v11640_v5, %v995_v43  ;;  %v1030_v54 = vadd.f32 %v11642_v6, %v11641_v22  ;;  %v1023_v24 = vadd.f32 %v11644_v46, %v8836_v45  ;;  %v11646_v39 = vld [vmem:[#allocation62_spill] sm:$0xff]  ;;  %v11647_v42 = vld [vmem:[#allocation64_spill] sm:$0xff] }
 0x151   :  { %v1517_v14 = vpop.f32.mrf.mxu0  ;;  %v8953_v2 = vadd.f32 %v11643_v44, %v1016_v55  ;;  %v8958_v12 = vadd.f32 %v11645_v28, %v1009_v33  ;;  %v1051_v45 = vadd.f32 %v8786_v56, %v8860_v58  ;;  %v8971_v50 = vadd.f32 %v11647_v42, %v1037_v26 }
 0x152   :  { %v6937_v7 = vpop.f32.mrf.mxu1  ;;  %v1518_v37 = vadd.f32 %v1517_v14, %v1190_v47  ;;  %v8963_v60 = vadd.f32 %v11646_v39, %v1030_v54  ;;  %v8966_v55 = vadd.f32 %v8777_v31, %v1023_v24  ;;  %v1065_v16 = vadd.f32 %v8802_v27, %v8863_v32 }
 0x153   :  { %v6886_v34 = vpop.f32.mrf.mxu0  ;;  %v1784_v59 = vadd.f32 %v6937_v7, %v1524_v1  ;;  %v8977_v6 = vadd.f32 %v8799_v20, %v1051_v45  ;;  %v1079_v31 = vadd.f32 %v8830_v57, %v8866_v15 }
 0x154   :  { %v1777_v43 = vpop.f32.mrf.mxu1  ;;  %v1536_v9 = vadd.f32 %v6886_v34, %v1214_v53  ;;  %v8982_v56 = vadd.f32 %v8824_v41, %v1065_v16 }
 0x155   :  { %v1968_v47 = vmax.f32 %v1784_v59, 0.0  ;;  %v1529_v14 = vpop.f32.mrf.mxu0  ;;  %v1778_v1 = vadd.f32 %v1777_v43, %v1518_v37  ;;  %v1093_v59 = vadd.f32 %v8871_v21, %v8869_v8  ;;  %v8990_v20 = vadd.f32 %v8857_v38, %v1079_v31 }
 0x156   :  { %v6940_v0 = vpop.f32.mrf.mxu1  ;;  %v1530_v7 = vadd.f32 %v1529_v14, %v1206_v4 }
 0x157   :  { %v2008_v33 = vsel %vm2003_vm1, %v1968_v47, 0  ;;  %v1967_v53 = vmax.f32 %v1778_v1, 0.0  ;;  %v6889_v5 = vpop.f32.mrf.mxu0  ;;  %v1796_v22 = vadd.f32 %v6940_v0, %v1536_v9  ;;  %v9000_v26 = vadd.f32 %v8891_v29, %v1093_v59  ;;  %v11651_v0 = vld [vmem:[#allocation2_spill] sm:$0xff]  ;;  %v11654_v59 = vld [vmem:[#allocation8_spill] sm:$0xff] }
 0x158   :  { %v8984_v58 = vand.u32 4294901760, %v2008_v33  ;;  %v1789_v54 = vpop.f32.mrf.mxu1  ;;  %v1548_v32 = vadd.f32 %v6889_v5, %v1230_v23  ;;  %v9014_v29 = vadd.f32 %v8900_v52, %v8874_v18  ;;  %v11652_v18 = vld [vmem:[#allocation5_spill] sm:$0xff] }
 0x159   :  { %v2005_v27 = vsel %vm2003_vm1, %v1967_v53, 0  ;;  %v1970_v37 = vmax.f32 %v1796_v22, 0.0  ;;  %v1541_v4 = vpop.f32.mrf.mxu0  ;;  %v1790_v34 = vadd.f32 %v1789_v54, %v1530_v7 }
 0x15a   :  { %11648 = vst [vmem:[#allocation35_spill] sm:$0xff] %v8984_v58  ;;  %v8993_v57 = vsub.f32 %v2008_v33, %v8984_v58  ;;  %v8995_v41 = vand.u32 4294901760, %v2005_v27  ;;  %v6943_v15 = vpop.f32.mrf.mxu1  ;;  %v1542_v46 = vadd.f32 %v1541_v4, %v8896_v40 }
 0x15b   :  { %v2014_v44 = vsel %vm2003_vm1, %v1970_v37, 0  ;;  %v1969_v23 = vmax.f32 %v1790_v34, 0.0  ;;  %v6892_v24 = vpop.f32.mrf.mxu0  ;;  %v1808_v28 = vadd.f32 %v6943_v15, %v1548_v32 }
 0x15c   :  { %v11324_v8 = vand.u32 4294901760, %v8993_v57  ;;  %v9004_v38 = vsub.f32 %v2005_v27, %v8995_v41  ;;  %v9006_v21 = vand.u32 4294901760, %v2014_v44  ;;  %v1801_v43 = vpop.f32.mrf.mxu1  ;;  %7063 = vmatprep.mubr.f32.mxu1 %v8995_v41  ;;  %v1560_v40 = vadd.f32 %v6892_v24, %v8903_v17 }
 0x15d   :  { %v2011_v39 = vsel %vm2003_vm1, %v1969_v23, 0  ;;  %v1972_v9 = vmax.f32 %v1808_v28, 0.0  ;;  %v1553_v47 = vpop.f32.mrf.mxu0  ;;  %v1802_v14 = vadd.f32 %v1801_v43, %v1542_v46  ;;  %7064 = vmatmul.mubr.f32.vlgmr.msra.gmra.mxu1 %v8984_v58 }
 0x15e   :  { %11649 = vst [vmem:[#allocation37_spill] sm:$0xff] %v9006_v21  ;;  %v2186_v1 = vsub.f32 %v8993_v57, %v11324_v8  ;;  %v9019_v45 = vand.u32 4294901760, %v2011_v39  ;;  %v1554_v42 = vadd.f32 %v1553_v47, %v8907_v19  ;;  %v6946_v16 = vpop.f32.mrf.mxu1  ;;  %7176 = vmatpush3.msra.mxu1 %v11651_v0  ;;  %v11326_v5 = vand.u32 4294901760, %v9004_v38 }
 0x15f   :  { %v2020_v17 = vsel %vm2003_vm1, %v1972_v9, 0  ;;  %v1971_v33 = vmax.f32 %v1802_v14, 0.0  ;;  %v6895_v7 = vpop.f32.mrf.mxu0  ;;  %v1820_v53 = vadd.f32 %v6946_v16, %v1560_v40  ;;  %7177 = vmatprep.subr.mxu1 %v11652_v18  ;;  %v9027_v52 = vsub.f32 %v2014_v44, %v9006_v21  ;;  %v11656_v9 = vld [vmem:[#allocation11_spill] sm:$0xff] }
 0x160   :  { %11650 = vst [vmem:[#allocation32_spill] sm:$0xff] %v9019_v45  ;;  %v9030_v22 = vsub.f32 %v2011_v39, %v9019_v45  ;;  %v9032_v31 = vand.u32 4294901760, %v2020_v17  ;;  %v1572_v19 = vadd.f32 %v6895_v7, %v8912_v63  ;;  %v1813_v54 = vpop.f32.mrf.mxu1  ;;  %7066 = vmatprep.mubr.f32.mxu1 %v9019_v45  ;;  %7178 = vmatpush3.msra.mxu1 %v11652_v18  ;;  %v2187_v47 = vand.u32 4294901760, %v2186_v1 }
 0x161   :  { %v2017_v27 = vsel %vm2003_vm1, %v1971_v33, 0  ;;  %v1974_v32 = vmax.f32 %v1820_v53, 0.0  ;;  %v1565_v37 = vpop.f32.mrf.mxu0  ;;  %v1814_v4 = vadd.f32 %v1813_v54, %v1554_v42  ;;  %7067 = vmatmul.mubr.f32.gmra.mxu1 %v9006_v21  ;;  %v2176_v34 = vsub.f32 %v9004_v38, %v11326_v5  ;;  %7179 = vmatprep.subr.mxu1 %v11654_v59  ;;  %v11672_v5 = vld [vmem:[#allocation18_spill] sm:$0xff] }
 0x162   :  { %11653 = vst [vmem:[#allocation33_spill] sm:$0xff] %v9032_v31  ;;  %v9044_v63 = vsub.f32 %v2020_v17, %v9032_v31  ;;  %v9046_v15 = vand.u32 4294901760, %v2017_v27  ;;  %v1566_v44 = vadd.f32 %v1565_v37, %v8920_v13  ;;  %v6949_v46 = vpop.f32.mrf.mxu1  ;;  %v11323_v23 = vand.u32 4294901760, %v9030_v22  ;;  %7180 = vmatpush3.msra.mxu1 %v11654_v59  ;;  %v11659_v37 = vld [vmem:[#allocation14_spill] sm:$0xff] }
 0x163   :  { %v2026_v24 = vsel %vm2003_vm1, %v1974_v32, 0  ;;  %v1973_v28 = vmax.f32 %v1814_v4, 0.0  ;;  %v6898_v43 = vpop.f32.mrf.mxu0  ;;  %v1832_v39 = vadd.f32 %v6949_v46, %v1572_v19  ;;  %v2177_v40 = vand.u32 4294901760, %v2176_v34  ;;  %7181 = vmatprep.subr.mxu1 %v11656_v9 }
 0x164   :  { %11655 = vst [vmem:[#allocation34_spill] sm:$0xff] %v9046_v15  ;;  %v9054_v14 = vsub.f32 %v2017_v27, %v9046_v15  ;;  %v1584_v42 = vadd.f32 %v6898_v43, %v8923_v61  ;;  %v1825_v13 = vpop.f32.mrf.mxu1  ;;  %7069 = vmatprep.mubr.f32.mxu1 %v9046_v15  ;;  %v2196_v16 = vsub.f32 %v9030_v22, %v11323_v23  ;;  %v11321_v1 = vand.u32 4294901760, %v9027_v52  ;;  %v11669_v23 = vld [vmem:[#allocation15_spill] sm:$0xff] }
 0x165   :  { %7182 = vmatpush3.msra.mxu1 %v11656_v9  ;;  %v2023_v17 = vsel %vm2003_vm1, %v1973_v28, 0  ;;  %v1976_v33 = vmax.f32 %v1832_v39, 0.0  ;;  %v1577_v7 = vpop.f32.mrf.mxu0  ;;  %v1826_v53 = vadd.f32 %v1825_v13, %v1566_v44  ;;  %6999 = vmatprep.mubr.f32.mxu0 %v2177_v40  ;;  %v9065_v61 = vand.u32 4294901760, %v2026_v24  ;;  %v11660_v28 = vld [vmem:[#allocation3_spill] sm:$0xff] }
 0x166   :  { %7070 = vmatmul.mubr.f32.gmra.mxu1 %v9032_v31  ;;  %v9067_v19 = vand.u32 4294901760, %v2023_v17  ;;  %v1578_v54 = vadd.f32 %v1577_v7, %v8931_v25  ;;  %7000 = vmatmul.mubr.f32.vlgmr.msra.gmra.mxu0 %v2187_v47  ;;  %v6952_v27 = vpop.f32.mrf.mxu1  ;;  %v2197_v32 = vand.u32 4294901760, %v2196_v16  ;;  %v2206_v43 = vsub.f32 %v9027_v52, %v11321_v1 }
 0x167   :  { %11657 = vst [vmem:[#allocation36_spill] sm:$0xff] %v9065_v61  ;;  %7183 = vmatprep.subr.mxu1 %v11659_v37  ;;  %v2032_v4 = vsel %vm2003_vm1, %v1976_v33, 0  ;;  %v1975_v34 = vmax.f32 %v1826_v53, 0.0  ;;  %v6901_v44 = vpop.f32.mrf.mxu0  ;;  %v1844_v46 = vadd.f32 %v6952_v27, %v1584_v42  ;;  %7112 = vmatpush3.msra.mxu0 %v11660_v28  ;;  %v9079_v25 = vadd.f32 %v8928_v62, %v9014_v29  ;;  %v11662_v62 = vld [vmem:[#allocation6_spill] sm:$0xff] }
 0x168   :  { %11658 = vst [vmem:[#allocation26_spill] sm:$0xff] %v9067_v19  ;;  %7184 = vmatpush3.msra.mxu1 %v11659_v37  ;;  %v9081_v39 = vand.u32 4294901760, %v2032_v4  ;;  %v1596_v40 = vadd.f32 %v6901_v44, %v8934_v48  ;;  %v1837_v47 = vpop.f32.mrf.mxu1  ;;  %7002 = vmatprep.mubr.f32.mxu0 %v2197_v32  ;;  %v11320_v42 = vand.u32 4294901760, %v9054_v14  ;;  %v2207_v53 = vand.u32 4294901760, %v2206_v43 }
 0x169   :  { %7072 = vmatprep.mubr.f32.mxu1 %v9067_v19  ;;  %v2029_v13 = vsel %vm2003_vm1, %v1975_v34, 0  ;;  %v1978_v16 = vmax.f32 %v1844_v46, 0.0  ;;  %v1589_v33 = vpop.f32.mrf.mxu0  ;;  %v1838_v7 = vadd.f32 %v1837_v47, %v1578_v54  ;;  %7113 = vmatprep.subr.mxu0 %v11662_v62  ;;  %v9090_v29 = vsub.f32 %v2023_v17, %v9067_v19  ;;  %v11664_v54 = vld [vmem:[#allocation17_spill] sm:$0xff]  ;;  %v11682_v19 = vld [vmem:[#allocation4_spill] sm:$0xff] }
 0x16a   :  { %11661 = vst [vmem:[#allocation39_spill] sm:$0xff] %v9081_v39  ;;  %7073 = vmatmul.mubr.f32.gmra.mxu1 %v9065_v61  ;;  %v9092_v48 = vand.u32 4294901760, %v2029_v13  ;;  %v1590_v27 = vadd.f32 %v1589_v33, %v8938_v3  ;;  %v6955_v32 = vpop.f32.mrf.mxu1  ;;  %v2216_v34 = vsub.f32 %v9054_v14, %v11320_v42  ;;  %7114 = vmatpush3.msra.mxu0 %v11662_v62  ;;  %v11322_v43 = vand.u32 4294901760, %v9044_v63  ;;  %v11665_v47 = vld [vmem:[#allocation9_spill] sm:$0xff] }
 0x16b   :  { %7185 = vmatprep.subr.mxu1 %v11664_v54  ;;  %v2038_v44 = vsel %vm2003_vm1, %v1978_v16, 0  ;;  %v1977_v46 = vmax.f32 %v1838_v7, 0.0  ;;  %7003 = vmatmul.mubr.f32.gmra.mxu0 %v2207_v53  ;;  %v6904_v28 = vpop.f32.mrf.mxu0  ;;  %v1856_v17 = vadd.f32 %v6955_v32, %v1596_v40  ;;  %v9104_v3 = vsub.f32 %v2026_v24, %v9065_v61 }
 0x16c   :  { %11663 = vst [vmem:[#allocation38_spill] sm:$0xff] %v9092_v48  ;;  %7115 = vmatprep.subr.mxu0 %v11665_v47  ;;  %v9107_v33 = vsub.f32 %v2032_v4, %v9081_v39  ;;  %v1608_v62 = vadd.f32 %v6904_v28, %v8943_v35  ;;  %v1849_v42 = vpop.f32.mrf.mxu1  ;;  %v2217_v1 = vand.u32 4294901760, %v2216_v34  ;;  %7075 = vmatprep.mubr.f32.mxu1 %v9092_v48  ;;  %v11666_v4 = vld [vmem:[#allocation12_spill] sm:$0xff]  ;;  %v9118_v35 = vand.u32 4294901760, %v2038_v44 }
 0x16d   :  { %7116 = vmatpush3.msra.mxu0 %v11665_v47  ;;  %v2035_v40 = vsel %vm2003_vm1, %v1977_v46, 0  ;;  %v1980_v16 = vmax.f32 %v1856_v17, 0.0  ;;  %v1601_v7 = vpop.f32.mrf.mxu0  ;;  %v1850_v53 = vadd.f32 %v1849_v42, %v1590_v27  ;;  %v2226_v24 = vsub.f32 %v9044_v63, %v11322_v43  ;;  %7186 = vmatpush3.msra.mxu1 %v11664_v54 }
 0x16e   :  { %7076 = vmatmul.mubr.f32.gmra.mxu1 %v9081_v39  ;;  %7117 = vmatprep.subr.mxu0 %v11666_v4  ;;  %11667 = vst [vmem:[#allocation41_spill] sm:$0xff] %v9118_v35  ;;  %v9120_v32 = vand.u32 4294901760, %v2035_v40  ;;  %v1602_v34 = vadd.f32 %v1601_v7, %v8948_v36  ;;  %v6958_v28 = vpop.f32.mrf.mxu1  ;;  %v11325_v46 = vand.u32 4294901760, %v9090_v29  ;;  %v9129_v8 = vsub.f32 %v2029_v13, %v9092_v48 }
 0x16f   :  { %7005 = vmatprep.mubr.f32.mxu0 %v2217_v1  ;;  %7118 = vmatpush3.msra.mxu0 %v11666_v4  ;;  %v2044_v42 = vsel %vm2003_vm1, %v1980_v16, 0  ;;  %v1979_v27 = vmax.f32 %v1850_v53, 0.0  ;;  %v2227_v17 = vand.u32 4294901760, %v2226_v24  ;;  %v6907_v47 = vpop.f32.mrf.mxu0  ;;  %v1868_v43 = vadd.f32 %v6958_v28, %v1608_v62 }
 0x170   :  { %11668 = vst [vmem:[#allocation40_spill] sm:$0xff] %v9120_v32  ;;  %7119 = vmatprep.subr.mxu0 %v11669_v23  ;;  %v1620_v36 = vadd.f32 %v6907_v47, %v8953_v2  ;;  %v1861_v1 = vpop.f32.mrf.mxu1  ;;  %v2236_v7 = vsub.f32 %v9090_v29, %v11325_v46  ;;  %7078 = vmatprep.mubr.f32.mxu1 %v9120_v32  ;;  %v11327_v13 = vand.u32 4294901760, %v9104_v3  ;;  %v9140_v2 = vand.u32 4294901760, %v2044_v42 }
 0x171   :  { %7120 = vmatpush3.msra.mxu0 %v11669_v23  ;;  %v2041_v62 = vsel %vm2003_vm1, %v1979_v27, 0  ;;  %v1982_v16 = vmax.f32 %v1868_v43, 0.0  ;;  %v1613_v53 = vpop.f32.mrf.mxu0  ;;  %v1862_v24 = vadd.f32 %v1861_v1, %v1602_v34  ;;  %v11673_v23 = vld [vmem:[#allocation19_spill] sm:$0xff] }
 0x172   :  { %7006 = vmatmul.mubr.f32.gmra.mxu0 %v2227_v17  ;;  %7079 = vmatmul.mubr.f32.gmra.mxu1 %v9118_v35  ;;  %11670 = vst [vmem:[#allocation27_spill] sm:$0xff] %v9140_v2  ;;  %v9142_v4 = vand.u32 4294901760, %v2041_v62  ;;  %v1614_v28 = vadd.f32 %v1613_v53, %v8958_v12  ;;  %v2237_v47 = vand.u32 4294901760, %v2236_v7  ;;  %v6961_v46 = vpop.f32.mrf.mxu1  ;;  %v2246_v34 = vsub.f32 %v9104_v3, %v11327_v13 }
 0x173   :  { %7121 = vmatprep.subr.mxu0 %v11672_v5  ;;  %7187 = vmatprep.subr.mxu1 %v11673_v23  ;;  %v2050_v43 = vsel %vm2003_vm1, %v1982_v16, 0  ;;  %v1981_v27 = vmax.f32 %v1862_v24, 0.0  ;;  %v6910_v17 = vpop.f32.mrf.mxu0  ;;  %v1880_v1 = vadd.f32 %v6961_v46, %v1620_v36  ;;  %v9154_v12 = vsub.f32 %v2038_v44, %v9118_v35  ;;  %v11674_v44 = vld [vmem:[#allocation21_spill] sm:$0xff] }
 0x174   :  { %11671 = vst [vmem:[#allocation43_spill] sm:$0xff] %v9142_v4  ;;  %7122 = vmatpush3.msra.mxu0 %v11672_v5  ;;  %7188 = vmatpush3.msra.mxu1 %v11673_v23  ;;  %v9157_v7 = vsub.f32 %v2035_v40, %v9120_v32  ;;  %v1632_v16 = vadd.f32 %v6910_v17, %v8963_v60  ;;  %v1873_v53 = vpop.f32.mrf.mxu1  ;;  %v11334_v24 = vand.u32 4294901760, %v9129_v8  ;;  %v2247_v36 = vand.u32 4294901760, %v2246_v34 }
 0x175   :  { %7008 = vmatprep.mubr.f32.mxu0 %v2237_v47  ;;  %7081 = vmatprep.mubr.f32.mxu1 %v9142_v4  ;;  %v2047_v46 = vsel %vm2003_vm1, %v1981_v27, 0  ;;  %v1984_v5 = vmax.f32 %v1880_v1, 0.0  ;;  %v1625_v13 = vpop.f32.mrf.mxu0  ;;  %v1874_v39 = vadd.f32 %v1873_v53, %v1614_v28  ;;  %v9165_v40 = vand.u32 4294901760, %v2050_v43  ;;  %v11677_v27 = vld [vmem:[#allocation22_spill] sm:$0xff] }
 0x176   :  { %7082 = vmatmul.mubr.f32.gmra.mxu1 %v9140_v2  ;;  %7123 = vmatprep.subr.mxu0 %v11674_v44  ;;  %v9167_v47 = vand.u32 4294901760, %v2047_v46  ;;  %v1626_v60 = vadd.f32 %v1625_v13, %v8966_v55  ;;  %v2256_v17 = vsub.f32 %v9129_v8, %v11334_v24  ;;  %v6964_v35 = vpop.f32.mrf.mxu1  ;;  %v11345_v1 = vand.u32 4294901760, %v9107_v33 }
 0x177   :  { %11675 = vst [vmem:[#allocation42_spill] sm:$0xff] %v9165_v40  ;;  %7124 = vmatpush3.msra.mxu0 %v11674_v44  ;;  %7189 = vmatprep.subr.mxu1 %v11677_v27  ;;  %v2056_v28 = vsel %vm2003_vm1, %v1984_v5, 0  ;;  %v1983_v34 = vmax.f32 %v1874_v39, 0.0  ;;  %v6913_v53 = vpop.f32.mrf.mxu0  ;;  %v1892_v32 = vadd.f32 %v6964_v35, %v1632_v16  ;;  %v9179_v55 = vsub.f32 %v2044_v42, %v9140_v2  ;;  %v11681_v2 = vld [vmem:[#allocation63_spill] sm:$0xff] }
 0x178   :  { %11676 = vst [vmem:[#allocation45_spill] sm:$0xff] %v9167_v47  ;;  %7009 = vmatmul.mubr.f32.gmra.mxu0 %v2247_v36  ;;  %7190 = vmatpush3.msra.mxu1 %v11677_v27  ;;  %v9182_v13 = vsub.f32 %v2041_v62, %v9142_v4  ;;  %v9184_v24 = vand.u32 4294901760, %v2056_v28  ;;  %v2257_v44 = vand.u32 4294901760, %v2256_v17  ;;  %v1885_v48 = vpop.f32.mrf.mxu1  ;;  %v11679_v36 = vld [vmem:[#allocation24_spill] sm:$0xff]  ;;  %v2266_v35 = vsub.f32 %v9107_v33, %v11345_v1 }
 0x179   :  { %7084 = vmatprep.mubr.f32.mxu1 %v9167_v47  ;;  %7125 = vmatprep.subr.mxu0 %v11679_v36  ;;  %v2053_v39 = vsel %vm2003_vm1, %v1983_v34, 0  ;;  %v1986_v16 = vmax.f32 %v1892_v32, 0.0  ;;  %v1637_v42 = vpop.f32.mrf.mxu0  ;;  %v1886_v5 = vadd.f32 %v1885_v48, %v1626_v60  ;;  %v9195_v62 = vsub.f32 %v2050_v43, %v9165_v40 }
 0x17a   :  { %11678 = vst [vmem:[#allocation28_spill] sm:$0xff] %v9184_v24  ;;  %7085 = vmatmul.mubr.f32.gmra.mxu1 %v9165_v40  ;;  %7126 = vmatpush3.msra.mxu0 %v11679_v36  ;;  %v9197_v17 = vand.u32 4294901760, %v2053_v39  ;;  %v1644_v4 = vadd.f32 %v6913_v53, %v11681_v2  ;;  %v11350_v34 = vand.u32 4294901760, %v9157_v7  ;;  %v6967_v61 = vpop.f32.mrf.mxu1  ;;  %v2267_v32 = vand.u32 4294901760, %v2266_v35 }
 0x17b   :  { %7011 = vmatprep.mubr.f32.mxu0 %v2257_v44  ;;  %7239 = vmatprep.subr.mxu0 %v11682_v19  ;;  %v2062_v48 = vsel %vm2003_vm1, %v1986_v16, 0  ;;  %v1985_v60 = vmax.f32 %v1886_v5, 0.0  ;;  %v11359_v1 = vand.u32 4294901760, %v9154_v12  ;;  %v6916_v36 = vpop.f32.mrf.mxu0  ;;  %v9206_v43 = vsub.f32 %v2047_v46, %v9167_v47 }
 0x17c   :  { %11680 = vst [vmem:[#allocation47_spill] sm:$0xff] %v9197_v17  ;;  %7303 = vmatprep.subr.mxu1 %v11651_v0  ;;  %v9209_v44 = vsub.f32 %v2056_v28, %v9184_v24  ;;  %v9211_v2 = vand.u32 4294901760, %v2062_v48  ;;  %v2276_v53 = vsub.f32 %v9157_v7, %v11350_v34  ;;  %v1897_v35 = vpop.f32.mrf.mxu1  ;;  %7087 = vmatprep.mubr.f32.mxu1 %v9197_v17  ;;  %v11360_v21 = vand.u32 4294901760, %v9182_v13 }
 0x17d   :  { %7012 = vmatmul.mubr.f32.gmra.mxu0 %v2267_v32  ;;  %v1638_v16 = vadd.f32 %v1637_v42, %v8971_v50  ;;  %v2059_v5 = vsel %vm2003_vm1, %v1985_v60, 0  ;;  %v2286_v46 = vsub.f32 %v9154_v12, %v11359_v1  ;;  %v1904_v28 = vadd.f32 %v6967_v61, %v1644_v4  ;;  %v1649_v40 = vpop.f32.mrf.mxu0 }
 0x17e   :  { %11683 = vst [vmem:[#allocation44_spill] sm:$0xff] %v9211_v2  ;;  %7088 = vmatmul.mubr.f32.gmra.mxu1 %v9184_v24  ;;  %v9224_v47 = vsub.f32 %v2062_v48, %v9211_v2  ;;  %v9226_v34 = vand.u32 4294901760, %v2059_v5  ;;  %v2277_v31 = vand.u32 4294901760, %v2276_v53  ;;  %v1656_v32 = vadd.f32 %v6916_v36, %v8790_v49  ;;  %v6970_v15 = vpop.f32.mrf.mxu1 }
 0x17f   :  { %v2287_v50 = vand.u32 4294901760, %v2286_v46  ;;  %v1988_v42 = vmax.f32 %v1904_v28, 0.0  ;;  %v1898_v60 = vadd.f32 %v1897_v35, %v1638_v16  ;;  %v6919_v45 = vpop.f32.mrf.mxu0  ;;  %v9232_v4 = vsub.f32 %v2053_v39, %v9197_v17 }
 0x180   :  { %11684 = vst [vmem:[#allocation46_spill] sm:$0xff] %v9226_v34  ;;  %7014 = vmatprep.mubr.f32.mxu0 %v2277_v31  ;;  %v1650_v48 = vadd.f32 %v1649_v40, %v8977_v6  ;;  %v11365_v1 = vand.u32 4294901760, %v9179_v55  ;;  %v1909_v53 = vpop.f32.mrf.mxu1  ;;  %7090 = vmatprep.mubr.f32.mxu1 %v9226_v34  ;;  %v2296_v35 = vsub.f32 %v9182_v13, %v11360_v21  ;;  %v11366_v21 = vand.u32 4294901760, %v9206_v43 }
 0x181   :  { %7015 = vmatmul.mubr.f32.gmra.mxu0 %v2287_v50  ;;  %v2068_v49 = vsel %vm2003_vm1, %v1988_v42, 0  ;;  %v1987_v36 = vmax.f32 %v1898_v60, 0.0  ;;  %v1916_v16 = vadd.f32 %v6970_v15, %v1656_v32  ;;  %v1661_v46 = vpop.f32.mrf.mxu0 }
 0x182   :  { %7091 = vmatmul.mubr.f32.gmra.mxu1 %v9211_v2  ;;  %v9243_v6 = vand.u32 4294901760, %v2068_v49  ;;  %v2306_v40 = vsub.f32 %v9179_v55, %v11365_v1  ;;  %v1910_v39 = vadd.f32 %v1909_v53, %v1650_v48  ;;  %v6973_v28 = vpop.f32.mrf.mxu1  ;;  %v2297_v42 = vand.u32 4294901760, %v2296_v35 }
 0x183   :  { %v2065_v50 = vsel %vm2003_vm1, %v1987_v36, 0  ;;  %v1990_v60 = vmax.f32 %v1916_v16, 0.0  ;;  %v6922_v15 = vpop.f32.mrf.mxu0  ;;  %v1668_v1 = vadd.f32 %v6919_v45, %v8815_v11  ;;  %v2316_v53 = vsub.f32 %v9206_v43, %v11366_v21 }
 0x184   :  { %11685 = vst [vmem:[#allocation49_spill] sm:$0xff] %v9243_v6  ;;  %v9251_v32 = vsub.f32 %v2068_v49, %v9243_v6  ;;  %v9253_v61 = vand.u32 4294901760, %v2065_v50  ;;  %v2307_v31 = vand.u32 4294901760, %v2306_v40  ;;  %v1989_v2 = vmax.f32 %v1910_v39, 0.0  ;;  %v1921_v24 = vpop.f32.mrf.mxu1  ;;  %7017 = vmatprep.mubr.f32.mxu0 %v2297_v42 }
 0x185   :  { %v2074_v48 = vsel %vm2003_vm1, %v1990_v60, 0  ;;  %v11373_v36 = vand.u32 4294901760, %v9195_v62  ;;  %v1673_v35 = vpop.f32.mrf.mxu0  ;;  %v9262_v49 = vsub.f32 %v2059_v5, %v9226_v34  ;;  %v1662_v40 = vadd.f32 %v1661_v46, %v8982_v56 }
 0x186   :  { %11686 = vst [vmem:[#allocation29_spill] sm:$0xff] %v9253_v61  ;;  %7018 = vmatmul.mubr.f32.gmra.mxu0 %v2307_v31  ;;  %v9264_v16 = vand.u32 4294901760, %v2074_v48  ;;  %v2071_v39 = vsel %vm2003_vm1, %v1989_v2, 0  ;;  %7093 = vmatprep.mubr.f32.mxu1 %v9253_v61  ;;  %v6976_v11 = vpop.f32.mrf.mxu1  ;;  %v2317_v42 = vand.u32 4294901760, %v2316_v53  ;;  %v1928_v21 = vadd.f32 %v6973_v28, %v1668_v1 }
 0x187   :  { %v9269_v45 = vand.u32 4294901760, %v2071_v39  ;;  %v2326_v60 = vsub.f32 %v9195_v62, %v11373_v36  ;;  %7094 = vmatmul.mubr.f32.gmra.mxu1 %v9243_v6  ;;  %v6925_v5 = vpop.f32.mrf.mxu0  ;;  %v1680_v56 = vadd.f32 %v6922_v15, %v8849_v10  ;;  %v1922_v46 = vadd.f32 %v1921_v24, %v1662_v40 }
 0x188   :  { %11687 = vst [vmem:[#allocation51_spill] sm:$0xff] %v9264_v16  ;;  %v11378_v2 = vand.u32 4294901760, %v9232_v4  ;;  %v1933_v34 = vpop.f32.mrf.mxu1  ;;  %v9279_v17 = vsub.f32 %v2065_v50, %v9253_v61  ;;  %7020 = vmatprep.mubr.f32.mxu0 %v2317_v42  ;;  %v1992_v58 = vmax.f32 %v1928_v21, 0.0  ;;  %v11688_v36 = vand.u32 4294901760, %v9209_v44 }
 0x189   :  { %v2327_v53 = vand.u32 4294901760, %v2326_v60  ;;  %v1685_v28 = vpop.f32.mrf.mxu0  ;;  %7096 = vmatprep.mubr.f32.mxu1 %v9269_v45  ;;  %v9286_v31 = vsub.f32 %v2074_v48, %v9264_v16  ;;  %v1674_v10 = vadd.f32 %v1673_v35, %v8990_v20  ;;  %v1991_v24 = vmax.f32 %v1922_v46, 0.0 }
 0x18a   :  { %v2346_v1 = vsub.f32 %v9209_v44, %v11688_v36  ;;  %v2336_v50 = vsub.f32 %v9232_v4, %v11378_v2  ;;  %v6979_v15 = vpop.f32.mrf.mxu1  ;;  %v2080_v21 = vsel %vm2003_vm1, %v1992_v58, 0  ;;  %v1692_v36 = vadd.f32 %v6925_v5, %v8884_v30 }
 0x18b   :  { %7021 = vmatmul.mubr.f32.gmra.mxu0 %v2327_v53  ;;  %v1940_v42 = vadd.f32 %v6976_v11, %v1680_v56  ;;  %7097 = vmatmul.mubr.f32.gmra.mxu1 %v9264_v16  ;;  %v6928_v60 = vpop.f32.mrf.mxu0  ;;  %v9295_v48 = vand.u32 4294901760, %v2080_v21  ;;  %v2077_v20 = vsel %vm2003_vm1, %v1991_v24, 0  ;;  %v1934_v46 = vadd.f32 %v1933_v34, %v1674_v10 }
 0x18c   :  { %v2347_v40 = vand.u32 4294901760, %v2346_v1  ;;  %v2337_v35 = vand.u32 4294901760, %v2336_v50  ;;  %v1945_v6 = vpop.f32.mrf.mxu1  ;;  %v9298_v61 = vand.u32 4294901760, %v2077_v20  ;;  %v11379_v53 = vand.u32 4294901760, %v9262_v49 }
 0x18d   :  { %v1994_v2 = vmax.f32 %v1940_v42, 0.0  ;;  %v11689_v58 = vand.u32 4294901760, %v9224_v47  ;;  %v9306_v5 = vsub.f32 %v2071_v39, %v9269_v45  ;;  %v1993_v56 = vmax.f32 %v1934_v46, 0.0 }
 0x18e   :  { %7023 = vmatprep.mubr.f32.mxu0 %v2337_v35  ;;  %v1952_v1 = vadd.f32 %v6979_v15, %v1692_v36  ;;  %v6982_v24 = vpop.f32.mrf.mxu1  ;;  %v9309_v34 = vsub.f32 %v2080_v21, %v9295_v48  ;;  %v1686_v50 = vadd.f32 %v1685_v28, %v9000_v26  ;;  %v2356_v42 = vsub.f32 %v9262_v49, %v11379_v53 }
 0x18f   :  { %v2366_v30 = vsub.f32 %v9224_v47, %v11689_v58  ;;  %7024 = vmatmul.mubr.f32.gmra.mxu0 %v2347_v40  ;;  %v2086_v10 = vsel %vm2003_vm1, %v1994_v2, 0  ;;  %v1697_v58 = vpop.f32.mrf.mxu0  ;;  %7099 = vmatprep.mubr.f32.mxu1 %v9298_v61  ;;  %v2083_v15 = vsel %vm2003_vm1, %v1993_v56, 0  ;;  %v1704_v36 = vadd.f32 %v6928_v60, %v8917_v51 }
 0x190   :  { %v9317_v39 = vand.u32 4294901760, %v2086_v10  ;;  %v1996_v21 = vmax.f32 %v1952_v1, 0.0  ;;  %7100 = vmatmul.mubr.f32.gmra.mxu1 %v9295_v48  ;;  %v9322_v40 = vand.u32 4294901760, %v2083_v15  ;;  %v2357_v2 = vand.u32 4294901760, %v2356_v42  ;;  %v1957_v35 = vpop.f32.mrf.mxu1 }
 0x191   :  { %v2367_v26 = vand.u32 4294901760, %v2366_v30  ;;  %v1946_v28 = vadd.f32 %v1945_v6, %v1686_v50  ;;  %v1698_v53 = vadd.f32 %v1697_v58, %v9079_v25  ;;  %v11384_v11 = vand.u32 4294901760, %v9279_v17 }
 0x192   :  { %v2092_v46 = vsel %vm2003_vm1, %v1996_v21, 0  ;;  %v11690_v16 = vand.u32 4294901760, %v9251_v32  ;;  %v9331_v51 = vsub.f32 %v2077_v20, %v9298_v61  ;;  %v9334_v60 = vsub.f32 %v2086_v10, %v9317_v39  ;;  %7026 = vmatprep.mubr.f32.mxu0 %v2357_v2  ;;  %7102 = vmatprep.mubr.f32.mxu1 %v9322_v40 }
 0x193   :  { %v1995_v30 = vmax.f32 %v1946_v28, 0.0  ;;  %v1964_v6 = vadd.f32 %v6982_v24, %v1704_v36  ;;  %v11385_v1 = vand.u32 4294901760, %v9309_v34  ;;  %v9339_v25 = vsub.f32 %v2083_v15, %v9322_v40  ;;  %7027 = vmatmul.mubr.f32.gmra.mxu0 %v2367_v26 }
 0x194   :  { %v2386_v56 = vsub.f32 %v9251_v32, %v11690_v16  ;;  %v2376_v16 = vsub.f32 %v9279_v17, %v11384_v11  ;;  %v1958_v20 = vadd.f32 %v1957_v35, %v1698_v53  ;;  %7103 = vmatmul.mubr.f32.gmra.mxu1 %v9317_v39  ;;  %v9345_v10 = vand.u32 4294901760, %v2092_v46 }
 0x195   :  { %v2089_v50 = vsel %vm2003_vm1, %v1995_v30, 0  ;;  %v1998_v24 = vmax.f32 %v1964_v6, 0.0  ;;  %v11382_v42 = vand.u32 4294901760, %v9306_v5  ;;  %v11691_v26 = vand.u32 4294901760, %v9286_v31 }
 0x196   :  { %v9349_v58 = vand.u32 4294901760, %v2089_v50  ;;  %v2377_v36 = vand.u32 4294901760, %v2376_v16  ;;  %v2387_v15 = vand.u32 4294901760, %v2386_v56  ;;  %v1997_v21 = vmax.f32 %v1958_v20, 0.0 }
 0x197   :  { %v2098_v2 = vsel %vm2003_vm1, %v1998_v24, 0  ;;  %v2396_v53 = vsub.f32 %v9306_v5, %v11382_v42  ;;  %v2406_v28 = vsub.f32 %v9286_v31, %v11691_v26  ;;  %v11383_v35 = vand.u32 4294901760, %v9331_v51 }
 0x198   :  { %v9360_v30 = vsub.f32 %v2089_v50, %v9349_v58  ;;  %7029 = vmatprep.mubr.f32.mxu0 %v2377_v36  ;;  %v2095_v6 = vsel %vm2003_vm1, %v1997_v21, 0  ;;  %7105 = vmatprep.mubr.f32.mxu1 %v9349_v58  ;;  %v11388_v56 = vand.u32 4294901760, %v9334_v60  ;;  %v9372_v50 = vsub.f32 %v2092_v46, %v9345_v10 }
 0x199   :  { %7030 = vmatmul.mubr.f32.gmra.mxu0 %v2387_v15  ;;  %v9365_v16 = vand.u32 4294901760, %v2095_v6  ;;  %v2397_v20 = vand.u32 4294901760, %v2396_v53  ;;  %v2416_v24 = vsub.f32 %v9331_v51, %v11383_v35  ;;  %7106 = vmatmul.mubr.f32.gmra.mxu1 %v9345_v10  ;;  %v9374_v36 = vand.u32 4294901760, %v2098_v2 }
 0x19a   :  { %v11386_v21 = vand.u32 4294901760, %v9339_v25  ;;  %v11387_v26 = vand.u32 4294901760, %v9360_v30  ;;  %v2407_v53 = vand.u32 4294901760, %v2406_v28  ;;  %v2426_v35 = vsub.f32 %v9309_v34, %v11385_v1 }
 0x19b   :  { %v9379_v15 = vsub.f32 %v2095_v6, %v9365_v16  ;;  %7032 = vmatprep.mubr.f32.mxu0 %v2397_v20  ;;  %v2417_v42 = vand.u32 4294901760, %v2416_v24  ;;  %7108 = vmatprep.mubr.f32.mxu1 %v9365_v16  ;;  %v11692_v6 = vand.u32 4294901760, %v9004_v38  ;;  %v2465_v24 = vand.u32 4294901760, %v9372_v50 }
 0x19c   :  { %v2436_v46 = vsub.f32 %v9339_v25, %v11386_v21  ;;  %v2456_v28 = vsub.f32 %v9360_v30, %v11387_v26  ;;  %v9397_v1 = vsub.f32 %v2098_v2, %v9374_v36  ;;  %v2427_v21 = vand.u32 4294901760, %v2426_v35 }
 0x19d   :  { %7033 = vmatmul.mubr.f32.gmra.mxu0 %v2407_v53  ;;  %7109 = vmatmul.mubr.f32.gmra.mxu1 %v9374_v36  ;;  %v2475_v20 = vand.u32 4294901760, %v9379_v15  ;;  %v11693_v53 = vand.u32 4294901760, %v8993_v57 }
 0x19e   :  { %7035 = vmatprep.mubr.f32.mxu0 %v2417_v42  ;;  %v2437_v11 = vand.u32 4294901760, %v2436_v46  ;;  %7191 = vmatprep.mubr.f32.mxu1 %v11692_v6  ;;  %v2446_v42 = vsub.f32 %v9334_v60, %v11388_v56  ;;  %v2457_v46 = vand.u32 4294901760, %v2456_v28  ;;  %v11694_v6 = vand.u32 4294901760, %v9030_v22 }
 0x19f   :  { %v2476_v26 = vsub.f32 %v9379_v15, %v2475_v20  ;;  %v2485_v2 = vand.u32 4294901760, %v9397_v1  ;;  %v2466_v56 = vsub.f32 %v9372_v50, %v2465_v24  ;;  %v11696_v28 = vand.u32 4294901760, %v9054_v14 }
 0x1a0   :  { %v2447_v35 = vand.u32 4294901760, %v2446_v42 }
 0x1a1   :  { %7036 = vmatmul.mubr.f32.gmra.mxu0 %v2427_v21  ;;  %7192 = vmatmul.mubr.f32.vlgmr.msra.gmra.mxu1 %v11693_v53  ;;  %v2477_v21 = vand.u32 4294901760, %v2476_v26  ;;  %v2467_v53 = vand.u32 4294901760, %v2466_v56  ;;  %v2486_v42 = vsub.f32 %v9397_v1, %v2485_v2  ;;  %v11699_v56 = vand.u32 4294901760, %v9104_v3 }
 0x1a2   :  { %7038 = vmatprep.mubr.f32.mxu0 %v2437_v11  ;;  %7194 = vmatprep.mubr.f32.mxu1 %v11694_v6  ;;  %v11695_v11 = vand.u32 4294901760, %v9027_v52  ;;  %v11701_v6 = vand.u32 4294901760, %v9107_v33 }
 0x1a3   :  { %7304 = vmatpush3.msra.mxu1 %v11651_v0  ;;  %v11697_v0 = vand.u32 4294901760, %v9044_v63  ;;  %v2487_v26 = vand.u32 4294901760, %v2486_v42  ;;  %v11749_v42 = vld [vmem:[#allocation49_spill] sm:$0xff] }
 0x1a4   :  { %7305 = vmatprep.subr.mxu1 %v11652_v18 }
 0x1a5   :  { %7039 = vmatmul.mubr.f32.gmra.mxu0 %v2447_v35  ;;  %7195 = vmatmul.mubr.f32.gmra.mxu1 %v11695_v11  ;;  %v11721_v35 = vld [vmem:[#allocation25_spill] sm:$0xff]  ;;  %v11725_v11 = vand.u32 4294901760, %v9339_v25 }
 0x1a6   :  { %7041 = vmatprep.mubr.f32.mxu0 %v2457_v46  ;;  %7197 = vmatprep.mubr.f32.mxu1 %v11696_v28  ;;  %v11698_v46 = vand.u32 4294901760, %v9090_v29  ;;  %v25_v28 = vld [vmem:[%s11213_s1 + $0x70] sm:$0xff] }
 0x1a7   :  { %7306 = vmatpush3.msra.mxu1 %v11652_v18  ;;  %v11700_v18 = vand.u32 4294901760, %v9129_v8 }
 0x1a8   :  { %7307 = vmatprep.subr.mxu1 %v11654_v59 }
 0x1a9   :  { %7042 = vmatmul.mubr.f32.gmra.mxu0 %v2467_v53  ;;  %7198 = vmatmul.mubr.f32.gmra.mxu1 %v11697_v0  ;;  %v9573_v53 = vand.u32 4294901760, %v25_v28 }
 0x1aa   :  { %7044 = vmatprep.mubr.f32.mxu0 %v2477_v21  ;;  %7200 = vmatprep.mubr.f32.mxu1 %v11698_v46  ;;  %v11747_v21 = vld [vmem:[#allocation29_spill] sm:$0xff] }
 0x1ab   :  { %7308 = vmatpush3.msra.mxu1 %v11654_v59  ;;  %v11702_v59 = vld [vmem:[#allocation7_spill] sm:$0xff]  ;;  %11748 = vst [vmem:[#allocation48_spill] sm:$0xff] %v9573_v53  ;;  %v9578_v0 = vsub.f32 %v25_v28, %v9573_v53 }
 0x1ac   :  { %7309 = vmatprep.subr.mxu1 %v11656_v9 }
 0x1ad   :  { %7045 = vmatmul.mubr.f32.gmra.mxu0 %v2487_v26  ;;  %7201 = vmatmul.mubr.f32.gmra.mxu1 %v11699_v56  ;;  %11750 = vst [vmem:[#allocation50_spill] sm:$0xff] %v9578_v0  ;;  %v9584_v46 = vand.u32 4294901760, %v9578_v0  ;;  %v11752_v26 = vld [vmem:[#allocation51_spill] sm:$0xff] }
 0x1ae   :  { %7127 = vmatprep.mubr.f32.mxu0 %v9004_v38  ;;  %7203 = vmatprep.mubr.f32.mxu1 %v11700_v18  ;;  %v11703_v38 = vand.u32 4294901760, %v9157_v7 }
 0x1af   :  { %7310 = vmatpush3.msra.mxu1 %v11656_v9  ;;  %v11706_v9 = vld [vmem:[#allocation10_spill] sm:$0xff]  ;;  %11751 = vst [vmem:[#allocation53_spill] sm:$0xff] %v9584_v46  ;;  %v4520_v56 = vsub.f32 %v9578_v0, %v9584_v46 }
 0x1b0   :  { %7311 = vmatprep.subr.mxu1 %v11659_v37 }
 0x1b1   :  { %7128 = vmatmul.mubr.f32.vlgmr.msra.gmra.mxu0 %v8993_v57  ;;  %7204 = vmatmul.mubr.f32.gmra.mxu1 %v11701_v6  ;;  %v11704_v57 = vand.u32 4294901760, %v9154_v12  ;;  %v4521_v18 = vand.u32 4294901760, %v4520_v56  ;;  %v24_v6 = vld [vmem:[%s11213_s1 + $0x68] sm:$0xff] }
 0x1b2   :  { %7130 = vmatprep.mubr.f32.mxu0 %v9030_v22  ;;  %7240 = vmatpush3.msra.mxu0 %v11682_v19  ;;  %v11705_v22 = vand.u32 4294901760, %v9182_v13  ;;  %v11709_v19 = vld [vmem:[#allocation13_spill] sm:$0xff] }
 0x1b3   :  { %7241 = vmatprep.subr.mxu0 %v11702_v59  ;;  %7206 = vmatprep.mubr.f32.mxu1 %v11703_v38 }
 0x1b4   :  { %7242 = vmatpush3.msra.mxu0 %v11702_v59  ;;  %7312 = vmatpush3.msra.mxu1 %v11659_v37  ;;  %v11711_v37 = vand.u32 4294901760, %v9232_v4  ;;  %v9604_v59 = vand.u32 4294901760, %v24_v6 }
 0x1b5   :  { %7131 = vmatmul.mubr.f32.gmra.mxu0 %v9027_v52  ;;  %7207 = vmatmul.mubr.f32.gmra.mxu1 %v11704_v57  ;;  %v11707_v52 = vand.u32 4294901760, %v9179_v55 }
 0x1b6   :  { %7133 = vmatprep.mubr.f32.mxu0 %v9054_v14  ;;  %7209 = vmatprep.mubr.f32.mxu1 %v11705_v22  ;;  %v11708_v14 = vand.u32 4294901760, %v9206_v43  ;;  %11753 = vst [vmem:[#allocation52_spill] sm:$0xff] %v9604_v59  ;;  %v9609_v38 = vsub.f32 %v24_v6, %v9604_v59 }
 0x1b7   :  { %7243 = vmatprep.subr.mxu0 %v11706_v9  ;;  %7313 = vmatprep.subr.mxu1 %v11664_v54 }
 0x1b8   :  { %7244 = vmatpush3.msra.mxu0 %v11706_v9  ;;  %7314 = vmatpush3.msra.mxu1 %v11664_v54  ;;  %v11713_v54 = vand.u32 4294901760, %v9209_v44  ;;  %11754 = vst [vmem:[#allocation30_spill] sm:$0xff] %v9609_v38  ;;  %v9615_v57 = vand.u32 4294901760, %v9609_v38 }
 0x1b9   :  { %7134 = vmatmul.mubr.f32.gmra.mxu0 %v9044_v63  ;;  %7210 = vmatmul.mubr.f32.gmra.mxu1 %v11707_v52  ;;  %v11710_v63 = vand.u32 4294901760, %v9195_v62 }
 0x1ba   :  { %7136 = vmatprep.mubr.f32.mxu0 %v9090_v29  ;;  %7212 = vmatprep.mubr.f32.mxu1 %v11708_v14  ;;  %v11712_v29 = vld [vmem:[#allocation16_spill] sm:$0xff]  ;;  %11755 = vst [vmem:[#allocation55_spill] sm:$0xff] %v9615_v57  ;;  %v4527_v9 = vsub.f32 %v9609_v38, %v9615_v57 }
 0x1bb   :  { %7245 = vmatprep.subr.mxu0 %v11709_v19  ;;  %7315 = vmatprep.subr.mxu1 %v11673_v23 }
 0x1bc   :  { %7246 = vmatpush3.msra.mxu0 %v11709_v19  ;;  %7316 = vmatpush3.msra.mxu1 %v11673_v23  ;;  %v11716_v23 = vand.u32 4294901760, %v9224_v47  ;;  %v4528_v52 = vand.u32 4294901760, %v4527_v9 }
 0x1bd   :  { %7137 = vmatmul.mubr.f32.gmra.mxu0 %v9104_v3  ;;  %7213 = vmatmul.mubr.f32.gmra.mxu1 %v11710_v63  ;;  %v11715_v3 = vld [vmem:[#allocation20_spill] sm:$0xff]  ;;  %v9632_v63 = vld [vmem:[%s11213_s1 + $0x79] ss:$0 sm:$0xff] }
 0x1be   :  { %7139 = vmatprep.mubr.f32.mxu0 %v9129_v8  ;;  %7215 = vmatprep.mubr.f32.mxu1 %v11711_v37  ;;  %v11714_v8 = vand.u32 4294901760, %v9262_v49 }
 0x1bf   :  { %7247 = vmatprep.subr.mxu0 %v11712_v29  ;;  %7317 = vmatprep.subr.mxu1 %v11677_v27 }
 0x1c0   :  { %7248 = vmatpush3.msra.mxu0 %v11712_v29  ;;  %7318 = vmatpush3.msra.mxu1 %v11677_v27  ;;  %v11718_v27 = vld [vmem:[#allocation23_spill] sm:$0xff] }
 0x1c1   :  { %7140 = vmatmul.mubr.f32.gmra.mxu0 %v9107_v33  ;;  %7216 = vmatmul.mubr.f32.gmra.mxu1 %v11713_v54  ;;  %v11717_v33 = vand.u32 4294901760, %v9279_v17 }
 0x1c2   :  { %7142 = vmatprep.mubr.f32.mxu0 %v9157_v7  ;;  %7218 = vmatprep.mubr.f32.mxu1 %v11714_v8  ;;  %v11719_v7 = vand.u32 4294901760, %v9251_v32 }
 0x1c3   :  { %7249 = vmatprep.subr.mxu0 %v11715_v3  ;;  %7423 = vmatprep.subr.mxu1 %v4521_v18 }
 0x1c4   :  { %7250 = vmatpush3.msra.mxu0 %v11715_v3 }
 0x1c5   :  { %7143 = vmatmul.mubr.f32.gmra.mxu0 %v9154_v12  ;;  %7219 = vmatmul.mubr.f32.gmra.mxu1 %v11716_v23  ;;  %v11720_v12 = vand.u32 4294901760, %v9306_v5 }
 0x1c6   :  { %7145 = vmatprep.mubr.f32.mxu0 %v9182_v13  ;;  %7221 = vmatprep.mubr.f32.mxu1 %v11717_v33  ;;  %v11722_v13 = vand.u32 4294901760, %v9286_v31 }
 0x1c7   :  { %7251 = vmatprep.subr.mxu0 %v11718_v27 }
 0x1c8   :  { %7252 = vmatpush3.msra.mxu0 %v11718_v27 }
 0x1c9   :  { %7146 = vmatmul.mubr.f32.gmra.mxu0 %v9179_v55  ;;  %7222 = vmatmul.mubr.f32.gmra.mxu1 %v11719_v7  ;;  %v11723_v55 = vand.u32 4294901760, %v9331_v51 }
 0x1ca   :  { %7148 = vmatprep.mubr.f32.mxu0 %v9206_v43  ;;  %7224 = vmatprep.mubr.f32.mxu1 %v11720_v12  ;;  %v11724_v43 = vand.u32 4294901760, %v9309_v34 }
 0x1cb   :  { %7253 = vmatprep.subr.mxu0 %v11721_v35 }
 0x1cc   :  { %7254 = vmatpush3.msra.mxu0 %v11721_v35 }
 0x1cd   :  { %7149 = vmatmul.mubr.f32.gmra.mxu0 %v9195_v62  ;;  %7225 = vmatmul.mubr.f32.gmra.mxu1 %v11722_v13  ;;  %v11726_v62 = vand.u32 4294901760, %v9334_v60 }
 0x1ce   :  { %7151 = vmatprep.mubr.f32.mxu0 %v9232_v4  ;;  %7227 = vmatprep.mubr.f32.mxu1 %v11723_v55  ;;  %v11727_v4 = vand.u32 4294901760, %v9360_v30 }
 0x1cf   :  { %7367 = vmatprep.subr.mxu0 %v9573_v53 }
 0x1d1   :  { %7152 = vmatmul.mubr.f32.gmra.mxu0 %v9209_v44  ;;  %7228 = vmatmul.mubr.f32.gmra.mxu1 %v11724_v43  ;;  %v11730_v44 = vld [vmem:[#allocation37_spill] sm:$0xff] }
 0x1d2   :  { %7154 = vmatprep.mubr.f32.mxu0 %v9262_v49  ;;  %7230 = vmatprep.mubr.f32.mxu1 %v11725_v11  ;;  %v11732_v49 = vld [vmem:[#allocation33_spill] sm:$0xff] }
 0x1d5   :  { %7155 = vmatmul.mubr.f32.gmra.mxu0 %v9224_v47  ;;  %7231 = vmatmul.mubr.f32.gmra.mxu1 %v11726_v62  ;;  %v11728_v47 = vld [vmem:[#allocation35_spill] sm:$0xff] }
 0x1d6   :  { %7157 = vmatprep.mubr.f32.mxu0 %v9279_v17  ;;  %7233 = vmatprep.mubr.f32.mxu1 %v11727_v4  ;;  %v11729_v17 = vld [vmem:[#allocation32_spill] sm:$0xff] }
 0x1d9   :  { %7158 = vmatmul.mubr.f32.gmra.mxu0 %v9251_v32  ;;  %7234 = vmatmul.mubr.f32.gmra.mxu1 %v2465_v24  ;;  %v11731_v32 = vld [vmem:[#allocation34_spill] sm:$0xff] }
 0x1da   :  { %7160 = vmatprep.mubr.f32.mxu0 %v9306_v5  ;;  %7236 = vmatprep.mubr.f32.mxu1 %v2475_v20  ;;  %v11734_v5 = vld [vmem:[#allocation36_spill] sm:$0xff]  ;;  %v11745_v24 = vld [vmem:[#allocation46_spill] sm:$0xff] }
 0x1db   :  { %v11744_v20 = vld [vmem:[#allocation28_spill] sm:$0xff] }
 0x1dd   :  { %7161 = vmatmul.mubr.f32.gmra.mxu0 %v9286_v31  ;;  %7237 = vmatmul.mubr.f32.gmra.mxu1 %v2485_v2  ;;  %v11733_v31 = vld [vmem:[#allocation26_spill] sm:$0xff]  ;;  %v11746_v2 = vld [vmem:[#allocation44_spill] sm:$0xff] }
 0x1de   :  { %7163 = vmatprep.mubr.f32.mxu0 %v9331_v51  ;;  %7319 = vmatprep.mubr.f32.mxu1 %v8995_v41  ;;  %v11736_v51 = vld [vmem:[#allocation39_spill] sm:$0xff] }
 0x1e1   :  { %7164 = vmatmul.mubr.f32.gmra.mxu0 %v9309_v34  ;;  %7320 = vmatmul.mubr.f32.vlgmr.msra.gmra.mxu1 %v11728_v47  ;;  %v11735_v34 = vld [vmem:[#allocation38_spill] sm:$0xff] }
 0x1e2   :  { %7166 = vmatprep.mubr.f32.mxu0 %v9339_v25  ;;  %7322 = vmatprep.mubr.f32.mxu1 %v11729_v17  ;;  %v11738_v25 = vld [vmem:[#allocation41_spill] sm:$0xff] }
 0x1e3   :  { %7424 = vmatpush3.msra.mxu1 %v4521_v18 }
 0x1e4   :  { %7425 = vmatprep.subr.mxu1 %v4528_v52 }
 0x1e5   :  { %7167 = vmatmul.mubr.f32.gmra.mxu0 %v9334_v60  ;;  %7323 = vmatmul.mubr.f32.gmra.mxu1 %v11730_v44  ;;  %v11737_v60 = vld [vmem:[#allocation40_spill] sm:$0xff] }
 0x1e6   :  { %7169 = vmatprep.mubr.f32.mxu0 %v9360_v30  ;;  %7325 = vmatprep.mubr.f32.mxu1 %v11731_v32  ;;  %v11741_v30 = vld [vmem:[#allocation45_spill] sm:$0xff] }
 0x1e7   :  { %7426 = vmatpush3.msra.mxu1 %v4528_v52 }
 0x1e9   :  { %7170 = vmatmul.mubr.f32.gmra.mxu0 %v9372_v50  ;;  %7326 = vmatmul.mubr.f32.gmra.mxu1 %v11732_v49  ;;  %v11742_v50 = vld [vmem:[#allocation42_spill] sm:$0xff] }
 0x1ea   :  { %7172 = vmatprep.mubr.f32.mxu0 %v9379_v15  ;;  %7328 = vmatprep.mubr.f32.mxu1 %v11733_v31  ;;  %v11743_v15 = vld [vmem:[#allocation47_spill] sm:$0xff] }
 0x1ed   :  { %7173 = vmatmul.mubr.f32.gmra.mxu0 %v9397_v1  ;;  %7329 = vmatmul.mubr.f32.gmra.mxu1 %v11734_v5  ;;  %v11739_v1 = vld [vmem:[#allocation43_spill] sm:$0xff] }
 0x1ee   :  { %7255 = vmatprep.mubr.f32.mxu0 %v8995_v41  ;;  %7331 = vmatprep.mubr.f32.mxu1 %v11735_v34  ;;  %v11740_v41 = vld [vmem:[#allocation27_spill] sm:$0xff] }
 0x1f1   :  { %7256 = vmatmul.mubr.f32.vlgmr.msra.gmra.mxu0 %v11728_v47  ;;  %7332 = vmatmul.mubr.f32.gmra.mxu1 %v11736_v51 }
 0x1f2   :  { %7258 = vmatprep.mubr.f32.mxu0 %v11729_v17  ;;  %7334 = vmatprep.mubr.f32.mxu1 %v11737_v60 }
 0x1f3   :  { %7368 = vmatpush3.msra.mxu0 %v9573_v53 }
 0x1f4   :  { %7369 = vmatprep.subr.mxu0 %v9604_v59 }
 0x1f5   :  { %7259 = vmatmul.mubr.f32.gmra.mxu0 %v11730_v44  ;;  %7335 = vmatmul.mubr.f32.gmra.mxu1 %v11738_v25 }
 0x1f6   :  { %7261 = vmatprep.mubr.f32.mxu0 %v11731_v32  ;;  %7337 = vmatprep.mubr.f32.mxu1 %v11739_v1 }
 0x1f7   :  { %7370 = vmatpush3.msra.mxu0 %v9604_v59 }
 0x1f9   :  { %7262 = vmatmul.mubr.f32.gmra.mxu0 %v11732_v49  ;;  %7338 = vmatmul.mubr.f32.gmra.mxu1 %v11740_v41 }
 0x1fa   :  { %7264 = vmatprep.mubr.f32.mxu0 %v11733_v31  ;;  %7340 = vmatprep.mubr.f32.mxu1 %v11741_v30 }
 0x1fd   :  { %7265 = vmatmul.mubr.f32.gmra.mxu0 %v11734_v5  ;;  %7341 = vmatmul.mubr.f32.gmra.mxu1 %v11742_v50 }
 0x1fe   :  { %7267 = vmatprep.mubr.f32.mxu0 %v11735_v34  ;;  %7343 = vmatprep.mubr.f32.mxu1 %v11743_v15 }
 0x201   :  { %7268 = vmatmul.mubr.f32.gmra.mxu0 %v11736_v51  ;;  %7344 = vmatmul.mubr.f32.gmra.mxu1 %v11744_v20 }
 0x202   :  { %7270 = vmatprep.mubr.f32.mxu0 %v11737_v60  ;;  %7346 = vmatprep.mubr.f32.mxu1 %v11745_v24 }
 0x205   :  { %7271 = vmatmul.mubr.f32.gmra.mxu0 %v11738_v25  ;;  %7347 = vmatmul.mubr.f32.gmra.mxu1 %v11746_v2 }
 0x206   :  { %7273 = vmatprep.mubr.f32.mxu0 %v11739_v1  ;;  %7349 = vmatprep.mubr.f32.mxu1 %v11747_v21 }
 0x209   :  { %7274 = vmatmul.mubr.f32.gmra.mxu0 %v11740_v41  ;;  %7350 = vmatmul.mubr.f32.gmra.mxu1 %v11749_v42 }
 0x20a   :  { %7276 = vmatprep.mubr.f32.mxu0 %v11741_v30  ;;  %7352 = vmatprep.mubr.f32.mxu1 %v9269_v45 }
 0x20d   :  { %7277 = vmatmul.mubr.f32.gmra.mxu0 %v11742_v50  ;;  %7353 = vmatmul.mubr.f32.gmra.mxu1 %v11752_v26 }
 0x20e   :  { %7279 = vmatprep.mubr.f32.mxu0 %v11743_v15  ;;  %7355 = vmatprep.mubr.f32.mxu1 %v9298_v61 }
 0x211   :  { %7280 = vmatmul.mubr.f32.gmra.mxu0 %v11744_v20  ;;  %7356 = vmatmul.mubr.f32.gmra.mxu1 %v9295_v48 }
 0x212   :  { %7282 = vmatprep.mubr.f32.mxu0 %v11745_v24  ;;  %7358 = vmatprep.mubr.f32.mxu1 %v9322_v40 }
 0x215   :  { %7283 = vmatmul.mubr.f32.gmra.mxu0 %v11746_v2  ;;  %7359 = vmatmul.mubr.f32.gmra.mxu1 %v9317_v39 }
 0x216   :  { %7285 = vmatprep.mubr.f32.mxu0 %v11747_v21  ;;  %7361 = vmatprep.mubr.f32.mxu1 %v9349_v58 }
 0x219   :  { %7286 = vmatmul.mubr.f32.gmra.mxu0 %v11749_v42  ;;  %7362 = vmatmul.mubr.f32.gmra.mxu1 %v9345_v10 }
 0x21a   :  { %7288 = vmatprep.mubr.f32.mxu0 %v9269_v45  ;;  %7364 = vmatprep.mubr.f32.mxu1 %v9365_v16 }
 0x21d   :  { %7289 = vmatmul.mubr.f32.gmra.mxu0 %v11752_v26  ;;  %7365 = vmatmul.mubr.f32.gmra.mxu1 %v9374_v36  ;;  %v7065_v22 = vpop.f32.mrf.mxu1 }
 0x21e   :  { %7291 = vmatprep.mubr.f32.mxu0 %v9298_v61 }
 0x21f   :  { %v9623_v45 = vpop.f32.mrf.mxu1 }
 0x221   :  { %7292 = vmatmul.mubr.f32.gmra.mxu0 %v9295_v48  ;;  %v7068_v14 = vpop.f32.mrf.mxu1  ;;  %v23_v48 = vld [vmem:[%s11213_s1 + $0x60] sm:$0xff] }
 0x222   :  { %7294 = vmatprep.mubr.f32.mxu0 %v9322_v40  ;;  %v9642_v54 = vand.u32 4294901760, %v23_v48 }
 0x223   :  { %v9627_v19 = vpop.f32.mrf.mxu1 }
 0x224   :  { %11756 = vst [vmem:[#allocation54_spill] sm:$0xff] %v9642_v54  ;;  %7371 = vmatprep.subr.mxu0 %v9642_v54 }
 0x225   :  { %7295 = vmatmul.mubr.f32.gmra.mxu0 %v9317_v39 }
 0x226   :  { %v7071_v61 = vpop.f32.mrf.mxu1  ;;  %7297 = vmatprep.mubr.f32.mxu0 %v9349_v58  ;;  %v7001_v37 = vpop.f32.mrf.mxu0  ;;  %v9651_v58 = vsub.f32 %v23_v48, %v9642_v54  ;;  %7372 = vmatpush3.msra.mxu0 %v9642_v54 }
 0x227   :  { %v2190_v40 = vadd.f32 %v7001_v37, %v9632_v63 }
 0x228   :  { %v9640_v29 = vpop.f32.mrf.mxu1  ;;  %v9644_v8 = vpop.f32.mrf.mxu0  ;;  %11757 = vst [vmem:[#allocation57_spill] sm:$0xff] %v9651_v58  ;;  %v9658_v27 = vand.u32 4294901760, %v9651_v58 }
 0x229   :  { %7298 = vmatmul.mubr.f32.gmra.mxu0 %v9345_v10  ;;  %v9647_v39 = vadd.f32 %v7065_v22, %v2190_v40 }
 0x22a   :  { %v7074_v3 = vpop.f32.mrf.mxu1  ;;  %7300 = vmatprep.mubr.f32.mxu0 %v9365_v16  ;;  %11758 = vst [vmem:[#allocation56_spill] sm:$0xff] %v9658_v27  ;;  %v4534_v35 = vsub.f32 %v9651_v58, %v9658_v27 }
 0x22b   :  { %v7004_v23 = vpop.f32.mrf.mxu0 }
 0x22c   :  { %v9655_v33 = vpop.f32.mrf.mxu1  ;;  %v2210_v10 = vadd.f32 %v7004_v23, %v9632_v63  ;;  %v4535_v55 = vand.u32 4294901760, %v4534_v35 }
 0x22d   :  { %7301 = vmatmul.mubr.f32.gmra.mxu0 %v9374_v36  ;;  %v9662_v7 = vpop.f32.mrf.mxu0  ;;  %v22_v36 = vld [vmem:[%s11213_s1 + $0x58] sm:$0xff] }
 0x22e   :  { %v7077_v12 = vpop.f32.mrf.mxu1  ;;  %v9666_v13 = vadd.f32 %v7068_v14, %v2210_v10  ;;  %7427 = vmatprep.subr.mxu1 %v4535_v55  ;;  %v9678_v17 = vand.u32 4294901760, %v22_v36 }
 0x22f   :  { %7428 = vmatpush3.msra.mxu1 %v4535_v55 }
 0x230   :  { %v9668_v16 = vpop.f32.mrf.mxu1  ;;  %11759 = vst [vmem:[#allocation31_spill] sm:$0xff] %v9678_v17  ;;  %7373 = vmatprep.subr.mxu0 %v9678_v17  ;;  %v9684_v49 = vsub.f32 %v22_v36, %v9678_v17 }
 0x231   :  { %7374 = vmatpush3.msra.mxu0 %v9678_v17 }
 0x232   :  { %v7007_v43 = vpop.f32.mrf.mxu0  ;;  %v7080_v11 = vpop.f32.mrf.mxu1  ;;  %11760 = vst [vmem:[#allocation59_spill] sm:$0xff] %v9684_v49  ;;  %v9690_v34 = vand.u32 4294901760, %v9684_v49  ;;  %7479 = vmatprep.subr.mxu0 %v9578_v0 }
 0x233   :  { %v2230_v62 = vadd.f32 %v7007_v43, %v9632_v63 }
 0x234   :  { %v9674_v4 = vpop.f32.mrf.mxu0  ;;  %v9676_v47 = vpop.f32.mrf.mxu1  ;;  %11761 = vst [vmem:[#allocation58_spill] sm:$0xff] %v9690_v34  ;;  %v4541_v1 = vsub.f32 %v9684_v49, %v9690_v34 }
 0x235   :  { %v9680_v44 = vadd.f32 %v7071_v61, %v2230_v62 }
 0x236   :  { %v7083_v32 = vpop.f32.mrf.mxu1  ;;  %v4542_v50 = vand.u32 4294901760, %v4541_v1 }
 0x238   :  { %v7010_v31 = vpop.f32.mrf.mxu0  ;;  %v9687_v5 = vpop.f32.mrf.mxu1  ;;  %7429 = vmatprep.subr.mxu1 %v4542_v50 }
 0x239   :  { %v2250_v51 = vadd.f32 %v7010_v31, %v9632_v63  ;;  %7430 = vmatpush3.msra.mxu1 %v4542_v50 }
 0x23a   :  { %v9694_v60 = vpop.f32.mrf.mxu0  ;;  %v7086_v25 = vpop.f32.mrf.mxu1  ;;  %7535 = vmatprep.subr.mxu1 %v9573_v53 }
 0x23b   :  { %v9698_v41 = vadd.f32 %v7074_v3, %v2250_v51 }
 0x23c   :  { %v9700_v30 = vpop.f32.mrf.mxu1 }
 0x23d   :  { %v7013_v15 = vpop.f32.mrf.mxu0 }
 0x23e   :  { %v7089_v20 = vpop.f32.mrf.mxu1  ;;  %v2270_v24 = vadd.f32 %v7013_v15, %v9632_v63 }
 0x23f   :  { %v9703_v2 = vpop.f32.mrf.mxu0 }
 0x240   :  { %v9705_v21 = vpop.f32.mrf.mxu1  ;;  %v9708_v28 = vadd.f32 %v7077_v12, %v2270_v24 }
 0x241   :  { %v7016_v42 = vpop.f32.mrf.mxu0 }
 0x242   :  { %11762 = vst [vmem:[#allocation61_spill] sm:$0xff] %v9708_v28  ;;  %v7092_v26 = vpop.f32.mrf.mxu1  ;;  %v2290_v56 = vadd.f32 %v7016_v42, %v9632_v63 }
 0x243   :  { %v9711_v18 = vpop.f32.mrf.mxu0 }
 0x244   :  { %v9713_v6 = vpop.f32.mrf.mxu1  ;;  %v9715_v22 = vadd.f32 %v7080_v11, %v2290_v56 }
 0x246   :  { %11763 = vst [vmem:[#allocation60_spill] sm:$0xff] %v9715_v22  ;;  %v7019_v9 = vpop.f32.mrf.mxu0 }
 0x247   :  { %v2310_v52 = vadd.f32 %v7019_v9, %v9632_v63  ;;  %v7095_v14 = vpop.f32.mrf.mxu1 }
 0x248   :  { %v9718_v61 = vpop.f32.mrf.mxu0 }
 0x249   :  { %v9720_v37 = vpop.f32.mrf.mxu1  ;;  %v9722_v48 = vadd.f32 %v7083_v32, %v2310_v52 }
 0x24b   :  { %11764 = vst [vmem:[#allocation62_spill] sm:$0xff] %v9722_v48  ;;  %v7022_v40 = vpop.f32.mrf.mxu0  ;;  %v7098_v3 = vpop.f32.mrf.mxu1 }
 0x24c   :  { %v2330_v23 = vadd.f32 %v7022_v40, %v9632_v63 }
 0x24d   :  { %v9725_v10 = vpop.f32.mrf.mxu0  ;;  %v9727_v12 = vpop.f32.mrf.mxu1 }
 0x24e   :  { %v9729_v35 = vadd.f32 %v7086_v25, %v2330_v23 }
 0x24f   :  { %v7025_v55 = vpop.f32.mrf.mxu0 }
 0x250   :  { %11765 = vst [vmem:[#allocation64_spill] sm:$0xff] %v9729_v35  ;;  %v2350_v43 = vadd.f32 %v7025_v55, %v9632_v63  ;;  %v7101_v11 = vpop.f32.mrf.mxu1 }
 0x251   :  { %v9732_v62 = vpop.f32.mrf.mxu0 }
 0x252   :  { %v9734_v36 = vpop.f32.mrf.mxu1  ;;  %v9736_v32 = vadd.f32 %v7089_v20, %v2350_v43 }
 0x253   :  { %v7028_v31 = vpop.f32.mrf.mxu0 }
 0x254   :  { %11766 = vst [vmem:[#allocation2_spill] sm:$0xff] %v9736_v32  ;;  %v7104_v51 = vpop.f32.mrf.mxu1  ;;  %v2370_v1 = vadd.f32 %v7028_v31, %v9632_v63 }
 0x255   :  { %v9739_v50 = vpop.f32.mrf.mxu0 }
 0x256   :  { %v9741_v15 = vpop.f32.mrf.mxu1  ;;  %v9743_v25 = vadd.f32 %v7092_v26, %v2370_v1 }
 0x258   :  { %11767 = vst [vmem:[#allocation5_spill] sm:$0xff] %v9743_v25 }
 0x259   :  { %v7031_v24 = vpop.f32.mrf.mxu0  ;;  %v7107_v42 = vpop.f32.mrf.mxu1 }
 0x25a   :  { %v2390_v56 = vadd.f32 %v7031_v24, %v9632_v63 }
 0x25b   :  { %v9746_v9 = vpop.f32.mrf.mxu0  ;;  %v9748_v52 = vpop.f32.mrf.mxu1 }
 0x25c   :  { %v9750_v20 = vadd.f32 %v7095_v14, %v2390_v56 }
 0x25d   :  { %v7034_v40 = vpop.f32.mrf.mxu0  ;;  %v7110_v23 = vpop.f32.mrf.mxu1 }
 0x25e   :  { %v2410_v55 = vadd.f32 %v7034_v40, %v9632_v63 }
 0x25f   :  { %v9753_v43 = vpop.f32.mrf.mxu0  ;;  %v9755_v31 = vpop.f32.mrf.mxu1 }
 0x260   :  { %11768 = vst [vmem:[#allocation8_spill] sm:$0xff] %v9755_v31  ;;  %v9757_v26 = vadd.f32 %v7098_v3, %v2410_v55 }
 0x261   :  { %v7037_v1 = vpop.f32.mrf.mxu0  ;;  %v9759_v34 = vpop.f32.mrf.mxu1 }
 0x262   :  { %11769 = vst [vmem:[#allocation11_spill] sm:$0xff] %v9759_v34  ;;  %v2430_v24 = vadd.f32 %v7037_v1, %v9632_v63 }
 0x263   :  { %v9762_v27 = vpop.f32.mrf.mxu0  ;;  %v9764_v57 = vpop.f32.mrf.mxu1 }
 0x264   :  { %11770 = vst [vmem:[#allocation14_spill] sm:$0xff] %v9764_v57  ;;  %v9766_v14 = vadd.f32 %v7101_v11, %v2430_v24 }
 0x265   :  { %v7040_v56 = vpop.f32.mrf.mxu0  ;;  %v9768_v46 = vpop.f32.mrf.mxu1 }
 0x266   :  { %11771 = vst [vmem:[#allocation3_spill] sm:$0xff] %v9768_v46  ;;  %v2450_v40 = vadd.f32 %v7040_v56, %v9632_v63 }
 0x267   :  { %v9771_v49 = vpop.f32.mrf.mxu0  ;;  %v9773_v3 = vpop.f32.mrf.mxu1 }
 0x268   :  { %11772 = vst [vmem:[#allocation6_spill] sm:$0xff] %v9773_v3  ;;  %v9775_v55 = vadd.f32 %v7104_v51, %v2450_v40 }
 0x269   :  { %v7043_v58 = vpop.f32.mrf.mxu0  ;;  %v9777_v38 = vpop.f32.mrf.mxu1 }
 0x26a   :  { %11773 = vst [vmem:[#allocation17_spill] sm:$0xff] %v9777_v38  ;;  %v2470_v1 = vadd.f32 %v7043_v58, %v9632_v63 }
 0x26b   :  { %v9780_v0 = vpop.f32.mrf.mxu0  ;;  %v9782_v11 = vpop.f32.mrf.mxu1 }
 0x26c   :  { %11774 = vst [vmem:[#allocation9_spill] sm:$0xff] %v9782_v11  ;;  %v9784_v24 = vadd.f32 %v7107_v42, %v2470_v1 }
 0x26d   :  { %v7046_v17 = vpop.f32.mrf.mxu0  ;;  %v9786_v54 = vpop.f32.mrf.mxu1 }
 0x26e   :  { %11775 = vst [vmem:[#allocation12_spill] sm:$0xff] %v9786_v54  ;;  %v2490_v56 = vadd.f32 %v7046_v17, %v9632_v63 }
 0x26f   :  { %v9789_v59 = vpop.f32.mrf.mxu0  ;;  %v9791_v51 = vpop.f32.mrf.mxu1 }
 0x270   :  { %11776 = vst [vmem:[#allocation15_spill] sm:$0xff] %v9791_v51  ;;  %v9793_v40 = vadd.f32 %v7110_v23, %v2490_v56 }
 0x271   :  { %v9795_v53 = vpop.f32.mrf.mxu0  ;;  %v9797_v58 = vpop.f32.mrf.mxu1 }
 0x272   :  { %11777 = vst [vmem:[#allocation18_spill] sm:$0xff] %v9793_v40  ;;  %11778 = vst [vmem:[#allocation19_spill] sm:$0xff] %v9797_v58 }
 0x273   :  { %v9799_v25 = vpop.f32.mrf.mxu0  ;;  %v9801_v32 = vpop.f32.mrf.mxu1 }
 0x274   :  { %11779 = vst [vmem:[#allocation21_spill] sm:$0xff] %v9801_v32 }
 0x275   :  { %v9803_v42 = vpop.f32.mrf.mxu0  ;;  %v9805_v1 = vpop.f32.mrf.mxu1 }
 0x276   :  { %11780 = vst [vmem:[#allocation22_spill] sm:$0xff] %v9805_v1 }
 0x277   :  { %v9807_v54 = vpop.f32.mrf.mxu0  ;;  %v9809_v17 = vpop.f32.mrf.mxu1 }
 0x278   :  { %11781 = vst [vmem:[#allocation24_spill] sm:$0xff] %v9809_v17 }
 0x279   :  { %v9811_v35 = vpop.f32.mrf.mxu0  ;;  %v9813_v23 = vpop.f32.mrf.mxu1 }
 0x27a   :  { %11782 = vst [vmem:[#allocation63_spill] sm:$0xff] %v9813_v23 }
 0x27b   :  { %v9815_v56 = vpop.f32.mrf.mxu0  ;;  %v9817_v51 = vpop.f32.mrf.mxu1 }
 0x27c   :  { %11783 = vst [vmem:[#allocation4_spill] sm:$0xff] %v9817_v51 }
 0x27d   :  { %v9819_v58 = vpop.f32.mrf.mxu0  ;;  %v9821_v11 = vpop.f32.mrf.mxu1 }
 0x27e   :  { %11784 = vst [vmem:[#allocation7_spill] sm:$0xff] %v9821_v11 }
 0x27f   :  { %v9823_v32 = vpop.f32.mrf.mxu0  ;;  %v9825_v38 = vpop.f32.mrf.mxu1 }
 0x280   :  { %11785 = vst [vmem:[#allocation10_spill] sm:$0xff] %v9823_v32  ;;  %11786 = vst [vmem:[#allocation13_spill] sm:$0xff] %v9825_v38 }
 0x281   :  { %v9827_v1 = vpop.f32.mrf.mxu0  ;;  %v9829_v48 = vpop.f32.mrf.mxu1 }
 0x282   :  { %11787 = vst [vmem:[#allocation16_spill] sm:$0xff] %v9827_v1  ;;  %11788 = vst [vmem:[#allocation20_spill] sm:$0xff] %v9829_v48 }
 0x283   :  { %v9831_v17 = vpop.f32.mrf.mxu0  ;;  %v9833_v3 = vpop.f32.mrf.mxu1 }
 0x284   :  { %11789 = vst [vmem:[#allocation23_spill] sm:$0xff] %v9831_v17  ;;  %11790 = vst [vmem:[#allocation25_spill] sm:$0xff] %v9833_v3 }
 0x285   :  { %v9835_v23 = vpop.f32.mrf.mxu0  ;;  %v9837_v40 = vpop.f32.mrf.mxu1 }
 0x286   :  { %11791 = vst [vmem:[#allocation35_spill] sm:$0xff] %v9835_v23  ;;  %11792 = vst [vmem:[#allocation32_spill] sm:$0xff] %v9837_v40 }
 0x287   :  { %v9839_v51 = vpop.f32.mrf.mxu0  ;;  %v9841_v22 = vpop.f32.mrf.mxu1 }
 0x288   :  { %11793 = vst [vmem:[#allocation37_spill] sm:$0xff] %v9839_v51  ;;  %11794 = vst [vmem:[#allocation34_spill] sm:$0xff] %v9841_v22 }
 0x289   :  { %v9843_v11 = vpop.f32.mrf.mxu0  ;;  %v7223_v46 = vpop.f32.mrf.mxu1 }
 0x28a   :  { %11795 = vst [vmem:[#allocation33_spill] sm:$0xff] %v9843_v11 }
 0x28b   :  { %v9845_v38 = vpop.f32.mrf.mxu0  ;;  %v9847_v57 = vpop.f32.mrf.mxu1 }
 0x28c   :  { %11796 = vst [vmem:[#allocation26_spill] sm:$0xff] %v9845_v38  ;;  %11797 = vst [vmem:[#allocation36_spill] sm:$0xff] %v9847_v57 }
 0x28d   :  { %v9849_v48 = vpop.f32.mrf.mxu0  ;;  %v7226_v17 = vpop.f32.mrf.mxu1 }
 0x28e   :  { %11798 = vst [vmem:[#allocation38_spill] sm:$0xff] %v9849_v48 }
 0x28f   :  { %v9851_v1 = vpop.f32.mrf.mxu0  ;;  %v9853_v3 = vpop.f32.mrf.mxu1 }
 0x290   :  { %11799 = vst [vmem:[#allocation39_spill] sm:$0xff] %v9851_v1  ;;  %11800 = vst [vmem:[#allocation40_spill] sm:$0xff] %v9853_v3 }
 0x291   :  { %v9855_v23 = vpop.f32.mrf.mxu0  ;;  %v7229_v40 = vpop.f32.mrf.mxu1 }
 0x292   :  { %11801 = vst [vmem:[#allocation41_spill] sm:$0xff] %v9855_v23 }
 0x293   :  { %v9857_v51 = vpop.f32.mrf.mxu0  ;;  %v9859_v22 = vpop.f32.mrf.mxu1 }
 0x294   :  { %11802 = vst [vmem:[#allocation43_spill] sm:$0xff] %v9857_v51  ;;  %11803 = vst [vmem:[#allocation27_spill] sm:$0xff] %v9859_v22 }
 0x295   :  { %v9861_v11 = vpop.f32.mrf.mxu0  ;;  %v7232_v28 = vpop.f32.mrf.mxu1 }
 0x296   :  { %11804 = vst [vmem:[#allocation45_spill] sm:$0xff] %v9861_v11 }
 0x297   :  { %v9863_v38 = vpop.f32.mrf.mxu0  ;;  %v9865_v57 = vpop.f32.mrf.mxu1 }
 0x298   :  { %11805 = vst [vmem:[#allocation42_spill] sm:$0xff] %v9863_v38  ;;  %11806 = vst [vmem:[#allocation47_spill] sm:$0xff] %v9865_v57  ;;  %v2180_v38 = vadd.f32 %v9632_v63, %v9644_v8 }
 0x299   :  { %v7159_v48 = vpop.f32.mrf.mxu0  ;;  %v9867_v32 = vpop.f32.mrf.mxu1 }
 0x29a   :  { %v3022_v1 = vadd.f32 %v7159_v48, %v9750_v20  ;;  %v2200_v48 = vadd.f32 %v9632_v63, %v9662_v7  ;;  %v2220_v20 = vadd.f32 %v9632_v63, %v9674_v4  ;;  %v2300_v7 = vadd.f32 %v9632_v63, %v9718_v61 }
 0x29b   :  { %v9870_v3 = vpop.f32.mrf.mxu0  ;;  %v9872_v23 = vpop.f32.mrf.mxu1  ;;  %v2320_v4 = vadd.f32 %v9632_v63, %v9725_v10  ;;  %v2360_v61 = vadd.f32 %v9632_v63, %v9739_v50  ;;  %v2380_v10 = vadd.f32 %v9632_v63, %v9746_v9  ;;  %v2440_v9 = vadd.f32 %v9632_v63, %v9771_v49 }
 0x29c   :  { %11807 = vst [vmem:[#allocation28_spill] sm:$0xff] %v9872_v23  ;;  %v9874_v34 = vadd.f32 %v7223_v46, %v3022_v1  ;;  %v2240_v1 = vadd.f32 %v9632_v63, %v9694_v60 }
 0x29d   :  { %v7162_v51 = vpop.f32.mrf.mxu0  ;;  %v9876_v22 = vpop.f32.mrf.mxu1 }
 0x29e   :  { %11808 = vst [vmem:[#allocation46_spill] sm:$0xff] %v9874_v34  ;;  %v3036_v11 = vadd.f32 %v7162_v51, %v9757_v26  ;;  %v2260_v26 = vadd.f32 %v9632_v63, %v9703_v2  ;;  %v2280_v34 = vadd.f32 %v9632_v63, %v9711_v18  ;;  %v2340_v2 = vadd.f32 %v9632_v63, %v9732_v62 }
 0x29f   :  { %v9881_v57 = vpop.f32.mrf.mxu0  ;;  %v9883_v31 = vpop.f32.mrf.mxu1  ;;  %v2625_v18 = vadd.f32 %v9640_v29, %v2220_v20  ;;  %v2420_v29 = vadd.f32 %v9632_v63, %v9762_v27  ;;  %v2480_v27 = vadd.f32 %v9632_v63, %v9789_v59 }
 0x2a0   :  { %11809 = vst [vmem:[#allocation44_spill] sm:$0xff] %v9883_v31  ;;  %v9889_v46 = vadd.f32 %v7226_v17, %v3036_v11  ;;  %v2601_v11 = vadd.f32 %v9623_v45, %v2180_v38  ;;  %v2637_v38 = vadd.f32 %v9655_v33, %v2240_v1  ;;  %v2649_v45 = vadd.f32 %v9668_v16, %v2260_v26  ;;  %v11816_v26 = vld [vmem:[#allocation14_spill] sm:$0xff] }
 0x2a1   :  { %v7165_v51 = vpop.f32.mrf.mxu0  ;;  %v9895_v8 = vpop.f32.mrf.mxu1  ;;  %v2661_v62 = vadd.f32 %v9676_v47, %v2280_v34  ;;  %v2460_v33 = vadd.f32 %v9632_v63, %v9780_v0  ;;  %v2673_v16 = vadd.f32 %v9687_v5, %v2300_v7  ;;  %v2882_v47 = vadd.f32 %v9795_v53, %v9647_v39 }
 0x2a2   :  { %11810 = vst [vmem:[#allocation29_spill] sm:$0xff] %v9889_v46  ;;  %v3050_v31 = vadd.f32 %v7165_v51, %v9766_v14  ;;  %v2613_v46 = vadd.f32 %v9627_v19, %v2200_v48  ;;  %v2400_v19 = vadd.f32 %v9632_v63, %v9753_v43  ;;  %v2697_v34 = vadd.f32 %v9705_v21, %v2340_v2 }
 0x2a3   :  { %v9905_v60 = vpop.f32.mrf.mxu0  ;;  %v9907_v17 = vpop.f32.mrf.mxu1  ;;  %v2875_v0 = vadd.f32 %v9799_v25, %v2601_v11  ;;  %v2896_v5 = vadd.f32 %v9803_v42, %v9666_v13  ;;  %v9956_v63 = vadd.f32 %v9734_v36, %v2420_v29  ;;  %v2910_v21 = vadd.f32 %v9811_v35, %v9680_v44  ;;  %v11811_v36 = vld [vmem:[#allocation8_spill] sm:$0xff]  ;;  %v11813_v35 = vld [vmem:[#allocation10_spill] sm:$0xff]  ;;  %v11823_v29 = vld [vmem:[#allocation37_spill] sm:$0xff] }
 0x2a4   :  { %v9913_v14 = vadd.f32 %v7229_v40, %v3050_v31  ;;  %v2685_v31 = vadd.f32 %v9700_v30, %v2320_v4  ;;  %v2709_v30 = vadd.f32 %v9713_v6, %v2360_v61  ;;  %v2889_v59 = vadd.f32 %v9807_v54, %v2613_v46  ;;  %v11817_v4 = vld [vmem:[#allocation3_spill] sm:$0xff] }
 0x2a5   :  { %v7168_v51 = vpop.f32.mrf.mxu0  ;;  %v9921_v23 = vpop.f32.mrf.mxu1  ;;  %v2733_v53 = vadd.f32 %v9727_v12, %v2400_v19  ;;  %v2903_v13 = vadd.f32 %v9815_v56, %v2625_v18  ;;  %v9964_v6 = vadd.f32 %v9748_v52, %v2460_v33  ;;  %v2924_v12 = vadd.f32 %v9819_v58, %v9698_v41  ;;  %v11814_v56 = vld [vmem:[#allocation61_spill] sm:$0xff]  ;;  %v11815_v52 = vld [vmem:[#allocation16_spill] sm:$0xff]  ;;  %v11818_v58 = vld [vmem:[#allocation23_spill] sm:$0xff] }
 0x2a6   :  { %v3064_v50 = vadd.f32 %v7168_v51, %v9775_v55  ;;  %v2721_v55 = vadd.f32 %v9720_v37, %v2380_v10  ;;  %v9973_v25 = vadd.f32 %v11811_v36, %v2480_v27  ;;  %v2938_v46 = vadd.f32 %v11815_v52, %v11814_v56  ;;  %v11819_v18 = vld [vmem:[#allocation60_spill] sm:$0xff]  ;;  %v11820_v61 = vld [vmem:[#allocation35_spill] sm:$0xff]  ;;  %v11822_v19 = vld [vmem:[#allocation6_spill] sm:$0xff] }
 0x2a7   :  { %v9935_v40 = vpop.f32.mrf.mxu0  ;;  %v9937_v43 = vpop.f32.mrf.mxu1  ;;  %v3173_v7 = vadd.f32 %v11816_v26, %v2875_v0  ;;  %v3197_v11 = vadd.f32 %v11817_v4, %v2896_v5  ;;  %v2931_v2 = vadd.f32 %v11818_v58, %v2649_v45  ;;  %v2952_v10 = vadd.f32 %v11820_v61, %v11819_v18  ;;  %v11825_v33 = vld [vmem:[#allocation33_spill] sm:$0xff]  ;;  %v11828_v36 = vld [vmem:[#allocation26_spill] sm:$0xff]  ;;  %v11832_v26 = vld [vmem:[#allocation39_spill] sm:$0xff] }
 0x2a8   :  { %v9944_v49 = vadd.f32 %v7232_v28, %v3064_v50  ;;  %v2757_v28 = vadd.f32 %v9741_v15, %v2440_v9  ;;  %v2917_v15 = vadd.f32 %v11813_v35, %v2637_v38  ;;  %v3189_v38 = vadd.f32 %v11822_v19, %v2889_v59  ;;  %v11824_v9 = vld [vmem:[#allocation62_spill] sm:$0xff]  ;;  %v11826_v5 = vld [vmem:[#allocation17_spill] sm:$0xff]  ;;  %v11829_v35 = vld [vmem:[#allocation64_spill] sm:$0xff] }
 0x2a9   :  { %v7171_v48 = vpop.f32.mrf.mxu0  ;;  %v9951_v20 = vpop.f32.mrf.mxu1  ;;  %v2945_v50 = vadd.f32 %v11823_v29, %v2661_v62  ;;  %v2966_v27 = vadd.f32 %v11825_v33, %v11824_v9  ;;  %v11830_v56 = vld [vmem:[#allocation38_spill] sm:$0xff]  ;;  %v11831_v59 = vld [vmem:[#allocation12_spill] sm:$0xff]  ;;  %v2973_v4 = vadd.f32 %v11832_v26, %v2685_v31  ;;  %v11834_v18 = vld [vmem:[#allocation41_spill] sm:$0xff] }
 0x2aa   :  { %v3078_v39 = vadd.f32 %v7171_v48, %v9784_v24  ;;  %v11812_v24 = vld [vmem:[#allocation11_spill] sm:$0xff]  ;;  %v3213_v48 = vadd.f32 %v11826_v5, %v2910_v21  ;;  %v2980_v52 = vadd.f32 %v11830_v56, %v11829_v35  ;;  %v11833_v58 = vld [vmem:[#allocation2_spill] sm:$0xff]  ;;  %v11838_v5 = vld [vmem:[#allocation21_spill] sm:$0xff] }
 0x2ab   :  { %v9966_v37 = vpop.f32.mrf.mxu0  ;;  %v9968_v54 = vpop.f32.mrf.mxu1  ;;  %v3181_v42 = vadd.f32 %v11812_v24, %v2882_v47  ;;  %v2959_v24 = vadd.f32 %v11828_v36, %v2673_v16  ;;  %v2994_v61 = vadd.f32 %v11834_v18, %v11833_v58  ;;  %v11836_v16 = vld [vmem:[#allocation19_spill] sm:$0xff]  ;;  %v11841_v36 = vld [vmem:[#allocation45_spill] sm:$0xff]  ;;  %v11842_v56 = vld [vmem:[#allocation42_spill] sm:$0xff] }
 0x2ac   :  { %v9977_v44 = vadd.f32 %v9867_v32, %v3078_v39  ;;  %v11821_v32 = vld [vmem:[#allocation18_spill] sm:$0xff]  ;;  %v11827_v39 = vld [vmem:[#allocation9_spill] sm:$0xff]  ;;  %v10020_v29 = vadd.f32 %v11836_v16, %v2938_v46  ;;  %v11837_v9 = vld [vmem:[#allocation43_spill] sm:$0xff] }
 0x2ad   :  { %v7174_v1 = vpop.f32.mrf.mxu0  ;;  %v9984_v41 = vpop.f32.mrf.mxu1  ;;  %v10000_v45 = vadd.f32 %v11827_v39, %v2903_v13  ;;  %v11835_v13 = vld [vmem:[#allocation15_spill] sm:$0xff]  ;;  %v11840_v39 = vld [vmem:[#allocation5_spill] sm:$0xff]  ;;  %v11843_v58 = vld [vmem:[#allocation24_spill] sm:$0xff] }
 0x2ae   :  { %v3092_v51 = vadd.f32 %v7174_v1, %v11821_v32  ;;  %v10006_v1 = vadd.f32 %v11831_v59, %v2924_v12  ;;  %v10017_v19 = vadd.f32 %v11835_v13, %v2917_v15  ;;  %v2987_v12 = vadd.f32 %v11837_v9, %v2697_v34  ;;  %v11844_v18 = vld [vmem:[#allocation63_spill] sm:$0xff] }
 0x2af   :  { %v9994_v47 = vpop.f32.mrf.mxu0  ;;  %v9996_v0 = vpop.f32.mrf.mxu1  ;;  %v3008_v35 = vadd.f32 %v11841_v36, %v11840_v39  ;;  %v3001_v59 = vadd.f32 %v11842_v56, %v2709_v30  ;;  %v10035_v46 = vadd.f32 %v11843_v58, %v2945_v50  ;;  %v10038_v34 = vadd.f32 %v11844_v18, %v2966_v27  ;;  %v11846_v13 = vld [vmem:[#allocation7_spill] sm:$0xff]  ;;  %v11847_v50 = vld [vmem:[#allocation13_spill] sm:$0xff]  ;;  %v11848_v27 = vld [vmem:[#allocation20_spill] sm:$0xff] }
 0x2b0   :  { %v10009_v62 = vadd.f32 %v9876_v22, %v3092_v51  ;;  %v10024_v22 = vadd.f32 %v11838_v5, %v2931_v2  ;;  %v11839_v51 = vld [vmem:[#allocation22_spill] sm:$0xff]  ;;  %v10045_v16 = vadd.f32 %v11846_v13, %v2980_v52  ;;  %v3015_v30 = vadd.f32 %v9870_v3, %v2721_v55  ;;  %v11852_v18 = vld [vmem:[#allocation36_spill] sm:$0xff] }
 0x2b1   :  { %v7257_v21 = vpop.f32.mrf.mxu0  ;;  %v10014_v32 = vpop.f32.mrf.mxu1  ;;  %v10027_v31 = vadd.f32 %v11839_v51, %v2952_v10  ;;  %v3029_v9 = vadd.f32 %v9881_v57, %v2733_v53  ;;  %v10052_v39 = vadd.f32 %v11847_v50, %v2973_v4  ;;  %v10055_v36 = vadd.f32 %v11848_v27, %v2994_v61  ;;  %v11850_v4 = vld [vmem:[#allocation32_spill] sm:$0xff]  ;;  %v11851_v61 = vld [vmem:[#allocation34_spill] sm:$0xff]  ;;  %v11854_v50 = vld [vmem:[#allocation27_spill] sm:$0xff] }
 0x2b2   :  { %v3522_v33 = vadd.f32 %v7257_v21, %v3181_v42  ;;  %v11845_v21 = vld [vmem:[#allocation4_spill] sm:$0xff]  ;;  %v3043_v3 = vadd.f32 %v9905_v60, %v9956_v63  ;;  %v3057_v57 = vadd.f32 %v9935_v40, %v2757_v28  ;;  %v10067_v56 = vadd.f32 %v11850_v4, %v3008_v35  ;;  %v11855_v27 = vld [vmem:[#allocation47_spill] sm:$0xff] }
 0x2b3   :  { %v3515_v26 = vpop.f32.mrf.mxu0  ;;  %v10032_v15 = vpop.f32.mrf.mxu1  ;;  %v10042_v10 = vadd.f32 %v11845_v21, %v2959_v24  ;;  %v3071_v60 = vadd.f32 %v9966_v37, %v9964_v6  ;;  %v10081_v35 = vadd.f32 %v11852_v18, %v3015_v30 }
 0x2b4   :  { %v3787_v42 = vadd.f32 %v9895_v8, %v3522_v33  ;;  %v3516_v2 = vadd.f32 %v3515_v26, %v3173_v7  ;;  %v11849_v33 = vld [vmem:[#allocation25_spill] sm:$0xff]  ;;  %v10070_v26 = vadd.f32 %v11851_v61, %v3001_v59  ;;  %v10096_v30 = vadd.f32 %v11854_v50, %v3043_v3 }
 0x2b5   :  { %v7260_v5 = vpop.f32.mrf.mxu0  ;;  %v10049_v51 = vpop.f32.mrf.mxu1  ;;  %v10059_v52 = vadd.f32 %v11849_v33, %v2987_v12 }
 0x2b6   :  { %v3971_v8 = vmax.f32 %v3787_v42, 0.0  ;;  %v3781_v7 = vadd.f32 %v9907_v17, %v3516_v2  ;;  %v3534_v24 = vadd.f32 %v7260_v5, %v3197_v11  ;;  %v11853_v42 = vld [vmem:[#allocation40_spill] sm:$0xff] }
 0x2b7   :  { %v3527_v55 = vpop.f32.mrf.mxu0  ;;  %v10064_v53 = vpop.f32.mrf.mxu1  ;;  %v10084_v59 = vadd.f32 %v11853_v42, %v3029_v9  ;;  %v10099_v9 = vadd.f32 %v11855_v27, %v3057_v57  ;;  %v11856_v57 = vld [vmem:[#allocation28_spill] sm:$0xff] }
 0x2b8   :  { %v4011_v17 = vsel %vm4006_vm2, %v3971_v8, 0  ;;  %v3970_v11 = vmax.f32 %v3781_v7, 0.0  ;;  %v3799_v12 = vadd.f32 %v9921_v23, %v3534_v24  ;;  %v3528_v58 = vadd.f32 %v3527_v55, %v3189_v38 }
 0x2b9   :  { %v10076_v63 = vand.u32 4294901760, %v4011_v17  ;;  %v7263_v40 = vpop.f32.mrf.mxu0  ;;  %v10078_v28 = vpop.f32.mrf.mxu1  ;;  %v10114_v61 = vadd.f32 %v11856_v57, %v3071_v60 }
 0x2ba   :  { %v4008_v2 = vsel %vm4006_vm2, %v3970_v11, 0  ;;  %v3973_v21 = vmax.f32 %v3799_v12, 0.0  ;;  %v3793_v23 = vadd.f32 %v9937_v43, %v3528_v58  ;;  %v3546_v38 = vadd.f32 %v7263_v40, %v3213_v48 }
 0x2bb   :  { %v10089_v13 = vsub.f32 %v4011_v17, %v10076_v63  ;;  %v10091_v6 = vand.u32 4294901760, %v4008_v2  ;;  %v3539_v37 = vpop.f32.mrf.mxu0  ;;  %v10093_v5 = vpop.f32.mrf.mxu1  ;;  %v10122_v12 = vadd.f32 %v9994_v47, %v9973_v25  ;;  %v11858_v47 = vld [vmem:[#allocation52_spill] sm:$0xff] }
 0x2bc   :  { %v4017_v8 = vsel %vm4006_vm2, %v3973_v21, 0  ;;  %v3972_v7 = vmax.f32 %v3793_v23, 0.0  ;;  %v3811_v43 = vadd.f32 %v9951_v20, %v3546_v38  ;;  %v3540_v48 = vadd.f32 %v3539_v37, %v10000_v45 }
 0x2bd   :  { %v11413_v24 = vand.u32 4294901760, %v10089_v13  ;;  %v10106_v33 = vsub.f32 %v4008_v2, %v10091_v6  ;;  %v10108_v55 = vand.u32 4294901760, %v4017_v8  ;;  %v7266_v4 = vpop.f32.mrf.mxu0  ;;  %7431 = vmatprep.mubr.f32.mxu1 %v10091_v6  ;;  %v10111_v3 = vpop.f32.mrf.mxu1 }
 0x2be   :  { %v4014_v17 = vsel %vm4006_vm2, %v3972_v7, 0  ;;  %v3975_v20 = vmax.f32 %v3811_v43, 0.0  ;;  %v3805_v45 = vadd.f32 %v9968_v54, %v3540_v48  ;;  %v3558_v11 = vadd.f32 %v7266_v4, %v10006_v1  ;;  %7432 = vmatmul.mubr.f32.vlgmr.msra.gmra.mxu1 %v10076_v63  ;;  %v11857_v54 = vld [vmem:[#allocation48_spill] sm:$0xff]  ;;  %v11860_v48 = vld [vmem:[#allocation54_spill] sm:$0xff] }
 0x2bf   :  { %v4185_v58 = vsub.f32 %v10089_v13, %v11413_v24  ;;  %v10127_v40 = vand.u32 4294901760, %v4014_v17  ;;  %v3551_v60 = vpop.f32.mrf.mxu0  ;;  %v11415_v18 = vand.u32 4294901760, %v10106_v33  ;;  %v10130_v42 = vpop.f32.mrf.mxu1  ;;  %7536 = vmatpush3.msra.mxu1 %v11857_v54  ;;  %v10138_v23 = vsub.f32 %v4017_v8, %v10108_v55 }
 0x2c0   :  { %v4023_v1 = vsel %vm4006_vm2, %v3975_v20, 0  ;;  %v3974_v2 = vmax.f32 %v3805_v45, 0.0  ;;  %v3823_v21 = vadd.f32 %v9984_v41, %v3558_v11  ;;  %v3552_v25 = vadd.f32 %v3551_v60, %v10017_v19  ;;  %7537 = vmatprep.subr.mxu1 %v11858_v47 }
 0x2c1   :  { %v10141_v38 = vsub.f32 %v4014_v17, %v10127_v40  ;;  %v10143_v37 = vand.u32 4294901760, %v4023_v1  ;;  %v7269_v50 = vpop.f32.mrf.mxu0  ;;  %7434 = vmatprep.mubr.f32.mxu1 %v10127_v40  ;;  %v4175_v27 = vsub.f32 %v10106_v33, %v11415_v18  ;;  %v10149_v41 = vpop.f32.mrf.mxu1  ;;  %7538 = vmatpush3.msra.mxu1 %v11858_v47  ;;  %v4186_v4 = vand.u32 4294901760, %v4185_v58 }
 0x2c2   :  { %v4020_v19 = vsel %vm4006_vm2, %v3974_v2, 0  ;;  %v3977_v8 = vmax.f32 %v3823_v21, 0.0  ;;  %v3817_v7 = vadd.f32 %v9996_v0, %v3552_v25  ;;  %v3570_v43 = vadd.f32 %v7269_v50, %v10020_v29  ;;  %7435 = vmatmul.mubr.f32.gmra.mxu1 %v10108_v55  ;;  %7539 = vmatprep.subr.mxu1 %v11860_v48  ;;  %v11861_v21 = vld [vmem:[#allocation31_spill] sm:$0xff] }
 0x2c3   :  { %11859 = vst [vmem:[#allocation49_spill] sm:$0xff] %v10143_v37  ;;  %v10157_v57 = vand.u32 4294901760, %v4020_v19  ;;  %v3563_v17 = vpop.f32.mrf.mxu0  ;;  %v4176_v20 = vand.u32 4294901760, %v4175_v27  ;;  %v11412_v45 = vand.u32 4294901760, %v10141_v38  ;;  %v10160_v11 = vpop.f32.mrf.mxu1  ;;  %7540 = vmatpush3.msra.mxu1 %v11860_v48  ;;  %v10168_v58 = vsub.f32 %v4023_v1, %v10143_v37 }
 0x2c4   :  { %v4029_v60 = vsel %vm4006_vm2, %v3977_v8, 0  ;;  %v3976_v0 = vmax.f32 %v3817_v7, 0.0  ;;  %v3835_v29 = vadd.f32 %v10014_v32, %v3570_v43  ;;  %v3564_v2 = vadd.f32 %v3563_v17, %v10024_v22  ;;  %7541 = vmatprep.subr.mxu1 %v11861_v21 }
 0x2c5   :  { %v10171_v25 = vsub.f32 %v4020_v19, %v10157_v57  ;;  %v7272_v50 = vpop.f32.mrf.mxu0  ;;  %7375 = vmatprep.mubr.f32.mxu0 %v4176_v20  ;;  %7437 = vmatprep.mubr.f32.mxu1 %v10157_v57  ;;  %v4195_v27 = vsub.f32 %v10141_v38, %v11412_v45  ;;  %v11414_v32 = vand.u32 4294901760, %v10138_v23  ;;  %v10178_v8 = vpop.f32.mrf.mxu1  ;;  %v10184_v43 = vand.u32 4294901760, %v4029_v60  ;;  %v11864_v45 = vld [vmem:[#allocation50_spill] sm:$0xff] }
 0x2c6   :  { %v4026_v22 = vsel %vm4006_vm2, %v3976_v0, 0  ;;  %v3979_v7 = vmax.f32 %v3835_v29, 0.0  ;;  %v3829_v1 = vadd.f32 %v10032_v15, %v3564_v2  ;;  %v3582_v19 = vadd.f32 %v7272_v50, %v10027_v31  ;;  %7376 = vmatmul.mubr.f32.vlgmr.msra.gmra.mxu0 %v4186_v4  ;;  %7438 = vmatmul.mubr.f32.gmra.mxu1 %v10143_v37  ;;  %v11865_v50 = vld [vmem:[#allocation30_spill] sm:$0xff] }
 0x2c7   :  { %11862 = vst [vmem:[#allocation51_spill] sm:$0xff] %v10184_v43  ;;  %v10186_v17 = vand.u32 4294901760, %v4026_v22  ;;  %v3575_v20 = vpop.f32.mrf.mxu0  ;;  %7480 = vmatpush3.msra.mxu0 %v11864_v45  ;;  %v4196_v24 = vand.u32 4294901760, %v4195_v27  ;;  %v4205_v0 = vsub.f32 %v10138_v23, %v11414_v32  ;;  %v10192_v29 = vpop.f32.mrf.mxu1  ;;  %7542 = vmatpush3.msra.mxu1 %v11861_v21 }
 0x2c8   :  { %v4035_v31 = vsel %vm4006_vm2, %v3979_v7, 0  ;;  %v3978_v15 = vmax.f32 %v3829_v1, 0.0  ;;  %v3847_v4 = vadd.f32 %v10049_v51, %v3582_v19  ;;  %v3576_v2 = vadd.f32 %v3575_v20, %v10035_v46  ;;  %7481 = vmatprep.subr.mxu0 %v11865_v50  ;;  %7647 = vmatprep.subr.mxu1 %v11857_v54  ;;  %v11866_v51 = vld [vmem:[#allocation44_spill] sm:$0xff] }
 0x2c9   :  { %11863 = vst [vmem:[#allocation8_spill] sm:$0xff] %v10186_v17  ;;  %v10201_v45 = vsub.f32 %v4026_v22, %v10186_v17  ;;  %v7275_v27 = vpop.f32.mrf.mxu0  ;;  %7378 = vmatprep.mubr.f32.mxu0 %v4196_v24  ;;  %7440 = vmatprep.mubr.f32.mxu1 %v10186_v17  ;;  %v4206_v32 = vand.u32 4294901760, %v4205_v0  ;;  %v10205_v7 = vpop.f32.mrf.mxu1  ;;  %v10209_v1 = vadd.f32 %v11866_v51, %v10122_v12  ;;  %v10216_v24 = vand.u32 4294901760, %v4035_v31 }
 0x2ca   :  { %v4032_v46 = vsel %vm4006_vm2, %v3978_v15, 0  ;;  %v3981_v19 = vmax.f32 %v3847_v4, 0.0  ;;  %v3841_v20 = vadd.f32 %v10064_v53, %v3576_v2  ;;  %v3594_v22 = vadd.f32 %v7275_v27, %v10038_v34  ;;  %7441 = vmatmul.mubr.f32.gmra.mxu1 %v10184_v43  ;;  %7482 = vmatpush3.msra.mxu0 %v11865_v50  ;;  %v11870_v4 = vld [vmem:[#allocation57_spill] sm:$0xff] }
 0x2cb   :  { %11867 = vst [vmem:[#allocation11_spill] sm:$0xff] %v10216_v24  ;;  %v10218_v0 = vand.u32 4294901760, %v4032_v46  ;;  %7379 = vmatmul.mubr.f32.gmra.mxu0 %v4206_v32  ;;  %v3587_v18 = vpop.f32.mrf.mxu0  ;;  %v11869_v12 = vand.u32 4294901760, %v10171_v25  ;;  %7483 = vmatprep.subr.mxu0 %v11870_v4  ;;  %v10228_v27 = vpop.f32.mrf.mxu1  ;;  %v10232_v32 = vsub.f32 %v4029_v60, %v10184_v43  ;;  %v11422_v37 = vand.u32 4294901760, %v10201_v45 }
 0x2cc   :  { %v4041_v34 = vsel %vm4006_vm2, %v3981_v19, 0  ;;  %v3980_v53 = vmax.f32 %v3841_v20, 0.0  ;;  %v3859_v2 = vadd.f32 %v10078_v28, %v3594_v22  ;;  %v3588_v50 = vadd.f32 %v3587_v18, %v10042_v10  ;;  %7484 = vmatpush3.msra.mxu0 %v11870_v4  ;;  %v11873_v28 = vld [vmem:[#allocation59_spill] sm:$0xff] }
 0x2cd   :  { %11868 = vst [vmem:[#allocation10_spill] sm:$0xff] %v10218_v0  ;;  %v4215_v51 = vsub.f32 %v10171_v25, %v11869_v12  ;;  %v10234_v17 = vand.u32 4294901760, %v4041_v34  ;;  %v7278_v12 = vpop.f32.mrf.mxu0  ;;  %7443 = vmatprep.mubr.f32.mxu1 %v10218_v0  ;;  %v11872_v19 = vand.u32 4294901760, %v10168_v58  ;;  %7485 = vmatprep.subr.mxu0 %v11873_v28 }
 0x2ce   :  { %v4038_v10 = vsel %vm4006_vm2, %v3980_v53, 0  ;;  %v3983_v18 = vmax.f32 %v3859_v2, 0.0  ;;  %v3853_v22 = vadd.f32 %v10093_v5, %v3588_v50  ;;  %v3606_v60 = vadd.f32 %v7278_v12, %v10045_v16  ;;  %7444 = vmatmul.mubr.f32.gmra.mxu1 %v10216_v24  ;;  %7486 = vmatpush3.msra.mxu0 %v11873_v28  ;;  %v11875_v53 = vld [vmem:[#allocation53_spill] sm:$0xff]  ;;  %v10256_v12 = vpop.f32.mrf.mxu1 }
 0x2cf   :  { %11871 = vst [vmem:[#allocation61_spill] sm:$0xff] %v10234_v17  ;;  %v4216_v15 = vand.u32 4294901760, %v4215_v51  ;;  %v4225_v20 = vsub.f32 %v10168_v58, %v11872_v19  ;;  %v10247_v51 = vsub.f32 %v4035_v31, %v10216_v24  ;;  %v10249_v4 = vand.u32 4294901760, %v4038_v10  ;;  %v3599_v43 = vpop.f32.mrf.mxu0  ;;  %7591 = vmatprep.subr.mxu0 %v11875_v53 }
 0x2d0   :  { %v4047_v5 = vsel %vm4006_vm2, %v3983_v18, 0  ;;  %v3982_v2 = vmax.f32 %v3853_v22, 0.0  ;;  %v3871_v16 = vadd.f32 %v10111_v3, %v3606_v60  ;;  %v3600_v50 = vadd.f32 %v3599_v43, %v10052_v39 }
 0x2d1   :  { %11874 = vst [vmem:[#allocation16_spill] sm:$0xff] %v10249_v4  ;;  %7381 = vmatprep.mubr.f32.mxu0 %v4216_v15  ;;  %v4226_v19 = vand.u32 4294901760, %v4225_v20  ;;  %v10259_v31 = vsub.f32 %v4032_v46, %v10218_v0  ;;  %v10262_v15 = vsub.f32 %v4041_v34, %v10234_v17  ;;  %v7281_v20 = vpop.f32.mrf.mxu0  ;;  %v4235_v28 = vsub.f32 %v10201_v45, %v11422_v37 }
 0x2d2   :  { %7446 = vmatprep.mubr.f32.mxu1 %v10249_v4  ;;  %v11427_v3 = vand.u32 4294901760, %v10232_v32  ;;  %v4044_v39 = vsel %vm4006_vm2, %v3982_v2, 0  ;;  %v3985_v43 = vmax.f32 %v3871_v16, 0.0  ;;  %v3865_v18 = vadd.f32 %v10130_v42, %v3600_v50 }
 0x2d3   :  { %7382 = vmatmul.mubr.f32.gmra.mxu0 %v4226_v19  ;;  %v3618_v46 = vadd.f32 %v7281_v20, %v10055_v36  ;;  %7447 = vmatmul.mubr.f32.gmra.mxu1 %v10234_v17  ;;  %v10273_v34 = vand.u32 4294901760, %v4047_v5  ;;  %v10275_v22 = vand.u32 4294901760, %v4044_v39  ;;  %v4236_v60 = vand.u32 4294901760, %v4235_v28  ;;  %v3611_v37 = vpop.f32.mrf.mxu0  ;;  %v10283_v36 = vpop.f32.mrf.mxu1 }
 0x2d4   :  { %v4245_v19 = vsub.f32 %v10232_v32, %v11427_v3  ;;  %v4053_v24 = vsel %vm4006_vm2, %v3985_v43, 0  ;;  %v3984_v2 = vmax.f32 %v3865_v18, 0.0  ;;  %v3612_v42 = vadd.f32 %v3611_v37, %v10059_v52 }
 0x2d5   :  { %11876 = vst [vmem:[#allocation14_spill] sm:$0xff] %v10273_v34  ;;  %11877 = vst [vmem:[#allocation3_spill] sm:$0xff] %v10275_v22  ;;  %v3883_v16 = vadd.f32 %v10149_v41, %v3618_v46  ;;  %v10286_v50 = vsub.f32 %v4038_v10, %v10249_v4  ;;  %v10288_v20 = vand.u32 4294901760, %v4053_v24  ;;  %7384 = vmatprep.mubr.f32.mxu0 %v4236_v60  ;;  %v7284_v17 = vpop.f32.mrf.mxu0  ;;  %v11428_v3 = vand.u32 4294901760, %v10259_v31 }
 0x2d6   :  { %v4246_v28 = vand.u32 4294901760, %v4245_v19  ;;  %7449 = vmatprep.mubr.f32.mxu1 %v10275_v22  ;;  %v4050_v43 = vsel %vm4006_vm2, %v3984_v2, 0  ;;  %v3877_v41 = vadd.f32 %v10160_v11, %v3612_v42  ;;  %v3630_v52 = vadd.f32 %v7284_v17, %v10067_v56 }
 0x2d7   :  { %11878 = vst [vmem:[#allocation23_spill] sm:$0xff] %v10288_v20  ;;  %v3987_v18 = vmax.f32 %v3883_v16, 0.0  ;;  %7450 = vmatmul.mubr.f32.gmra.mxu1 %v10273_v34  ;;  %v10297_v37 = vsub.f32 %v4047_v5, %v10273_v34  ;;  %v10299_v10 = vand.u32 4294901760, %v4050_v43  ;;  %v4255_v46 = vsub.f32 %v10259_v31, %v11428_v3  ;;  %v3623_v19 = vpop.f32.mrf.mxu0  ;;  %v10308_v16 = vpop.f32.mrf.mxu1 }
 0x2d8   :  { %7385 = vmatmul.mubr.f32.gmra.mxu0 %v4246_v28  ;;  %v11431_v60 = vand.u32 4294901760, %v10247_v51  ;;  %v3986_v11 = vmax.f32 %v3877_v41, 0.0  ;;  %v3895_v56 = vadd.f32 %v10178_v8, %v3630_v52  ;;  %v3624_v17 = vadd.f32 %v3623_v19, %v10070_v26  ;;  %v11880_v41 = vld [vmem:[#allocation46_spill] sm:$0xff] }
 0x2d9   :  { %11879 = vst [vmem:[#allocation60_spill] sm:$0xff] %v10299_v10  ;;  %v4059_v2 = vsel %vm4006_vm2, %v3987_v18, 0  ;;  %v10311_v5 = vsub.f32 %v4044_v39, %v10275_v22  ;;  %v10314_v42 = vsub.f32 %v4053_v24, %v10288_v20  ;;  %v4256_v28 = vand.u32 4294901760, %v4255_v46  ;;  %v7287_v34 = vpop.f32.mrf.mxu0  ;;  %7452 = vmatprep.mubr.f32.mxu1 %v10299_v10 }
 0x2da   :  { %v4265_v3 = vsub.f32 %v10247_v51, %v11431_v60  ;;  %v4056_v8 = vsel %vm4006_vm2, %v3986_v11, 0  ;;  %v3989_v18 = vmax.f32 %v3895_v56, 0.0  ;;  %v3889_v26 = vadd.f32 %v10192_v29, %v3624_v17  ;;  %v10332_v56 = vpop.f32.mrf.mxu1 }
 0x2db   :  { %v3642_v52 = vadd.f32 %v7287_v34, %v11880_v41  ;;  %7453 = vmatmul.mubr.f32.gmra.mxu1 %v10288_v20  ;;  %v10324_v39 = vand.u32 4294901760, %v4059_v2  ;;  %v10326_v24 = vand.u32 4294901760, %v4056_v8  ;;  %7387 = vmatprep.mubr.f32.mxu0 %v4256_v28  ;;  %v11436_v19 = vand.u32 4294901760, %v10286_v50  ;;  %v3635_v60 = vpop.f32.mrf.mxu0  ;;  %v11882_v41 = vld [vmem:[#allocation29_spill] sm:$0xff] }
 0x2dc   :  { %v4266_v46 = vand.u32 4294901760, %v4265_v3  ;;  %v4065_v22 = vsel %vm4006_vm2, %v3989_v18, 0  ;;  %v3988_v4 = vmax.f32 %v3889_v26, 0.0  ;;  %v11441_v29 = vand.u32 4294901760, %v10262_v15 }
 0x2dd   :  { %11881 = vst [vmem:[#allocation35_spill] sm:$0xff] %v10324_v39  ;;  %v3907_v11 = vadd.f32 %v10205_v7, %v3642_v52  ;;  %v10335_v34 = vsub.f32 %v4050_v43, %v10299_v10  ;;  %v4275_v3 = vsub.f32 %v10286_v50, %v11436_v19  ;;  %v3636_v17 = vadd.f32 %v3635_v60, %v10081_v35  ;;  %v7290_v28 = vpop.f32.mrf.mxu0  ;;  %v7360_v10 = vpop.f32.mrf.mxu1 }
 0x2de   :  { %7388 = vmatmul.mubr.f32.gmra.mxu0 %v4266_v46  ;;  %7455 = vmatprep.mubr.f32.mxu1 %v10326_v24  ;;  %v4062_v18 = vsel %vm4006_vm2, %v3988_v4, 0  ;;  %v4285_v26 = vsub.f32 %v10262_v15, %v11441_v29  ;;  %v3654_v43 = vadd.f32 %v7290_v28, %v11882_v41  ;;  %v10348_v52 = vand.u32 4294901760, %v4065_v22 }
 0x2df   :  { %v3991_v7 = vmax.f32 %v3907_v11, 0.0  ;;  %7456 = vmatmul.mubr.f32.gmra.mxu1 %v10324_v39  ;;  %v10350_v46 = vand.u32 4294901760, %v4062_v18  ;;  %v4276_v19 = vand.u32 4294901760, %v4275_v3  ;;  %v3901_v35 = vadd.f32 %v10228_v27, %v3636_v17  ;;  %v3647_v60 = vpop.f32.mrf.mxu0 }
 0x2e0   :  { %11883 = vst [vmem:[#allocation18_spill] sm:$0xff] %v10348_v52  ;;  %v10354_v20 = vsub.f32 %v4059_v2, %v10324_v39  ;;  %v4286_v4 = vand.u32 4294901760, %v4285_v26  ;;  %v3919_v11 = vadd.f32 %v10256_v12, %v3654_v43  ;;  %v11445_v29 = vand.u32 4294901760, %v10311_v5 }
 0x2e1   :  { %11884 = vst [vmem:[#allocation6_spill] sm:$0xff] %v10350_v46  ;;  %v10359_v28 = vsub.f32 %v4056_v8, %v10326_v24  ;;  %v4071_v41 = vsel %vm4006_vm2, %v3991_v7, 0  ;;  %7390 = vmatprep.mubr.f32.mxu0 %v4276_v19  ;;  %v3990_v0 = vmax.f32 %v3901_v35, 0.0  ;;  %v11444_v3 = vand.u32 4294901760, %v10297_v37  ;;  %v7293_v27 = vpop.f32.mrf.mxu0  ;;  %7458 = vmatprep.mubr.f32.mxu1 %v10350_v46 }
 0x2e2   :  { %7391 = vmatmul.mubr.f32.gmra.mxu0 %v4286_v4  ;;  %v3993_v2 = vmax.f32 %v3919_v11, 0.0  ;;  %v4295_v12 = vsub.f32 %v10311_v5, %v11445_v29  ;;  %v3648_v17 = vadd.f32 %v3647_v60, %v10084_v59  ;;  %v3666_v8 = vadd.f32 %v7293_v27, %v9913_v14  ;;  %v3936_v11 = vpop.f32.mrf.mxu1 }
 0x2e3   :  { %7459 = vmatmul.mubr.f32.gmra.mxu1 %v10348_v52  ;;  %v10371_v19 = vsub.f32 %v4065_v22, %v10348_v52  ;;  %v4068_v7 = vsel %vm4006_vm2, %v3990_v0, 0  ;;  %v4305_v26 = vsub.f32 %v10297_v37, %v11444_v3  ;;  %v11450_v43 = vand.u32 4294901760, %v10335_v34  ;;  %v3659_v35 = vpop.f32.mrf.mxu0 }
 0x2e4   :  { %v10378_v4 = vand.u32 4294901760, %v4068_v7  ;;  %v4077_v59 = vsel %vm4006_vm2, %v3993_v2, 0  ;;  %v4296_v60 = vand.u32 4294901760, %v4295_v12  ;;  %v3913_v14 = vadd.f32 %v10283_v36, %v3648_v17 }
 0x2e5   :  { %v10382_v27 = vand.u32 4294901760, %v4071_v41  ;;  %v4306_v22 = vand.u32 4294901760, %v4305_v26  ;;  %v3931_v0 = vadd.f32 %v10308_v16, %v3666_v8  ;;  %v4315_v3 = vsub.f32 %v10335_v34, %v11450_v43  ;;  %v7296_v29 = vpop.f32.mrf.mxu0 }
 0x2e6   :  { %v10389_v52 = vsub.f32 %v4062_v18, %v10350_v46  ;;  %7393 = vmatprep.mubr.f32.mxu0 %v4296_v60  ;;  %v3992_v39 = vmax.f32 %v3913_v14, 0.0  ;;  %v11455_v2 = vand.u32 4294901760, %v10314_v42  ;;  %v3660_v36 = vadd.f32 %v3659_v35, %v10096_v30  ;;  %7461 = vmatprep.mubr.f32.mxu1 %v10378_v4  ;;  %v7363_v60 = vpop.f32.mrf.mxu1 }
 0x2e7   :  { %11885 = vst [vmem:[#allocation37_spill] sm:$0xff] %v10382_v27  ;;  %v10394_v12 = vand.u32 4294901760, %v4077_v59  ;;  %7394 = vmatmul.mubr.f32.gmra.mxu0 %v4306_v22  ;;  %v3995_v16 = vmax.f32 %v3931_v0, 0.0  ;;  %v4316_v17 = vand.u32 4294901760, %v4315_v3  ;;  %v3678_v8 = vadd.f32 %v7296_v29, %v9944_v49  ;;  %7462 = vmatmul.mubr.f32.gmra.mxu1 %v10382_v27  ;;  %v3671_v26 = vpop.f32.mrf.mxu0 }
 0x2e8   :  { %v4074_v18 = vsel %vm4006_vm2, %v3992_v39, 0  ;;  %v4325_v14 = vsub.f32 %v10314_v42, %v11455_v2  ;;  %v3925_v30 = vadd.f32 %v10332_v56, %v3660_v36  ;;  %v11453_v35 = vand.u32 4294901760, %v10359_v28 }
 0x2e9   :  { %11886 = vst [vmem:[#allocation62_spill] sm:$0xff] %v10394_v12  ;;  %v10405_v22 = vsub.f32 %v4071_v41, %v10382_v27  ;;  %v10407_v3 = vand.u32 4294901760, %v4074_v18  ;;  %7396 = vmatprep.mubr.f32.mxu0 %v4316_v17  ;;  %v3943_v49 = vadd.f32 %v7360_v10, %v3678_v8  ;;  %v11454_v29 = vand.u32 4294901760, %v10354_v20  ;;  %v7299_v0 = vpop.f32.mrf.mxu0 }
 0x2ea   :  { %v4083_v39 = vsel %vm4006_vm2, %v3995_v16, 0  ;;  %v4326_v43 = vand.u32 4294901760, %v4325_v14  ;;  %v3994_v46 = vmax.f32 %v3925_v30, 0.0  ;;  %v4335_v56 = vsub.f32 %v10359_v28, %v11453_v35  ;;  %v3948_v30 = vpop.f32.mrf.mxu1 }
 0x2eb   :  { %v10415_v36 = vsub.f32 %v4068_v7, %v10378_v4  ;;  %v3997_v41 = vmax.f32 %v3943_v49, 0.0  ;;  %v4345_v17 = vsub.f32 %v10354_v20, %v11454_v29  ;;  %v3672_v10 = vadd.f32 %v3671_v26, %v10099_v9  ;;  %7464 = vmatprep.mubr.f32.mxu1 %v10407_v3  ;;  %v3683_v8 = vpop.f32.mrf.mxu0 }
 0x2ec   :  { %v10423_v16 = vsub.f32 %v4077_v59, %v10394_v12  ;;  %7397 = vmatmul.mubr.f32.gmra.mxu0 %v4326_v43  ;;  %v4080_v14 = vsel %vm4006_vm2, %v3994_v46, 0  ;;  %v4336_v35 = vand.u32 4294901760, %v4335_v56  ;;  %v3690_v7 = vadd.f32 %v7299_v0, %v9977_v44  ;;  %7465 = vmatmul.mubr.f32.gmra.mxu1 %v10394_v12 }
 0x2ed   :  { %v10428_v49 = vand.u32 4294901760, %v4083_v39  ;;  %v10430_v29 = vand.u32 4294901760, %v4080_v14  ;;  %v4089_v9 = vsel %vm4006_vm2, %v3997_v41, 0  ;;  %v3937_v26 = vadd.f32 %v3936_v11, %v3672_v10  ;;  %v7302_v2 = vpop.f32.mrf.mxu0  ;;  %v7366_v11 = vpop.f32.mrf.mxu1 }
 0x2ee   :  { %7399 = vmatprep.mubr.f32.mxu0 %v4336_v35  ;;  %v4346_v59 = vand.u32 4294901760, %v4345_v17  ;;  %v3955_v27 = vadd.f32 %v7363_v60, %v3690_v7  ;;  %v11460_v43 = vand.u32 4294901760, %v10389_v52  ;;  %v11461_v46 = vand.u32 4294901760, %v10371_v19 }
 0x2ef   :  { %v10436_v56 = vsub.f32 %v4074_v18, %v10407_v3  ;;  %v3996_v44 = vmax.f32 %v3937_v26, 0.0  ;;  %v3684_v0 = vadd.f32 %v3683_v8, %v10114_v61  ;;  %v3702_v12 = vadd.f32 %v7302_v2, %v10009_v62  ;;  %7467 = vmatprep.mubr.f32.mxu1 %v10430_v29  ;;  %v3695_v10 = vpop.f32.mrf.mxu0 }
 0x2f0   :  { %v10441_v41 = vand.u32 4294901760, %v4089_v9  ;;  %7400 = vmatmul.mubr.f32.gmra.mxu0 %v4346_v59  ;;  %v3999_v35 = vmax.f32 %v3955_v27, 0.0  ;;  %v4355_v60 = vsub.f32 %v10389_v52, %v11460_v43  ;;  %v4365_v18 = vsub.f32 %v10371_v19, %v11461_v46  ;;  %7468 = vmatmul.mubr.f32.gmra.mxu1 %v10428_v49 }
 0x2f1   :  { %v4086_v61 = vsel %vm4006_vm2, %v3996_v44, 0  ;;  %v3949_v62 = vadd.f32 %v3948_v30, %v3684_v0  ;;  %v3967_v2 = vadd.f32 %v7366_v11, %v3702_v12  ;;  %v11462_v17 = vand.u32 4294901760, %v10415_v36 }
 0x2f2   :  { %v10453_v8 = vsub.f32 %v4080_v14, %v10430_v29  ;;  %v10455_v27 = vand.u32 4294901760, %v4086_v61  ;;  %v4095_v7 = vsel %vm4006_vm2, %v3999_v35, 0  ;;  %v4356_v26 = vand.u32 4294901760, %v4355_v60  ;;  %v3960_v35 = vpop.f32.mrf.mxu1 }
 0x2f3   :  { %v4366_v59 = vand.u32 4294901760, %v4365_v18  ;;  %v3998_v43 = vmax.f32 %v3949_v62, 0.0  ;;  %v4001_v46 = vmax.f32 %v3967_v2, 0.0  ;;  %v4375_v44 = vsub.f32 %v10415_v36, %v11462_v17 }
 0x2f4   :  { %v10462_v12 = vsub.f32 %v4083_v39, %v10428_v49  ;;  %7402 = vmatprep.mubr.f32.mxu0 %v4356_v26  ;;  %v11465_v30 = vand.u32 4294901760, %v10405_v22  ;;  %v3696_v14 = vadd.f32 %v3695_v10, %v10209_v1  ;;  %v11463_v0 = vand.u32 4294901760, %v10436_v56  ;;  %7470 = vmatprep.mubr.f32.mxu1 %v10455_v27 }
 0x2f5   :  { %v10469_v11 = vsub.f32 %v4089_v9, %v10441_v41  ;;  %v10471_v60 = vand.u32 4294901760, %v4095_v7  ;;  %7403 = vmatmul.mubr.f32.gmra.mxu0 %v4366_v59  ;;  %v4092_v18 = vsel %vm4006_vm2, %v3998_v43, 0  ;;  %v4376_v39 = vand.u32 4294901760, %v4375_v44  ;;  %7471 = vmatmul.mubr.f32.gmra.mxu1 %v10441_v41 }
 0x2f6   :  { %v10476_v62 = vsub.f32 %v4086_v61, %v10455_v27  ;;  %v10478_v1 = vand.u32 4294901760, %v4092_v18  ;;  %v4385_v2 = vsub.f32 %v10405_v22, %v11465_v30  ;;  %v3961_v9 = vadd.f32 %v3960_v35, %v3696_v14 }
 0x2f7   :  { %v4101_v10 = vsel %vm4006_vm2, %v4001_v46, 0  ;;  %7405 = vmatprep.mubr.f32.mxu0 %v4376_v39  ;;  %v4395_v43 = vsub.f32 %v10436_v56, %v11463_v0  ;;  %v11464_v26 = vand.u32 4294901760, %v10423_v16  ;;  %v11466_v59 = vand.u32 4294901760, %v10453_v8 }
 0x2f8   :  { %11887 = vst [vmem:[#allocation33_spill] sm:$0xff] %v10478_v1  ;;  %v10490_v61 = vsub.f32 %v4092_v18, %v10478_v1  ;;  %v4386_v44 = vand.u32 4294901760, %v4385_v2  ;;  %v4000_v17 = vmax.f32 %v3961_v9, 0.0  ;;  %7473 = vmatprep.mubr.f32.mxu1 %v10478_v1  ;;  %v10502_v18 = vsub.f32 %v4095_v7, %v10471_v60 }
 0x2f9   :  { %v4396_v35 = vand.u32 4294901760, %v4395_v43  ;;  %v4405_v46 = vsub.f32 %v10423_v16, %v11464_v26  ;;  %v4415_v39 = vsub.f32 %v10453_v8, %v11466_v59  ;;  %7474 = vmatmul.mubr.f32.gmra.mxu1 %v10471_v60  ;;  %v11469_v9 = vand.u32 4294901760, %v10476_v62 }
 0x2fa   :  { %7406 = vmatmul.mubr.f32.gmra.mxu0 %v4386_v44  ;;  %v4098_v2 = vsel %vm4006_vm2, %v4000_v17, 0  ;;  %v10506_v0 = vand.u32 4294901760, %v4101_v10  ;;  %v11470_v30 = vand.u32 4294901760, %v10490_v61  ;;  %v11889_v59 = vand.u32 4294901760, %v10462_v12 }
 0x2fb   :  { %v10508_v43 = vand.u32 4294901760, %v4098_v2  ;;  %7408 = vmatprep.mubr.f32.mxu0 %v4396_v35  ;;  %v4416_v26 = vand.u32 4294901760, %v4415_v39  ;;  %v4406_v14 = vand.u32 4294901760, %v4405_v46  ;;  %v4435_v7 = vsub.f32 %v10476_v62, %v11469_v9 }
 0x2fc   :  { %11888 = vst [vmem:[#allocation17_spill] sm:$0xff] %v10506_v0  ;;  %v4425_v1 = vsub.f32 %v10462_v12, %v11889_v59  ;;  %v11471_v17 = vand.u32 4294901760, %v10469_v11  ;;  %v11890_v46 = vand.u32 4294901760, %v10106_v33  ;;  %v4455_v59 = vsub.f32 %v10490_v61, %v11470_v30 }
 0x2fd   :  { %v10519_v44 = vsub.f32 %v4098_v2, %v10508_v43  ;;  %7476 = vmatprep.mubr.f32.mxu1 %v10508_v43  ;;  %v4436_v35 = vand.u32 4294901760, %v4435_v7  ;;  %v10530_v9 = vsub.f32 %v4101_v10, %v10506_v0  ;;  %v11891_v7 = vand.u32 4294901760, %v10089_v13 }
 0x2fe   :  { %7409 = vmatmul.mubr.f32.gmra.mxu0 %v4406_v14  ;;  %7477 = vmatmul.mubr.f32.gmra.mxu1 %v10506_v0  ;;  %v4426_v2 = vand.u32 4294901760, %v4425_v1  ;;  %v4445_v14 = vsub.f32 %v10469_v11, %v11471_v17  ;;  %v11892_v30 = vand.u32 4294901760, %v10141_v38 }
 0x2ff   :  { %7411 = vmatprep.mubr.f32.mxu0 %v4416_v26  ;;  %7543 = vmatprep.mubr.f32.mxu1 %v11890_v46  ;;  %v4474_v39 = vand.u32 4294901760, %v10519_v44  ;;  %v4464_v26 = vand.u32 4294901760, %v10502_v18  ;;  %v4456_v46 = vand.u32 4294901760, %v4455_v59  ;;  %v4484_v0 = vand.u32 4294901760, %v10530_v9 }
 0x300   :  { %v4446_v1 = vand.u32 4294901760, %v4445_v14  ;;  %v11894_v59 = vand.u32 4294901760, %v10171_v25 }
 0x301   :  { %v4475_v10 = vsub.f32 %v10519_v44, %v4474_v39  ;;  %v4465_v17 = vsub.f32 %v10502_v18, %v4464_v26  ;;  %v4485_v14 = vsub.f32 %v10530_v9, %v4484_v0 }
 0x302   :  { %7412 = vmatmul.mubr.f32.gmra.mxu0 %v4426_v2  ;;  %7544 = vmatmul.mubr.f32.vlgmr.msra.gmra.mxu1 %v11891_v7  ;;  %v11896_v7 = vand.u32 4294901760, %v10201_v45 }
 0x303   :  { %7414 = vmatprep.mubr.f32.mxu0 %v4436_v35  ;;  %7546 = vmatprep.mubr.f32.mxu1 %v11892_v30  ;;  %v11893_v35 = vand.u32 4294901760, %v10138_v23  ;;  %v4476_v30 = vand.u32 4294901760, %v4475_v10  ;;  %v4466_v2 = vand.u32 4294901760, %v4465_v17  ;;  %v11897_v17 = vand.u32 4294901760, %v10232_v32 }
 0x304   :  { %7648 = vmatpush3.msra.mxu1 %v11857_v54  ;;  %v11895_v54 = vand.u32 4294901760, %v10168_v58  ;;  %v11899_v10 = vand.u32 4294901760, %v10247_v51 }
 0x305   :  { %7649 = vmatprep.subr.mxu1 %v11858_v47 }
 0x306   :  { %7415 = vmatmul.mubr.f32.gmra.mxu0 %v4446_v1  ;;  %7547 = vmatmul.mubr.f32.gmra.mxu1 %v11893_v35  ;;  %v11901_v1 = vld [vmem:[#allocation55_spill] sm:$0xff]  ;;  %v11911_v35 = vand.u32 4294901760, %v10389_v52 }
 0x307   :  { %7417 = vmatprep.mubr.f32.mxu0 %v4456_v46  ;;  %7549 = vmatprep.mubr.f32.mxu1 %v11894_v59  ;;  %v4486_v46 = vand.u32 4294901760, %v4485_v14 }
 0x308   :  { %7650 = vmatpush3.msra.mxu1 %v11858_v47  ;;  %v11898_v47 = vand.u32 4294901760, %v10259_v31 }
 0x309   :  { %7651 = vmatprep.subr.mxu1 %v11860_v48 }
 0x30a   :  { %7418 = vmatmul.mubr.f32.gmra.mxu0 %v4466_v2  ;;  %7550 = vmatmul.mubr.f32.gmra.mxu1 %v11895_v54 }
 0x30b   :  { %7420 = vmatprep.mubr.f32.mxu0 %v4476_v30  ;;  %7552 = vmatprep.mubr.f32.mxu1 %v11896_v7 }
 0x30c   :  { %7652 = vmatpush3.msra.mxu1 %v11860_v48  ;;  %v11900_v48 = vand.u32 4294901760, %v10286_v50 }
 0x30d   :  { %7653 = vmatprep.subr.mxu1 %v11861_v21 }
 0x30e   :  { %7421 = vmatmul.mubr.f32.gmra.mxu0 %v4486_v46  ;;  %7553 = vmatmul.mubr.f32.gmra.mxu1 %v11897_v17 }
 0x30f   :  { %7487 = vmatprep.mubr.f32.mxu0 %v10106_v33  ;;  %7555 = vmatprep.mubr.f32.mxu1 %v11898_v47  ;;  %v11902_v33 = vand.u32 4294901760, %v10262_v15 }
 0x310   :  { %7654 = vmatpush3.msra.mxu1 %v11861_v21  ;;  %v11905_v21 = vand.u32 4294901760, %v10297_v37 }
 0x312   :  { %7488 = vmatmul.mubr.f32.vlgmr.msra.gmra.mxu0 %v10089_v13  ;;  %7556 = vmatmul.mubr.f32.gmra.mxu1 %v11899_v10  ;;  %v11903_v13 = vand.u32 4294901760, %v10311_v5 }
 0x313   :  { %7490 = vmatprep.mubr.f32.mxu0 %v10141_v38  ;;  %7592 = vmatpush3.msra.mxu0 %v11875_v53  ;;  %v11904_v38 = vld [vmem:[#allocation56_spill] sm:$0xff]  ;;  %v11907_v53 = vld [vmem:[#allocation58_spill] sm:$0xff] }
 0x314   :  { %7558 = vmatprep.mubr.f32.mxu1 %v11900_v48  ;;  %7593 = vmatprep.subr.mxu0 %v11901_v1 }
 0x315   :  { %7594 = vmatpush3.msra.mxu0 %v11901_v1 }
 0x316   :  { %7491 = vmatmul.mubr.f32.gmra.mxu0 %v10138_v23  ;;  %7559 = vmatmul.mubr.f32.gmra.mxu1 %v11902_v33  ;;  %v11906_v23 = vand.u32 4294901760, %v10335_v34 }
 0x317   :  { %7493 = vmatprep.mubr.f32.mxu0 %v10171_v25  ;;  %7561 = vmatprep.mubr.f32.mxu1 %v11903_v13  ;;  %v11908_v25 = vand.u32 4294901760, %v10314_v42 }
 0x318   :  { %7595 = vmatprep.subr.mxu0 %v11904_v38 }
 0x319   :  { %7596 = vmatpush3.msra.mxu0 %v11904_v38 }
 0x31a   :  { %7494 = vmatmul.mubr.f32.gmra.mxu0 %v10168_v58  ;;  %7562 = vmatmul.mubr.f32.gmra.mxu1 %v11905_v21  ;;  %v11909_v58 = vand.u32 4294901760, %v10359_v28 }
 0x31b   :  { %7496 = vmatprep.mubr.f32.mxu0 %v10201_v45  ;;  %7564 = vmatprep.mubr.f32.mxu1 %v11906_v23  ;;  %v11910_v45 = vand.u32 4294901760, %v10354_v20 }
 0x31c   :  { %7597 = vmatprep.subr.mxu0 %v11907_v53 }
 0x31d   :  { %7598 = vmatpush3.msra.mxu0 %v11907_v53 }
 0x31e   :  { %7497 = vmatmul.mubr.f32.gmra.mxu0 %v10232_v32  ;;  %7565 = vmatmul.mubr.f32.gmra.mxu1 %v11908_v25  ;;  %v11912_v32 = vand.u32 4294901760, %v10371_v19 }
 0x31f   :  { %7499 = vmatprep.mubr.f32.mxu0 %v10259_v31  ;;  %7567 = vmatprep.mubr.f32.mxu1 %v11909_v58  ;;  %v11913_v31 = vand.u32 4294901760, %v10415_v36 }
 0x322   :  { %7500 = vmatmul.mubr.f32.gmra.mxu0 %v10247_v51  ;;  %7568 = vmatmul.mubr.f32.gmra.mxu1 %v11910_v45  ;;  %v11914_v51 = vand.u32 4294901760, %v10405_v22 }
 0x323   :  { %7502 = vmatprep.mubr.f32.mxu0 %v10286_v50  ;;  %7570 = vmatprep.mubr.f32.mxu1 %v11911_v35  ;;  %v11915_v50 = vand.u32 4294901760, %v10436_v56 }
 0x326   :  { %7503 = vmatmul.mubr.f32.gmra.mxu0 %v10262_v15  ;;  %7571 = vmatmul.mubr.f32.gmra.mxu1 %v11912_v32  ;;  %v11916_v15 = vand.u32 4294901760, %v10423_v16 }
 0x327   :  { %7505 = vmatprep.mubr.f32.mxu0 %v10311_v5  ;;  %7573 = vmatprep.mubr.f32.mxu1 %v11913_v31  ;;  %v11917_v5 = vand.u32 4294901760, %v10453_v8 }
 0x32a   :  { %7506 = vmatmul.mubr.f32.gmra.mxu0 %v10297_v37  ;;  %7574 = vmatmul.mubr.f32.gmra.mxu1 %v11914_v51  ;;  %v11918_v37 = vand.u32 4294901760, %v10462_v12 }
 0x32b   :  { %7508 = vmatprep.mubr.f32.mxu0 %v10335_v34  ;;  %7576 = vmatprep.mubr.f32.mxu1 %v11915_v50  ;;  %v11919_v34 = vand.u32 4294901760, %v10476_v62 }
 0x32e   :  { %7509 = vmatmul.mubr.f32.gmra.mxu0 %v10314_v42  ;;  %7577 = vmatmul.mubr.f32.gmra.mxu1 %v11916_v15  ;;  %v11920_v42 = vand.u32 4294901760, %v10469_v11 }
 0x32f   :  { %7511 = vmatprep.mubr.f32.mxu0 %v10359_v28  ;;  %7579 = vmatprep.mubr.f32.mxu1 %v11917_v5  ;;  %v11921_v28 = vand.u32 4294901760, %v10490_v61 }
 0x332   :  { %7512 = vmatmul.mubr.f32.gmra.mxu0 %v10354_v20  ;;  %7580 = vmatmul.mubr.f32.gmra.mxu1 %v11918_v37  ;;  %v11922_v20 = vld [vmem:[#allocation49_spill] sm:$0xff] }
 0x333   :  { %7514 = vmatprep.mubr.f32.mxu0 %v10389_v52  ;;  %7582 = vmatprep.mubr.f32.mxu1 %v11919_v34  ;;  %v11923_v52 = vld [vmem:[#allocation8_spill] sm:$0xff] }
 0x336   :  { %7515 = vmatmul.mubr.f32.gmra.mxu0 %v10371_v19  ;;  %7583 = vmatmul.mubr.f32.gmra.mxu1 %v11920_v42  ;;  %v11924_v19 = vld [vmem:[#allocation51_spill] sm:$0xff] }
 0x337   :  { %7517 = vmatprep.mubr.f32.mxu0 %v10415_v36  ;;  %7585 = vmatprep.mubr.f32.mxu1 %v11921_v28  ;;  %v11926_v36 = vld [vmem:[#allocation11_spill] sm:$0xff] }
 0x33a   :  { %7518 = vmatmul.mubr.f32.gmra.mxu0 %v10405_v22  ;;  %7586 = vmatmul.mubr.f32.gmra.mxu1 %v4464_v26  ;;  %v11925_v22 = vld [vmem:[#allocation10_spill] sm:$0xff] }
 0x33b   :  { %7520 = vmatprep.mubr.f32.mxu0 %v10436_v56  ;;  %7588 = vmatprep.mubr.f32.mxu1 %v4474_v39  ;;  %v11928_v56 = vld [vmem:[#allocation61_spill] sm:$0xff] }
 0x33e   :  { %7521 = vmatmul.mubr.f32.gmra.mxu0 %v10423_v16  ;;  %7589 = vmatmul.mubr.f32.gmra.mxu1 %v4484_v0  ;;  %v11927_v16 = vld [vmem:[#allocation16_spill] sm:$0xff]  ;;  %v11936_v0 = vld [vmem:[#allocation37_spill] sm:$0xff] }
 0x33f   :  { %7523 = vmatprep.mubr.f32.mxu0 %v10453_v8  ;;  %7655 = vmatprep.mubr.f32.mxu1 %v10091_v6  ;;  %v11929_v8 = vld [vmem:[#allocation3_spill] sm:$0xff] }
 0x342   :  { %7524 = vmatmul.mubr.f32.gmra.mxu0 %v10462_v12  ;;  %7656 = vmatmul.mubr.f32.vlgmr.msra.gmra.mxu1 %v10076_v63  ;;  %v11935_v12 = vld [vmem:[#allocation18_spill] sm:$0xff] }
 0x343   :  { %7526 = vmatprep.mubr.f32.mxu0 %v10476_v62  ;;  %7658 = vmatprep.mubr.f32.mxu1 %v10127_v40  ;;  %v11938_v62 = vld [vmem:[#allocation33_spill] sm:$0xff] }
 0x346   :  { %7527 = vmatmul.mubr.f32.gmra.mxu0 %v10469_v11  ;;  %7659 = vmatmul.mubr.f32.gmra.mxu1 %v10108_v55  ;;  %v11937_v11 = vld [vmem:[#allocation62_spill] sm:$0xff] }
 0x347   :  { %7529 = vmatprep.mubr.f32.mxu0 %v10490_v61  ;;  %7661 = vmatprep.mubr.f32.mxu1 %v10157_v57 }
 0x34a   :  { %7530 = vmatmul.mubr.f32.gmra.mxu0 %v10502_v18  ;;  %7662 = vmatmul.mubr.f32.gmra.mxu1 %v11922_v20 }
 0x34b   :  { %7532 = vmatprep.mubr.f32.mxu0 %v10519_v44  ;;  %7664 = vmatprep.mubr.f32.mxu1 %v11923_v52 }
 0x34e   :  { %7533 = vmatmul.mubr.f32.gmra.mxu0 %v10530_v9  ;;  %7665 = vmatmul.mubr.f32.gmra.mxu1 %v11924_v19 }
 0x34f   :  { %7599 = vmatprep.mubr.f32.mxu0 %v10091_v6  ;;  %7667 = vmatprep.mubr.f32.mxu1 %v11925_v22  ;;  %v11930_v6 = vld [vmem:[#allocation14_spill] sm:$0xff] }
 0x352   :  { %7600 = vmatmul.mubr.f32.vlgmr.msra.gmra.mxu0 %v10076_v63  ;;  %7668 = vmatmul.mubr.f32.gmra.mxu1 %v11926_v36  ;;  %v11931_v63 = vld [vmem:[#allocation60_spill] sm:$0xff] }
 0x353   :  { %7602 = vmatprep.mubr.f32.mxu0 %v10127_v40  ;;  %7670 = vmatprep.mubr.f32.mxu1 %v11927_v16  ;;  %v11932_v40 = vld [vmem:[#allocation23_spill] sm:$0xff] }
 0x356   :  { %7603 = vmatmul.mubr.f32.gmra.mxu0 %v10108_v55  ;;  %7671 = vmatmul.mubr.f32.gmra.mxu1 %v11928_v56  ;;  %v11933_v55 = vld [vmem:[#allocation35_spill] sm:$0xff] }
 0x357   :  { %7605 = vmatprep.mubr.f32.mxu0 %v10157_v57  ;;  %7673 = vmatprep.mubr.f32.mxu1 %v11929_v8  ;;  %v11934_v57 = vld [vmem:[#allocation6_spill] sm:$0xff] }
 0x35a   :  { %7606 = vmatmul.mubr.f32.gmra.mxu0 %v11922_v20  ;;  %7674 = vmatmul.mubr.f32.gmra.mxu1 %v11930_v6 }
 0x35b   :  { %7608 = vmatprep.mubr.f32.mxu0 %v11923_v52  ;;  %7676 = vmatprep.mubr.f32.mxu1 %v11931_v63 }
 0x35e   :  { %7609 = vmatmul.mubr.f32.gmra.mxu0 %v11924_v19  ;;  %7677 = vmatmul.mubr.f32.gmra.mxu1 %v11932_v40 }
 0x35f   :  { %7611 = vmatprep.mubr.f32.mxu0 %v11925_v22  ;;  %7679 = vmatprep.mubr.f32.mxu1 %v10326_v24 }
 0x362   :  { %7612 = vmatmul.mubr.f32.gmra.mxu0 %v11926_v36  ;;  %7680 = vmatmul.mubr.f32.gmra.mxu1 %v11933_v55 }
 0x363   :  { %7614 = vmatprep.mubr.f32.mxu0 %v11927_v16  ;;  %7682 = vmatprep.mubr.f32.mxu1 %v11934_v57 }
 0x366   :  { %7615 = vmatmul.mubr.f32.gmra.mxu0 %v11928_v56  ;;  %7683 = vmatmul.mubr.f32.gmra.mxu1 %v11935_v12 }
 0x367   :  { %7617 = vmatprep.mubr.f32.mxu0 %v11929_v8  ;;  %7685 = vmatprep.mubr.f32.mxu1 %v10378_v4 }
 0x36a   :  { %7618 = vmatmul.mubr.f32.gmra.mxu0 %v11930_v6  ;;  %7686 = vmatmul.mubr.f32.gmra.mxu1 %v11936_v0 }
 0x36b   :  { %7620 = vmatprep.mubr.f32.mxu0 %v11931_v63  ;;  %7688 = vmatprep.mubr.f32.mxu1 %v10407_v3 }
 0x36e   :  { %7621 = vmatmul.mubr.f32.gmra.mxu0 %v11932_v40  ;;  %7689 = vmatmul.mubr.f32.gmra.mxu1 %v11937_v11 }
 0x36f   :  { %7623 = vmatprep.mubr.f32.mxu0 %v10326_v24  ;;  %7691 = vmatprep.mubr.f32.mxu1 %v10430_v29  ;;  %v11939_v24 = vld [vmem:[#allocation17_spill] sm:$0xff] }
 0x372   :  { %7624 = vmatmul.mubr.f32.gmra.mxu0 %v11933_v55  ;;  %7692 = vmatmul.mubr.f32.gmra.mxu1 %v10428_v49 }
 0x373   :  { %7626 = vmatprep.mubr.f32.mxu0 %v11934_v57  ;;  %7694 = vmatprep.mubr.f32.mxu1 %v10455_v27 }
 0x376   :  { %7627 = vmatmul.mubr.f32.gmra.mxu0 %v11935_v12  ;;  %7695 = vmatmul.mubr.f32.gmra.mxu1 %v10441_v41 }
 0x377   :  { %7629 = vmatprep.mubr.f32.mxu0 %v10378_v4  ;;  %7697 = vmatprep.mubr.f32.mxu1 %v11938_v62 }
 0x37a   :  { %7630 = vmatmul.mubr.f32.gmra.mxu0 %v11936_v0  ;;  %7698 = vmatmul.mubr.f32.gmra.mxu1 %v10471_v60 }
 0x37b   :  { %7632 = vmatprep.mubr.f32.mxu0 %v10407_v3  ;;  %7700 = vmatprep.mubr.f32.mxu1 %v10508_v43  ;;  %v10716_v3 = vld [vmem:[%s11213_s1 + $0x7a] ss:$0 sm:$0xff] }
 0x37e   :  { %7633 = vmatmul.mubr.f32.gmra.mxu0 %v11937_v11  ;;  %7701 = vmatmul.mubr.f32.gmra.mxu1 %v11939_v24  ;;  %v7433_v61 = vpop.f32.mrf.mxu1 }
 0x37f   :  { %7635 = vmatprep.mubr.f32.mxu0 %v10430_v29 }
 0x380   :  { %v4579_v18 = vpop.f32.mrf.mxu1 }
 0x382   :  { %7636 = vmatmul.mubr.f32.gmra.mxu0 %v10428_v49  ;;  %v7436_v4 = vpop.f32.mrf.mxu1 }
 0x383   :  { %7638 = vmatprep.mubr.f32.mxu0 %v10455_v27 }
 0x384   :  { %v4591_v9 = vpop.f32.mrf.mxu1 }
 0x386   :  { %7639 = vmatmul.mubr.f32.gmra.mxu0 %v10441_v41  ;;  %v7377_v44 = vpop.f32.mrf.mxu0  ;;  %v7439_v39 = vpop.f32.mrf.mxu1 }
 0x387   :  { %7641 = vmatprep.mubr.f32.mxu0 %v11938_v62  ;;  %v4189_v29 = vadd.f32 %v7377_v44, %v10716_v3 }
 0x388   :  { %v4178_v26 = vpop.f32.mrf.mxu0  ;;  %v4603_v30 = vpop.f32.mrf.mxu1 }
 0x389   :  { %v4179_v49 = vadd.f32 %v10716_v3, %v4178_v26  ;;  %v10722_v59 = vadd.f32 %v7433_v61, %v4189_v29 }
 0x38a   :  { %7642 = vmatmul.mubr.f32.gmra.mxu0 %v10471_v60  ;;  %v7442_v27 = vpop.f32.mrf.mxu1 }
 0x38b   :  { %7644 = vmatprep.mubr.f32.mxu0 %v10508_v43  ;;  %v7380_v2 = vpop.f32.mrf.mxu0  ;;  %v10726_v14 = vadd.f32 %v4579_v18, %v4179_v49 }
 0x38c   :  { %v4209_v41 = vadd.f32 %v7380_v2, %v10716_v3  ;;  %v4615_v54 = vpop.f32.mrf.mxu1 }
 0x38d   :  { %v4198_v7 = vpop.f32.mrf.mxu0 }
 0x38e   :  { %7645 = vmatmul.mubr.f32.gmra.mxu0 %v11939_v24  ;;  %v4199_v46 = vadd.f32 %v10716_v3, %v4198_v7  ;;  %v7445_v17 = vpop.f32.mrf.mxu1  ;;  %v10731_v47 = vadd.f32 %v7436_v4, %v4209_v41 }
 0x390   :  { %v4627_v10 = vpop.f32.mrf.mxu1  ;;  %v10733_v48 = vadd.f32 %v4591_v9, %v4199_v46 }
 0x393   :  { %v7383_v60 = vpop.f32.mrf.mxu0  ;;  %v7448_v1 = vpop.f32.mrf.mxu1 }
 0x394   :  { %v4229_v43 = vadd.f32 %v7383_v60, %v10716_v3 }
 0x395   :  { %v4218_v33 = vpop.f32.mrf.mxu0  ;;  %v4639_v38 = vpop.f32.mrf.mxu1 }
 0x396   :  { %v4219_v13 = vadd.f32 %v10716_v3, %v4218_v33  ;;  %v10737_v21 = vadd.f32 %v7439_v39, %v4229_v43 }
 0x397   :  { %v7451_v23 = vpop.f32.mrf.mxu1 }
 0x398   :  { %v10739_v53 = vadd.f32 %v4603_v30, %v4219_v13  ;;  %v7386_v25 = vpop.f32.mrf.mxu0 }
 0x399   :  { %v4249_v58 = vadd.f32 %v7386_v25, %v10716_v3  ;;  %v4651_v45 = vpop.f32.mrf.mxu1 }
 0x39a   :  { %v4238_v35 = vpop.f32.mrf.mxu0 }
 0x39b   :  { %v4239_v32 = vadd.f32 %v10716_v3, %v4238_v35  ;;  %v7454_v31 = vpop.f32.mrf.mxu1  ;;  %v10743_v51 = vadd.f32 %v7442_v27, %v4249_v58 }
 0x39d   :  { %v4663_v50 = vpop.f32.mrf.mxu1  ;;  %v10745_v15 = vadd.f32 %v4615_v54, %v4239_v32 }
 0x39e   :  { %v7389_v5 = vpop.f32.mrf.mxu0 }
 0x39f   :  { %v4269_v37 = vadd.f32 %v7389_v5, %v10716_v3  ;;  %v7457_v34 = vpop.f32.mrf.mxu1 }
 0x3a0   :  { %v4258_v42 = vpop.f32.mrf.mxu0 }
 0x3a1   :  { %v4259_v28 = vadd.f32 %v10716_v3, %v4258_v42  ;;  %v4675_v20 = vpop.f32.mrf.mxu1  ;;  %v10749_v52 = vadd.f32 %v7445_v17, %v4269_v37 }
 0x3a2   :  { %v7392_v19 = vpop.f32.mrf.mxu0 }
 0x3a3   :  { %v7460_v22 = vpop.f32.mrf.mxu1  ;;  %v10751_v36 = vadd.f32 %v4627_v10, %v4259_v28  ;;  %v4289_v16 = vadd.f32 %v7392_v19, %v10716_v3 }
 0x3a4   :  { %v4278_v56 = vpop.f32.mrf.mxu0 }
 0x3a5   :  { %v4687_v8 = vpop.f32.mrf.mxu1  ;;  %v4279_v6 = vadd.f32 %v10716_v3, %v4278_v56  ;;  %v10755_v63 = vadd.f32 %v7448_v1, %v4289_v16 }
 0x3a7   :  { %v7395_v40 = vpop.f32.mrf.mxu0  ;;  %v7463_v55 = vpop.f32.mrf.mxu1  ;;  %v10757_v57 = vadd.f32 %v4639_v38, %v4279_v6 }
 0x3a8   :  { %v4309_v12 = vadd.f32 %v7395_v40, %v10716_v3 }
 0x3a9   :  { %v4298_v0 = vpop.f32.mrf.mxu0  ;;  %v4699_v11 = vpop.f32.mrf.mxu1 }
 0x3aa   :  { %v4299_v62 = vadd.f32 %v10716_v3, %v4298_v0  ;;  %v10761_v24 = vadd.f32 %v7451_v23, %v4309_v12 }
 0x3ac   :  { %v7398_v61 = vpop.f32.mrf.mxu0  ;;  %v7466_v18 = vpop.f32.mrf.mxu1  ;;  %v10763_v4 = vadd.f32 %v4651_v45, %v4299_v62 }
 0x3ad   :  { %v4329_v9 = vadd.f32 %v7398_v61, %v10716_v3 }
 0x3ae   :  { %v4318_v44 = vpop.f32.mrf.mxu0  ;;  %v4711_v39 = vpop.f32.mrf.mxu1 }
 0x3af   :  { %v4319_v29 = vadd.f32 %v10716_v3, %v4318_v44  ;;  %v10767_v26 = vadd.f32 %v7454_v31, %v4329_v9 }
 0x3b0   :  { %v7401_v30 = vpop.f32.mrf.mxu0  ;;  %v7469_v49 = vpop.f32.mrf.mxu1 }
 0x3b1   :  { %v4349_v27 = vadd.f32 %v7401_v30, %v10716_v3  ;;  %v10770_v2 = vadd.f32 %v4663_v50, %v4319_v29 }
 0x3b2   :  { %v4338_v41 = vpop.f32.mrf.mxu0  ;;  %v4723_v54 = vpop.f32.mrf.mxu1 }
 0x3b3   :  { %v4339_v7 = vadd.f32 %v10716_v3, %v4338_v41  ;;  %v10773_v46 = vadd.f32 %v7457_v34, %v4349_v27 }
 0x3b5   :  { %11940 = vst [vmem:[#allocation9_spill] sm:$0xff] %v10773_v46  ;;  %v7404_v17 = vpop.f32.mrf.mxu0  ;;  %v7472_v10 = vpop.f32.mrf.mxu1  ;;  %v10775_v60 = vadd.f32 %v4675_v20, %v4339_v7 }
 0x3b6   :  { %v4369_v43 = vadd.f32 %v7404_v17, %v10716_v3 }
 0x3b7   :  { %11941 = vst [vmem:[#allocation26_spill] sm:$0xff] %v10775_v60  ;;  %v4358_v1 = vpop.f32.mrf.mxu0  ;;  %v4735_v33 = vpop.f32.mrf.mxu1 }
 0x3b8   :  { %v4359_v13 = vadd.f32 %v10716_v3, %v4358_v1  ;;  %v10779_v38 = vadd.f32 %v7460_v22, %v4369_v43 }
 0x3b9   :  { %v7475_v23 = vpop.f32.mrf.mxu1 }
 0x3ba   :  { %11942 = vst [vmem:[#allocation64_spill] sm:$0xff] %v10779_v38  ;;  %v7407_v25 = vpop.f32.mrf.mxu0  ;;  %v10781_v58 = vadd.f32 %v4687_v8, %v4359_v13 }
 0x3bb   :  { %v4389_v45 = vadd.f32 %v7407_v25, %v10716_v3  ;;  %v4747_v35 = vpop.f32.mrf.mxu1 }
 0x3bc   :  { %11943 = vst [vmem:[#allocation38_spill] sm:$0xff] %v10781_v58  ;;  %v4378_v32 = vpop.f32.mrf.mxu0 }
 0x3bd   :  { %v4379_v31 = vadd.f32 %v10716_v3, %v4378_v32  ;;  %v10785_v50 = vadd.f32 %v7463_v55, %v4389_v45 }
 0x3be   :  { %v7410_v5 = vpop.f32.mrf.mxu0  ;;  %v7478_v37 = vpop.f32.mrf.mxu1 }
 0x3bf   :  { %11944 = vst [vmem:[#allocation12_spill] sm:$0xff] %v10785_v50  ;;  %v4409_v34 = vadd.f32 %v7410_v5, %v10716_v3  ;;  %v10788_v42 = vadd.f32 %v4699_v11, %v4379_v31 }
 0x3c0   :  { %v4398_v28 = vpop.f32.mrf.mxu0  ;;  %v4759_v20 = vpop.f32.mrf.mxu1 }
 0x3c1   :  { %11945 = vst [vmem:[#allocation39_spill] sm:$0xff] %v10788_v42  ;;  %v4399_v19 = vadd.f32 %v10716_v3, %v4398_v28  ;;  %v10791_v22 = vadd.f32 %v7466_v18, %v4409_v34 }
 0x3c2   :  { %v7413_v16 = vpop.f32.mrf.mxu0  ;;  %v10793_v56 = vpop.f32.mrf.mxu1 }
 0x3c3   :  { %11946 = vst [vmem:[#allocation2_spill] sm:$0xff] %v10791_v22  ;;  %v4429_v8 = vadd.f32 %v7413_v16, %v10716_v3  ;;  %v10796_v6 = vadd.f32 %v4711_v39, %v4399_v19 }
 0x3c4   :  { %v4418_v40 = vpop.f32.mrf.mxu0  ;;  %v10798_v55 = vpop.f32.mrf.mxu1 }
 0x3c5   :  { %11947 = vst [vmem:[#allocation41_spill] sm:$0xff] %v10796_v6  ;;  %v4419_v12 = vadd.f32 %v10716_v3, %v4418_v40  ;;  %v10801_v0 = vadd.f32 %v7469_v49, %v4429_v8 }
 0x3c6   :  { %v7416_v11 = vpop.f32.mrf.mxu0  ;;  %v10803_v62 = vpop.f32.mrf.mxu1 }
 0x3c7   :  { %11948 = vst [vmem:[#allocation15_spill] sm:$0xff] %v10801_v0  ;;  %v4449_v61 = vadd.f32 %v7416_v11, %v10716_v3  ;;  %v10806_v18 = vadd.f32 %v4723_v54, %v4419_v12 }
 0x3c8   :  { %v4438_v9 = vpop.f32.mrf.mxu0  ;;  %v10808_v44 = vpop.f32.mrf.mxu1 }
 0x3c9   :  { %11949 = vst [vmem:[#allocation19_spill] sm:$0xff] %v10806_v18  ;;  %v4439_v39 = vadd.f32 %v10716_v3, %v4438_v9  ;;  %v10811_v29 = vadd.f32 %v7472_v10, %v4449_v61 }
 0x3ca   :  { %v7419_v30 = vpop.f32.mrf.mxu0  ;;  %v10813_v27 = vpop.f32.mrf.mxu1 }
 0x3cb   :  { %11950 = vst [vmem:[#allocation43_spill] sm:$0xff] %v10811_v29  ;;  %v4469_v49 = vadd.f32 %v7419_v30, %v10716_v3  ;;  %v10816_v41 = vadd.f32 %v4735_v33, %v4439_v39 }
 0x3cc   :  { %v4458_v7 = vpop.f32.mrf.mxu0  ;;  %v10818_v17 = vpop.f32.mrf.mxu1 }
 0x3cd   :  { %11951 = vst [vmem:[#allocation21_spill] sm:$0xff] %v10816_v41  ;;  %v4459_v54 = vadd.f32 %v10716_v3, %v4458_v7  ;;  %v10821_v43 = vadd.f32 %v7475_v23, %v4469_v49 }
 0x3ce   :  { %v7422_v1 = vpop.f32.mrf.mxu0  ;;  %v10823_v13 = vpop.f32.mrf.mxu1 }
 0x3cf   :  { %11952 = vst [vmem:[#allocation22_spill] sm:$0xff] %v10821_v43  ;;  %v4489_v10 = vadd.f32 %v7422_v1, %v10716_v3  ;;  %v10826_v25 = vadd.f32 %v4747_v35, %v4459_v54 }
 0x3d0   :  { %v4478_v45 = vpop.f32.mrf.mxu0  ;;  %v10828_v32 = vpop.f32.mrf.mxu1 }
 0x3d1   :  { %11953 = vst [vmem:[#allocation5_spill] sm:$0xff] %v10826_v25  ;;  %v4479_v33 = vadd.f32 %v10716_v3, %v4478_v45  ;;  %v10831_v31 = vadd.f32 %v7478_v37, %v4489_v10 }
 0x3d2   :  { %v7489_v5 = vpop.f32.mrf.mxu0  ;;  %v10833_v34 = vpop.f32.mrf.mxu1 }
 0x3d3   :  { %11954 = vst [vmem:[#allocation45_spill] sm:$0xff] %v10831_v31  ;;  %v10835_v28 = vadd.f32 %v4759_v20, %v4479_v33 }
 0x3d4   :  { %v4845_v23 = vpop.f32.mrf.mxu0  ;;  %v10837_v19 = vpop.f32.mrf.mxu1 }
 0x3d5   :  { %11955 = vst [vmem:[#allocation42_spill] sm:$0xff] %v10835_v28 }
 0x3d6   :  { %v7492_v16 = vpop.f32.mrf.mxu0  ;;  %v10839_v8 = vpop.f32.mrf.mxu1 }
 0x3d8   :  { %v10841_v35 = vpop.f32.mrf.mxu0  ;;  %v10843_v40 = vpop.f32.mrf.mxu1 }
 0x3da   :  { %v10845_v12 = vpop.f32.mrf.mxu0  ;;  %v10847_v3 = vpop.f32.mrf.mxu1 }
 0x3dc   :  { %v10849_v37 = vpop.f32.mrf.mxu0  ;;  %v10851_v11 = vpop.f32.mrf.mxu1 }
 0x3de   :  { %v10853_v20 = vpop.f32.mrf.mxu0  ;;  %v10855_v61 = vpop.f32.mrf.mxu1 }
 0x3df   :  { %11956 = vst [vmem:[#allocation24_spill] sm:$0xff] %v10855_v61 }
 0x3e0   :  { %v10857_v9 = vpop.f32.mrf.mxu0  ;;  %v10859_v39 = vpop.f32.mrf.mxu1 }
 0x3e1   :  { %11957 = vst [vmem:[#allocation63_spill] sm:$0xff] %v10859_v39 }
 0x3e2   :  { %v10861_v30 = vpop.f32.mrf.mxu0  ;;  %v10863_v49 = vpop.f32.mrf.mxu1 }
 0x3e3   :  { %11958 = vst [vmem:[#allocation4_spill] sm:$0xff] %v10863_v49 }
 0x3e4   :  { %v10865_v7 = vpop.f32.mrf.mxu0  ;;  %v10867_v54 = vpop.f32.mrf.mxu1 }
 0x3e5   :  { %11959 = vst [vmem:[#allocation7_spill] sm:$0xff] %v10867_v54 }
 0x3e6   :  { %v10869_v1 = vpop.f32.mrf.mxu0  ;;  %v10871_v10 = vpop.f32.mrf.mxu1 }
 0x3e7   :  { %11960 = vst [vmem:[#allocation13_spill] sm:$0xff] %v10871_v10 }
 0x3e8   :  { %v10873_v45 = vpop.f32.mrf.mxu0  ;;  %v10875_v33 = vpop.f32.mrf.mxu1 }
 0x3e9   :  { %11961 = vst [vmem:[#allocation20_spill] sm:$0xff] %v10875_v33 }
 0x3ea   :  { %v10877_v28 = vpop.f32.mrf.mxu0  ;;  %v10879_v31 = vpop.f32.mrf.mxu1 }
 0x3eb   :  { %11962 = vst [vmem:[#allocation25_spill] sm:$0xff] %v10879_v31 }
 0x3ec   :  { %v10881_v25 = vpop.f32.mrf.mxu0  ;;  %v10883_v43 = vpop.f32.mrf.mxu1 }
 0x3ed   :  { %11963 = vst [vmem:[#allocation32_spill] sm:$0xff] %v10883_v43 }
 0x3ee   :  { %v10885_v41 = vpop.f32.mrf.mxu0  ;;  %v10887_v29 = vpop.f32.mrf.mxu1 }
 0x3ef   :  { %11964 = vst [vmem:[#allocation34_spill] sm:$0xff] %v10887_v29 }
 0x3f0   :  { %v10889_v18 = vpop.f32.mrf.mxu0  ;;  %v10891_v0 = vpop.f32.mrf.mxu1 }
 0x3f1   :  { %11965 = vst [vmem:[#allocation36_spill] sm:$0xff] %v10891_v0 }
 0x3f2   :  { %v10893_v6 = vpop.f32.mrf.mxu0  ;;  %v10895_v22 = vpop.f32.mrf.mxu1 }
 0x3f3   :  { %11966 = vst [vmem:[#allocation40_spill] sm:$0xff] %v10893_v6  ;;  %11967 = vst [vmem:[#allocation27_spill] sm:$0xff] %v10895_v22 }
 0x3f4   :  { %v10897_v33 = vpop.f32.mrf.mxu0  ;;  %v10899_v42 = vpop.f32.mrf.mxu1 }
 0x3f5   :  { %11968 = vst [vmem:[#allocation47_spill] sm:$0xff] %v10897_v33  ;;  %11969 = vst [vmem:[#allocation28_spill] sm:$0xff] %v10899_v42 }
 0x3f6   :  { %v10901_v31 = vpop.f32.mrf.mxu0  ;;  %v10903_v10 = vpop.f32.mrf.mxu1 }
 0x3f7   :  { %11970 = vst [vmem:[#allocation48_spill] sm:$0xff] %v10901_v31  ;;  %11971 = vst [vmem:[#allocation52_spill] sm:$0xff] %v10903_v10 }
 0x3f8   :  { %v10905_v43 = vpop.f32.mrf.mxu0  ;;  %v10907_v50 = vpop.f32.mrf.mxu1 }
 0x3f9   :  { %11972 = vst [vmem:[#allocation54_spill] sm:$0xff] %v10905_v43  ;;  %11973 = vst [vmem:[#allocation31_spill] sm:$0xff] %v10907_v50 }
 0x3fa   :  { %v10909_v29 = vpop.f32.mrf.mxu0  ;;  %v10911_v58 = vpop.f32.mrf.mxu1 }
 0x3fb   :  { %11974 = vst [vmem:[#allocation50_spill] sm:$0xff] %v10909_v29  ;;  %11975 = vst [vmem:[#allocation30_spill] sm:$0xff] %v10911_v58 }
 0x3fc   :  { %v10913_v0 = vpop.f32.mrf.mxu0  ;;  %v10915_v54 = vpop.f32.mrf.mxu1 }
 0x3fd   :  { %11976 = vst [vmem:[#allocation44_spill] sm:$0xff] %v10913_v0  ;;  %11977 = vst [vmem:[#allocation57_spill] sm:$0xff] %v10915_v54 }
 0x3fe   :  { %v10917_v22 = vpop.f32.mrf.mxu0  ;;  %v10919_v38 = vpop.f32.mrf.mxu1 }
 0x3ff   :  { %11978 = vst [vmem:[#allocation59_spill] sm:$0xff] %v10917_v22  ;;  %11979 = vst [vmem:[#allocation53_spill] sm:$0xff] %v10919_v38 }
 0x400   :  { %v10921_v42 = vpop.f32.mrf.mxu0  ;;  %v10923_v31 = vpop.f32.mrf.mxu1 }
 0x401   :  { %11980 = vst [vmem:[#allocation46_spill] sm:$0xff] %v10921_v42  ;;  %11981 = vst [vmem:[#allocation29_spill] sm:$0xff] %v10923_v31  ;;  %v4853_v31 = vadd.f32 %v7489_v5, %v10722_v59 }
 0x402   :  { %v10925_v10 = vpop.f32.mrf.mxu0  ;;  %v7657_v43 = vpop.f32.mrf.mxu1 }
 0x403   :  { %11982 = vst [vmem:[#allocation55_spill] sm:$0xff] %v10925_v10  ;;  %v5148_v61 = vadd.f32 %v10793_v56, %v4853_v31  ;;  %v4874_v56 = vadd.f32 %v10849_v37, %v10739_v53 }
 0x404   :  { %v10927_v50 = vpop.f32.mrf.mxu0  ;;  %v5731_v29 = vpop.f32.mrf.mxu1 }
 0x405   :  { %11983 = vst [vmem:[#allocation56_spill] sm:$0xff] %v10927_v50  ;;  %v4846_v50 = vadd.f32 %v4845_v23, %v10726_v14  ;;  %v4881_v14 = vadd.f32 %v10845_v12, %v10737_v21  ;;  %v5172_v37 = vadd.f32 %v10818_v17, %v4874_v56  ;;  %v4902_v17 = vadd.f32 %v10865_v7, %v10751_v36 }
 0x406   :  { %v10929_v49 = vpop.f32.mrf.mxu0  ;;  %v7660_v58 = vpop.f32.mrf.mxu1  ;;  %v4930_v56 = vadd.f32 %v10881_v25, %v10763_v4  ;;  %v4951_v4 = vadd.f32 %v10885_v41, %v10767_v26 }
 0x407   :  { %11984 = vst [vmem:[#allocation58_spill] sm:$0xff] %v10929_v49  ;;  %v5140_v5 = vadd.f32 %v10798_v55, %v4846_v50  ;;  %v5180_v21 = vadd.f32 %v10813_v27, %v4881_v14  ;;  %v5204_v7 = vadd.f32 %v10837_v19, %v4902_v17 }
 0x408   :  { %v10931_v0 = vpop.f32.mrf.mxu0  ;;  %v5743_v54 = vpop.f32.mrf.mxu1 }
 0x409   :  { %11985 = vst [vmem:[#allocation49_spill] sm:$0xff] %v10931_v0  ;;  %v4867_v0 = vadd.f32 %v7492_v16, %v10731_v47 }
 0x40a   :  { %v10933_v39 = vpop.f32.mrf.mxu0  ;;  %v7663_v22 = vpop.f32.mrf.mxu1 }
 0x40b   :  { %11986 = vst [vmem:[#allocation8_spill] sm:$0xff] %v10933_v39  ;;  %v5164_v47 = vadd.f32 %v10803_v62, %v4867_v0 }
 0x40c   :  { %v10935_v38 = vpop.f32.mrf.mxu0  ;;  %v5755_v42 = vpop.f32.mrf.mxu1 }
 0x40d   :  { %11987 = vst [vmem:[#allocation51_spill] sm:$0xff] %v10935_v38  ;;  %v4860_v38 = vadd.f32 %v10841_v35, %v10733_v48 }
 0x40e   :  { %v10938_v33 = vpop.f32.mrf.mxu0  ;;  %v7666_v10 = vpop.f32.mrf.mxu1 }
 0x40f   :  { %11988 = vst [vmem:[#allocation10_spill] sm:$0xff] %v10938_v33  ;;  %v5156_v50 = vadd.f32 %v10808_v44, %v4860_v38 }
 0x410   :  { %v10941_v60 = vpop.f32.mrf.mxu0  ;;  %v10943_v49 = vpop.f32.mrf.mxu1 }
 0x411   :  { %11989 = vst [vmem:[#allocation11_spill] sm:$0xff] %v10941_v60 }
 0x412   :  { %v7601_v39 = vpop.f32.mrf.mxu0  ;;  %v10947_v6 = vpop.f32.mrf.mxu1 }
 0x413   :  { %v5477_v59 = vadd.f32 %v7601_v39, %v5148_v61 }
 0x414   :  { %v5470_v23 = vpop.f32.mrf.mxu0  ;;  %v10954_v60 = vpop.f32.mrf.mxu1 }
 0x415   :  { %v5738_v33 = vadd.f32 %v7657_v43, %v5477_v59  ;;  %v5471_v46 = vadd.f32 %v5470_v23, %v5140_v5  ;;  %v4895_v43 = vadd.f32 %v10853_v20, %v10743_v51 }
 0x416   :  { %v7604_v31 = vpop.f32.mrf.mxu0  ;;  %v10959_v16 = vpop.f32.mrf.mxu1 }
 0x417   :  { %7703 = vtanh.f32 %v5738_v33  ;;  %v5732_v48 = vadd.f32 %v5731_v29, %v5471_v46  ;;  %v5489_v35 = vadd.f32 %v7604_v31, %v5164_v47  ;;  %v4888_v46 = vadd.f32 %v10857_v9, %v10745_v15 }
 0x418   :  { %v5482_v55 = vpop.f32.mrf.mxu0  ;;  %v10963_v12 = vpop.f32.mrf.mxu1  ;;  %v4909_v29 = vadd.f32 %v10861_v30, %v10749_v52  ;;  %v5196_v20 = vadd.f32 %v10823_v13, %v4895_v43  ;;  %v5236_v43 = vadd.f32 %v10851_v11, %v4930_v56  ;;  %v12003_v56 = vld [vmem:[#allocation50_spill] sm:$0xff] }
 0x419   :  { %7705 = vtanh.f32 %v5732_v48  ;;  %v5750_v0 = vadd.f32 %v7660_v58, %v5489_v35  ;;  %v5483_v62 = vadd.f32 %v5482_v55, %v5156_v50 }
 0x41a   :  { %v7607_v53 = vpop.f32.mrf.mxu0  ;;  %v10968_v61 = vpop.f32.mrf.mxu1  ;;  %v5212_v30 = vadd.f32 %v10833_v34, %v4909_v29  ;;  %v11993_v29 = vld [vmem:[#allocation26_spill] sm:$0xff] }
 0x41b   :  { %7707 = vtanh.f32 %v5750_v0  ;;  %v5744_v38 = vadd.f32 %v5743_v54, %v5483_v62  ;;  %v5501_v44 = vadd.f32 %v7607_v53, %v5180_v21  ;;  %v5188_v54 = vadd.f32 %v10828_v32, %v4888_v46  ;;  %v11990_v62 = vld [vmem:[#allocation9_spill] sm:$0xff]  ;;  %v11991_v53 = vld [vmem:[#allocation40_spill] sm:$0xff] }
 0x41c   :  { %v5494_v27 = vpop.f32.mrf.mxu0  ;;  %v10974_v39 = vpop.f32.mrf.mxu1 }
 0x41d   :  { %7709 = vtanh.f32 %v5744_v38  ;;  %v5762_v51 = vadd.f32 %v7663_v22, %v5501_v44  ;;  %v5495_v58 = vadd.f32 %v5494_v27, %v5172_v37  ;;  %v4923_v22 = vadd.f32 %v10869_v1, %v10755_v63  ;;  %v11992_v38 = vld [vmem:[#allocation24_spill] sm:$0xff]  ;;  %v11994_v27 = vld [vmem:[#allocation47_spill] sm:$0xff] }
 0x41e   :  { %v7610_v33 = vpop.f32.mrf.mxu0  ;;  %v10979_v59 = vpop.f32.mrf.mxu1  ;;  %v4937_v63 = vadd.f32 %v10877_v28, %v10761_v24  ;;  %v4965_v37 = vadd.f32 %v11991_v53, %v11990_v62  ;;  %v5260_v44 = vadd.f32 %v11992_v38, %v4951_v4  ;;  %v12005_v4 = vld [vmem:[#allocation39_spill] sm:$0xff]  ;;  %v12009_v53 = vld [vmem:[#allocation2_spill] sm:$0xff] }
 0x41f   :  { %7711 = vtanh.f32 %v5762_v51  ;;  %v5756_v15 = vadd.f32 %v5755_v42, %v5495_v58  ;;  %v5513_v9 = vadd.f32 %v7610_v33, %v5196_v20  ;;  %v4916_v42 = vadd.f32 %v10873_v45, %v10757_v57 }
 0x420   :  { %v5506_v52 = vpop.f32.mrf.mxu0  ;;  %v10983_v5 = vpop.f32.mrf.mxu1  ;;  %v5228_v45 = vadd.f32 %v10839_v8, %v4923_v22  ;;  %v5244_v50 = vadd.f32 %v10847_v3, %v4937_v63  ;;  %v4944_v3 = vadd.f32 %v10889_v18, %v10770_v2  ;;  %v4958_v51 = vadd.f32 %v11994_v27, %v11993_v29  ;;  %v11997_v22 = vld [vmem:[#allocation64_spill] sm:$0xff]  ;;  %v12000_v63 = vld [vmem:[#allocation38_spill] sm:$0xff]  ;;  %v12012_v27 = vld [vmem:[#allocation41_spill] sm:$0xff] }
 0x421   :  { %7713 = vtanh.f32 %v5756_v15  ;;  %v5774_v13 = vadd.f32 %v7666_v10, %v5513_v9  ;;  %v5507_v14 = vadd.f32 %v5506_v52, %v5188_v54  ;;  %v11996_v52 = vld [vmem:[#allocation4_spill] sm:$0xff] }
 0x422   :  { %v7613_v36 = vpop.f32.mrf.mxu0  ;;  %v10988_v23 = vpop.f32.mrf.mxu1 }
 0x423   :  { %7715 = vtanh.f32 %v5774_v13  ;;  %v5768_v32 = vadd.f32 %v10943_v49, %v5507_v14  ;;  %v5525_v34 = vadd.f32 %v7613_v36, %v5212_v30  ;;  %v5276_v30 = vadd.f32 %v11996_v52, %v4965_v37  ;;  %v11998_v13 = vld [vmem:[#allocation48_spill] sm:$0xff]  ;;  %v12010_v37 = vld [vmem:[#allocation59_spill] sm:$0xff] }
 0x424   :  { %v7704_v47 = vpop.eup %7703  ;;  %v5518_v1 = vpop.f32.mrf.mxu0  ;;  %v4979_v14 = vadd.f32 %v11998_v13, %v11997_v22  ;;  %v12016_v22 = vld [vmem:[#allocation34_spill] sm:$0xff] }
 0x425   :  { %v10995_v10 = vpop.f32.mrf.mxu1  ;;  %5955 = vst.msk [vmem:[%s11215_s2 + $0x8] sm:$0xff] %vm5953_vm3, %v7704_v47  ;;  %7717 = vtanh.f32 %v5768_v32  ;;  %v5786_v19 = vadd.f32 %v10947_v6, %v5525_v34  ;;  %v5519_v57 = vadd.f32 %v5518_v1, %v5204_v7  ;;  %v5220_v6 = vadd.f32 %v10843_v40, %v4916_v42  ;;  %v11999_v32 = vld [vmem:[#allocation7_spill] sm:$0xff]  ;;  %v12001_v1 = vld [vmem:[#allocation54_spill] sm:$0xff] }
 0x426   :  { %v7706_v49 = vpop.eup %7705  ;;  %v7616_v31 = vpop.f32.mrf.mxu0  ;;  %v5268_v34 = vadd.f32 %v11999_v32, %v4958_v51  ;;  %v12013_v51 = vld [vmem:[#allocation46_spill] sm:$0xff] }
 0x427   :  { %v11005_v24 = vpop.f32.mrf.mxu1  ;;  %5954 = vst.msk [vmem:[%s11215_s2] sm:$0xff] %vm5953_vm3, %v7706_v49  ;;  %7719 = vtanh.f32 %v5786_v19  ;;  %v5780_v28 = vadd.f32 %v10954_v60, %v5519_v57  ;;  %v5537_v48 = vadd.f32 %v7616_v31, %v5228_v45  ;;  %v4972_v19 = vadd.f32 %v12001_v1, %v12000_v63  ;;  %v12002_v49 = vld [vmem:[#allocation12_spill] sm:$0xff] }
 0x428   :  { %v7708_v35 = vpop.eup %7707  ;;  %v5530_v8 = vpop.f32.mrf.mxu0  ;;  %v4993_v31 = vadd.f32 %v12003_v56, %v12002_v49  ;;  %v12019_v63 = vld [vmem:[#allocation36_spill] sm:$0xff]  ;;  %v12022_v49 = vld [vmem:[#allocation58_spill] sm:$0xff] }
 0x429   :  { %v11014_v55 = vpop.f32.mrf.mxu1  ;;  %5957 = vst.msk [vmem:[%s11215_s2 + $0x18] sm:$0xff] %vm5953_vm3, %v7708_v35  ;;  %7721 = vtanh.f32 %v5780_v28  ;;  %v5798_v60 = vadd.f32 %v10959_v16, %v5537_v48  ;;  %v5531_v25 = vadd.f32 %v5530_v8, %v5220_v6  ;;  %v12004_v35 = vld [vmem:[#allocation13_spill] sm:$0xff] }
 0x42a   :  { %v7710_v21 = vpop.eup %7709  ;;  %v7619_v40 = vpop.f32.mrf.mxu0  ;;  %v5292_v8 = vadd.f32 %v12004_v35, %v4979_v14  ;;  %v12023_v35 = vld [vmem:[#allocation28_spill] sm:$0xff] }
 0x42b   :  { %v11024_v0 = vpop.f32.mrf.mxu1  ;;  %5956 = vst.msk [vmem:[%s11215_s2 + $0x10] sm:$0xff] %vm5953_vm3, %v7710_v21  ;;  %7723 = vtanh.f32 %v5798_v60  ;;  %v5792_v26 = vadd.f32 %v10963_v12, %v5531_v25  ;;  %v5549_v41 = vadd.f32 %v7619_v40, %v5244_v50 }
 0x42c   :  { %v7712_v16 = vpop.eup %7711  ;;  %v5542_v46 = vpop.f32.mrf.mxu0 }
 0x42d   :  { %v11035_v11 = vpop.f32.mrf.mxu1  ;;  %5959 = vst.msk [vmem:[%s11215_s2 + $0x28] sm:$0xff] %vm5953_vm3, %v7712_v16  ;;  %7725 = vtanh.f32 %v5792_v26  ;;  %v5810_v2 = vadd.f32 %v10968_v61, %v5549_v41  ;;  %v5543_v18 = vadd.f32 %v5542_v46, %v5236_v43  ;;  %v11995_v61 = vld [vmem:[#allocation63_spill] sm:$0xff]  ;;  %v12008_v16 = vld [vmem:[#allocation25_spill] sm:$0xff]  ;;  %v5007_v46 = vadd.f32 %v12010_v37, %v12009_v53 }
 0x42e   :  { %v7714_v12 = vpop.eup %7713  ;;  %v7622_v58 = vpop.f32.mrf.mxu0  ;;  %v5252_v15 = vadd.f32 %v11995_v61, %v4944_v3  ;;  %v12007_v3 = vld [vmem:[#allocation20_spill] sm:$0xff]  ;;  %v5308_v62 = vadd.f32 %v12008_v16, %v4993_v31  ;;  %v12029_v37 = vld [vmem:[#allocation5_spill] sm:$0xff] }
 0x42f   :  { %v11045_v20 = vpop.f32.mrf.mxu1  ;;  %5958 = vst.msk [vmem:[%s11215_s2 + $0x20] sm:$0xff] %vm5953_vm3, %v7714_v12  ;;  %7727 = vtanh.f32 %v5810_v2  ;;  %v5804_v17 = vadd.f32 %v10974_v39, %v5543_v18  ;;  %v5561_v33 = vadd.f32 %v7622_v58, %v5260_v44  ;;  %v12011_v44 = vld [vmem:[#allocation32_spill] sm:$0xff]  ;;  %v5000_v58 = vadd.f32 %v12013_v51, %v12012_v27  ;;  %v12032_v51 = vld [vmem:[#allocation30_spill] sm:$0xff] }
 0x430   :  { %v7716_v9 = vpop.eup %7715  ;;  %v5554_v54 = vpop.f32.mrf.mxu0  ;;  %v5324_v13 = vadd.f32 %v12016_v22, %v5007_v46  ;;  %v12028_v16 = vld [vmem:[#allocation52_spill] sm:$0xff]  ;;  %v12030_v46 = vld [vmem:[#allocation51_spill] sm:$0xff]  ;;  %v12036_v22 = vld [vmem:[#allocation42_spill] sm:$0xff] }
 0x431   :  { %5961 = vst.msk [vmem:[%s11215_s2 + $0x38] sm:$0xff] %vm5953_vm3, %v7716_v9  ;;  %7729 = vtanh.f32 %v5804_v17  ;;  %v5822_v36 = vadd.f32 %v10979_v59, %v5561_v33  ;;  %v5555_v7 = vadd.f32 %v5554_v54, %v5252_v15  ;;  %v11062_v47 = vpop.f32.mrf.mxu1  ;;  %v12015_v15 = vld [vmem:[#allocation55_spill] sm:$0xff] }
 0x432   :  { %v7718_v39 = vpop.eup %7717  ;;  %v7625_v42 = vpop.f32.mrf.mxu0 }
 0x433   :  { %5960 = vst.msk [vmem:[%s11215_s2 + $0x30] sm:$0xff] %vm5953_vm3, %v7718_v39  ;;  %7731 = vtanh.f32 %v5822_v36  ;;  %v5816_v57 = vadd.f32 %v10983_v5, %v5555_v7  ;;  %v5573_v45 = vadd.f32 %v7625_v42, %v5276_v30  ;;  %v12006_v5 = vld [vmem:[#allocation44_spill] sm:$0xff]  ;;  %v7693_v21 = vpop.f32.mrf.mxu1  ;;  %v12017_v36 = vld [vmem:[#allocation19_spill] sm:$0xff] }
 0x434   :  { %v7720_v59 = vpop.eup %7719  ;;  %v5566_v28 = vpop.f32.mrf.mxu0  ;;  %v4986_v60 = vadd.f32 %v12006_v5, %v12005_v4  ;;  %v12025_v4 = vld [vmem:[#allocation49_spill] sm:$0xff] }
 0x435   :  { %5963 = vst.msk [vmem:[%s11215_s2 + $0x48] sm:$0xff] %vm5953_vm3, %v7720_v59  ;;  %7733 = vtanh.f32 %v5816_v57  ;;  %v5834_v48 = vadd.f32 %v10988_v23, %v5573_v45  ;;  %v5567_v6 = vadd.f32 %v5566_v28, %v5268_v34  ;;  %v5284_v23 = vadd.f32 %v12007_v3, %v4972_v19  ;;  %v5875_v29 = vpop.f32.mrf.mxu1  ;;  %v12020_v57 = vld [vmem:[#allocation27_spill] sm:$0xff] }
 0x436   :  { %v7722_v50 = vpop.eup %7721  ;;  %v7628_v25 = vpop.f32.mrf.mxu0  ;;  %v5300_v12 = vadd.f32 %v12011_v44, %v4986_v60  ;;  %v12021_v59 = vld [vmem:[#allocation43_spill] sm:$0xff] }
 0x437   :  { %5962 = vst.msk [vmem:[%s11215_s2 + $0x40] sm:$0xff] %vm5953_vm3, %v7722_v50  ;;  %7735 = vtanh.f32 %v5834_v48  ;;  %v5828_v40 = vadd.f32 %v10995_v10, %v5567_v6  ;;  %v5585_v43 = vadd.f32 %v7628_v25, %v5292_v8  ;;  %v7696_v42 = vpop.f32.mrf.mxu1  ;;  %v5035_v56 = vadd.f32 %v12022_v49, %v12021_v59  ;;  %v12024_v50 = vld [vmem:[#allocation21_spill] sm:$0xff]  ;;  %v12031_v44 = vld [vmem:[#allocation31_spill] sm:$0xff] }
 0x438   :  { %v7724_v26 = vpop.eup %7723  ;;  %v5578_v41 = vpop.f32.mrf.mxu0  ;;  %v5028_v5 = vadd.f32 %v12025_v4, %v12024_v50  ;;  %v12039_v59 = vld [vmem:[#allocation29_spill] sm:$0xff] }
 0x439   :  { %5965 = vst.msk [vmem:[%s11215_s2 + $0x58] sm:$0xff] %vm5953_vm3, %v7724_v26  ;;  %7737 = vtanh.f32 %v5828_v40  ;;  %v5846_v2 = vadd.f32 %v11005_v24, %v5585_v43  ;;  %v5579_v18 = vadd.f32 %v5578_v41, %v5284_v23  ;;  %v12014_v24 = vld [vmem:[#allocation15_spill] sm:$0xff]  ;;  %v5887_v48 = vpop.f32.mrf.mxu1  ;;  %v12027_v43 = vld [vmem:[#allocation8_spill] sm:$0xff] }
 0x43a   :  { %v7726_v10 = vpop.eup %7725  ;;  %v7631_v38 = vpop.f32.mrf.mxu0  ;;  %v5021_v9 = vadd.f32 %v12015_v15, %v12014_v24 }
 0x43b   :  { %5964 = vst.msk [vmem:[%s11215_s2 + $0x50] sm:$0xff] %vm5953_vm3, %v7726_v10  ;;  %7739 = vtanh.f32 %v5846_v2  ;;  %v5840_v17 = vadd.f32 %v11014_v55, %v5579_v18  ;;  %v5597_v33 = vadd.f32 %v7631_v38, %v5308_v62  ;;  %v12018_v55 = vld [vmem:[#allocation56_spill] sm:$0xff]  ;;  %v5356_v62 = vadd.f32 %v12028_v16, %v5035_v56  ;;  %v7699_v2 = vpop.f32.mrf.mxu1 }
 0x43c   :  { %v7728_v61 = vpop.eup %7727  ;;  %v5590_v54 = vpop.f32.mrf.mxu0  ;;  %v5014_v7 = vadd.f32 %v12018_v55, %v12017_v36  ;;  %v5340_v45 = vadd.f32 %v12020_v57, %v5021_v9 }
 0x43d   :  { %5967 = vst.msk [vmem:[%s11215_s2 + $0x68] sm:$0xff] %vm5953_vm3, %v7728_v61  ;;  %7741 = vtanh.f32 %v5840_v17  ;;  %v5858_v52 = vadd.f32 %v11024_v0, %v5597_v33  ;;  %v5591_v30 = vadd.f32 %v5590_v54, %v5300_v12  ;;  %v5316_v0 = vadd.f32 %v12019_v63, %v5000_v58  ;;  %v12033_v17 = vld [vmem:[#allocation45_spill] sm:$0xff]  ;;  %v12034_v33 = vld [vmem:[#allocation10_spill] sm:$0xff] }
 0x43e   :  { %v7730_v14 = vpop.eup %7729  ;;  %v7634_v39 = vpop.f32.mrf.mxu0  ;;  %v5332_v8 = vadd.f32 %v12023_v35, %v5014_v7  ;;  %v5348_v12 = vadd.f32 %v12031_v44, %v5028_v5  ;;  %v5063_v61 = vadd.f32 %v12034_v33, %v12033_v17 }
 0x43f   :  { %5966 = vst.msk [vmem:[%s11215_s2 + $0x60] sm:$0xff] %vm5953_vm3, %v7730_v14  ;;  %7743 = vtanh.f32 %v5858_v52  ;;  %v5852_v32 = vadd.f32 %v11035_v11, %v5591_v30  ;;  %v5609_v34 = vadd.f32 %v7634_v39, %v5324_v13  ;;  %v12035_v52 = vld [vmem:[#allocation57_spill] sm:$0xff]  ;;  %v12037_v13 = vld [vmem:[#allocation11_spill] sm:$0xff] }
 0x440   :  { %v7732_v1 = vpop.eup %7731  ;;  %v5602_v19 = vpop.f32.mrf.mxu0  ;;  %v5056_v14 = vadd.f32 %v12037_v13, %v12036_v22 }
 0x441   :  { %5969 = vst.msk [vmem:[%s11215_s2 + $0x78] sm:$0xff] %vm5953_vm3, %v7732_v1  ;;  %7745 = vtanh.f32 %v5852_v32  ;;  %v5870_v31 = vadd.f32 %v11045_v20, %v5609_v34  ;;  %v5603_v28 = vadd.f32 %v5602_v19, %v5316_v0  ;;  %v12026_v20 = vld [vmem:[#allocation22_spill] sm:$0xff]  ;;  %v12038_v34 = vld [vmem:[#allocation53_spill] sm:$0xff] }
 0x442   :  { %v7734_v11 = vpop.eup %7733  ;;  %v7637_v6 = vpop.f32.mrf.mxu0  ;;  %v5049_v3 = vadd.f32 %v12027_v43, %v12026_v20  ;;  %v5388_v63 = vadd.f32 %v12038_v34, %v5063_v61  ;;  %v5380_v49 = vadd.f32 %v12039_v59, %v5056_v14 }
 0x443   :  { %5968 = vst.msk [vmem:[%s11215_s2 + $0x70] sm:$0xff] %vm5953_vm3, %v7734_v11  ;;  %7747 = vtanh.f32 %v5870_v31  ;;  %v5864_v60 = vadd.f32 %v11062_v47, %v5603_v28  ;;  %v5621_v25 = vadd.f32 %v7637_v6, %v5340_v45  ;;  %v5042_v47 = vadd.f32 %v12030_v46, %v12029_v37 }
 0x444   :  { %v7736_v40 = vpop.eup %7735  ;;  %v5614_v23 = vpop.f32.mrf.mxu0  ;;  %v5372_v58 = vadd.f32 %v12032_v51, %v5049_v3 }
 0x445   :  { %5971 = vst.msk [vmem:[%s11215_s2 + $0x88] sm:$0xff] %vm5953_vm3, %v7736_v40  ;;  %7749 = vtanh.f32 %v5864_v60  ;;  %v5882_v26 = vadd.f32 %v7693_v21, %v5621_v25  ;;  %v5615_v41 = vadd.f32 %v5614_v23, %v5332_v8  ;;  %v5364_v30 = vadd.f32 %v12035_v52, %v5042_v47 }
 0x446   :  { %v7738_v53 = vpop.eup %7737  ;;  %v7640_v18 = vpop.f32.mrf.mxu0 }
 0x447   :  { %5970 = vst.msk [vmem:[%s11215_s2 + $0x80] sm:$0xff] %vm5953_vm3, %v7738_v53  ;;  %7751 = vtanh.f32 %v5882_v26  ;;  %v5876_v10 = vadd.f32 %v5875_v29, %v5615_v41  ;;  %v5633_v38 = vadd.f32 %v7640_v18, %v5356_v62  ;;  %v5899_v29 = vpop.f32.mrf.mxu1 }
 0x448   :  { %v7740_v21 = vpop.eup %7739  ;;  %v5626_v27 = vpop.f32.mrf.mxu0 }
 0x449   :  { %5973 = vst.msk [vmem:[%s11215_s2 + $0x98] sm:$0xff] %vm5953_vm3, %v7740_v21  ;;  %7753 = vtanh.f32 %v5876_v10  ;;  %v5894_v24 = vadd.f32 %v7696_v42, %v5633_v38  ;;  %v5627_v15 = vadd.f32 %v5626_v27, %v5348_v12  ;;  %v7702_v1 = vpop.f32.mrf.mxu1 }
 0x44a   :  { %v7742_v9 = vpop.eup %7741  ;;  %v7643_v54 = vpop.f32.mrf.mxu0 }
 0x44b   :  { %5972 = vst.msk [vmem:[%s11215_s2 + $0x90] sm:$0xff] %vm5953_vm3, %v7742_v9  ;;  %7755 = vtanh.f32 %v5894_v24  ;;  %v5888_v36 = vadd.f32 %v5887_v48, %v5627_v15  ;;  %v5645_v55 = vadd.f32 %v7643_v54, %v5372_v58  ;;  %v5911_v6 = vpop.f32.mrf.mxu1 }
 0x44c   :  { %v7744_v7 = vpop.eup %7743  ;;  %v5638_v39 = vpop.f32.mrf.mxu0 }
 0x44d   :  { %5975 = vst.msk [vmem:[%s11215_s2 + $0xa8] sm:$0xff] %vm5953_vm3, %v7744_v7  ;;  %7757 = vtanh.f32 %v5888_v36  ;;  %v5906_v42 = vadd.f32 %v7699_v2, %v5645_v55  ;;  %v5639_v32 = vadd.f32 %v5638_v39, %v5364_v30 }
 0x44e   :  { %v7746_v0 = vpop.eup %7745  ;;  %v7646_v19 = vpop.f32.mrf.mxu0 }
 0x44f   :  { %5974 = vst.msk [vmem:[%s11215_s2 + $0xa0] sm:$0xff] %vm5953_vm3, %v7746_v0  ;;  %7759 = vtanh.f32 %v5906_v42  ;;  %v5900_v57 = vadd.f32 %v5899_v29, %v5639_v32  ;;  %v5657_v45 = vadd.f32 %v7646_v19, %v5388_v63 }
 0x450   :  { %v7748_v56 = vpop.eup %7747  ;;  %v5650_v31 = vpop.f32.mrf.mxu0 }
 0x451   :  { %5977 = vst.msk [vmem:[%s11215_s2 + $0xb8] sm:$0xff] %vm5953_vm3, %v7748_v56  ;;  %7761 = vtanh.f32 %v5900_v57  ;;  %v5918_v28 = vadd.f32 %v7702_v1, %v5657_v45  ;;  %v5651_v11 = vadd.f32 %v5650_v31, %v5380_v49 }
 0x452   :  { %v7750_v48 = vpop.eup %7749 }
 0x453   :  { %5976 = vst.msk [vmem:[%s11215_s2 + $0xb0] sm:$0xff] %vm5953_vm3, %v7750_v48  ;;  %7763 = vtanh.f32 %v5918_v28  ;;  %v5912_v35 = vadd.f32 %v5911_v6, %v5651_v11 }
 0x454   :  { %v7752_v8 = vpop.eup %7751 }
 0x455   :  { %5979 = vst.msk [vmem:[%s11215_s2 + $0xc8] sm:$0xff] %vm5953_vm3, %v7752_v8  ;;  %7765 = vtanh.f32 %v5912_v35 }
 0x456   :  { %v7754_v50 = vpop.eup %7753 }
 0x457   :  { %5978 = vst.msk [vmem:[%s11215_s2 + $0xc0] sm:$0xff] %vm5953_vm3, %v7754_v50 }
 0x458   :  { %v7756_v4 = vpop.eup %7755 }
 0x459   :  { %5981 = vst.msk [vmem:[%s11215_s2 + $0xd8] sm:$0xff] %vm5953_vm3, %v7756_v4 }
 0x45a   :  { %v7758_v5 = vpop.eup %7757 }
 0x45b   :  { %5980 = vst.msk [vmem:[%s11215_s2 + $0xd0] sm:$0xff] %vm5953_vm3, %v7758_v5 }
 0x45c   :  { %v7760_v60 = vpop.eup %7759 }
 0x45d   :  { %5983 = vst.msk [vmem:[%s11215_s2 + $0xe8] sm:$0xff] %vm5953_vm3, %v7760_v60 }
 0x45e   :  { %v7762_v25 = vpop.eup %7761 }
 0x45f   :  { %5982 = vst.msk [vmem:[%s11215_s2 + $0xe0] sm:$0xff] %vm5953_vm3, %v7762_v25 }
 0x460   :  { %v7764_v40 = vpop.eup %7763 }
 0x461   :  { %5985 = vst.msk [vmem:[%s11215_s2 + $0xf8] sm:$0xff] %vm5953_vm3, %v7764_v40 }
 0x462   :  { %v7766_v20 = vpop.eup %7765 }
 0x463   :  { %5984 = vst.msk [vmem:[%s11215_s2 + $0xf0] sm:$0xff] %vm5953_vm3, %v7766_v20 }

</bundles_post_ra>
